<compile_context>
chip_gen: v7x
topology: tpu7x:2x2x1
jax: 0.10.0
libtpu: 0.0.40
codegen_flags: <defaults>
</compile_context>

<pallas_src>
import functools
import math

import jax
import jax.numpy as jnp
from jax import lax
from jax.experimental import pallas as pl
from jax.experimental.pallas import tpu as pltpu

_LANE = 128


def _lstm_fc_kernel(x_ref,       # (T*Bp, I)   time-major, batch-padded input
                    wih0_ref,     # (I,   4Hp)  layer-0 input weights (gate-padded)
                    whh0_ref,     # (Hp,  4Hp)  layer-0 recurrent weights
                    b0_ref,       # (1,   4Hp)  b_ih_l0 + b_hh_l0 (gate-padded)
                    w1_ref,       # (2Hp, 4Hp)  fused [W_ih_l1; W_hh_l1]
                    b1_ref,       # (1,   4Hp)  b_ih_l1 + b_hh_l1
                    wfc_ref,      # (Hp,  PIp)  fc weights (padded)
                    bfc_ref,      # (1,   PIp)
                    out_ref,      # (Bp,  PIp)
                    xg_ref):      # scratch (T*Bp, 4Hp): hoisted x-gates
    TB, _ = x_ref.shape
    Bp = out_ref.shape[0]
    T = TB // Bp
    Hp = whh0_ref.shape[0]
    Hp4 = whh0_ref.shape[1]

    # --- Hoisted input projection for ALL timesteps (one MXU pass), bias folded.
    xg_ref[...] = (jnp.dot(x_ref[...], wih0_ref[...],
                           preferred_element_type=jnp.float32) + b0_ref[...])

    # --- Hoisted bias broadcast for layer 1 (done once, not per step).
    b1_b = jnp.broadcast_to(b1_ref[...], (Bp, Hp4))

    def cell(gates, c):
        # Lane-aligned whole-vreg gate slices (Hp = 128).
        i_g = jax.nn.sigmoid(gates[:, 0 * Hp:1 * Hp])
        f_g = jax.nn.sigmoid(gates[:, 1 * Hp:2 * Hp])
        g_g = jnp.tanh(gates[:, 2 * Hp:3 * Hp])
        o_g = jax.nn.sigmoid(gates[:, 3 * Hp:4 * Hp])
        c_new = f_g * c + i_g * g_g
        h_new = o_g * jnp.tanh(c_new)
        return h_new, c_new

    def step(t, carry):
        h1, c1, h2, c2 = carry
        row = pl.multiple_of(t * Bp, Bp)
        # Layer 0: precomputed x-gates + one recurrent matmul.
        g0 = xg_ref[pl.ds(row, Bp), :] + jnp.dot(
            h1, whh0_ref[...], preferred_element_type=jnp.float32)
        h1, c1 = cell(g0, c1)
        # Layer 1: single fused matmul over concat([h1, h2]) (K = 2*Hp).
        g1 = jnp.dot(jnp.concatenate([h1, h2], axis=1), w1_ref[...],
                     preferred_element_type=jnp.float32) + b1_b
        h2, c2 = cell(g1, c2)
        return (h1, c1, h2, c2)

    zeros = jnp.zeros((Bp, Hp), jnp.float32)
    _, _, h2, _ = lax.fori_loop(0, T, step, (zeros, zeros, zeros, zeros),
                                unroll=True)

    # FC head on the last top-layer hidden state; lane-dense (PIp = 128) store.
    out_ref[...] = (jnp.dot(h2, wfc_ref[...], preferred_element_type=jnp.float32)
                    + bfc_ref[...])


def _full_spec(shape):
    zero = (0,) * len(shape)
    return pl.BlockSpec(shape, lambda: zero)


@functools.partial(jax.jit, static_argnames=("predict_size",))
def lstm_model_forward(x, params, predict_size):
    """x: (batch, window, input_size) float32 -> (batch, predict_size, input_size)."""
    B, T, I = x.shape
    Hp4 = params["whh0"].shape[1]
    PIp = params["wfc"].shape[1]
    PI = predict_size * I

    Bp = max(8, ((B + 7) // 8) * 8)   # pad batch to the f32 sublane tile

    x_tm = jnp.transpose(x, (1, 0, 2)).astype(jnp.float32)     # (T, B, I)
    x_tm = jnp.pad(x_tm, ((0, 0), (0, Bp - B), (0, 0)))        # (T, Bp, I)
    x_flat = x_tm.reshape(T * Bp, I)                           # (T*Bp, I)

    args = (x_flat,
            params["wih0"], params["whh0"], params["b0"],
            params["w1"], params["b1"],
            params["wfc"], params["bfc"])

    out_p = pl.pallas_call(
        _lstm_fc_kernel,
        out_shape=jax.ShapeDtypeStruct((Bp, PIp), jnp.float32),
        in_specs=[_full_spec(a.shape) for a in args],
        out_specs=_full_spec((Bp, PIp)),
        scratch_shapes=[pltpu.VMEM((T * Bp, Hp4), jnp.float32)],
    )(*args)

    return out_p[:B, :PI].reshape(B, predict_size, I)


def init_raw_params(key, input_size=6, hidden_size=64, predict_size=10):
    """PyTorch-layout parameters, uniform(-1/sqrt(H), 1/sqrt(H)) init."""
    H, I, P = hidden_size, input_size, predict_size
    bound = 1.0 / math.sqrt(H)
    ks = jax.random.split(key, 10)

    def u(k, shape):
        return jax.random.uniform(k, shape, jnp.float32, -bound, bound)

    return dict(
        w_ih_l0=u(ks[0], (4 * H, I)), w_hh_l0=u(ks[1], (4 * H, H)),
        b_ih_l0=u(ks[2], (4 * H,)),   b_hh_l0=u(ks[3], (4 * H,)),
        w_ih_l1=u(ks[4], (4 * H, H)), w_hh_l1=u(ks[5], (4 * H, H)),
        b_ih_l1=u(ks[6], (4 * H,)),   b_hh_l1=u(ks[7], (4 * H,)),
        w_fc=u(ks[8], (P * I, H)),    b_fc=u(ks[9], (P * I,)),
    )


def pack_params(raw, hidden_size):
    """Transpose, lane-pad each gate to 128, fuse layer-1 weights, pad fc head."""
    H = hidden_size
    Hp = ((H + _LANE - 1) // _LANE) * _LANE
    PI = raw["w_fc"].shape[0]
    PIp = ((PI + _LANE - 1) // _LANE) * _LANE

    def gate_pad_cols(w_t):
        # (in, 4H) -> (in, 4*Hp): gate k occupies cols [k*Hp, k*Hp+H), rest zero.
        n = w_t.shape[0]
        return jnp.pad(w_t.reshape(n, 4, H),
                       ((0, 0), (0, 0), (0, Hp - H))).reshape(n, 4 * Hp)

    def row_pad(w, rows):
        return jnp.pad(w, ((0, rows - w.shape[0]), (0, 0)))

    wih0 = gate_pad_cols(raw["w_ih_l0"].T)                           # (I, 4Hp)
    whh0 = row_pad(gate_pad_cols(raw["w_hh_l0"].T), Hp)              # (Hp, 4Hp)
    b0 = gate_pad_cols((raw["b_ih_l0"] + raw["b_hh_l0"])[None, :])   # (1, 4Hp)
    wih1 = row_pad(gate_pad_cols(raw["w_ih_l1"].T), Hp)              # (Hp, 4Hp)
    whh1 = row_pad(gate_pad_cols(raw["w_hh_l1"].T), Hp)              # (Hp, 4Hp)
    w1 = jnp.concatenate([wih1, whh1], axis=0)                       # (2Hp, 4Hp)
    b1 = gate_pad_cols((raw["b_ih_l1"] + raw["b_hh_l1"])[None, :])   # (1, 4Hp)
    wfc = jnp.pad(raw["w_fc"].T, ((0, Hp - H), (0, PIp - PI)))       # (Hp, PIp)
    bfc = jnp.pad(raw["b_fc"][None, :], ((0, 0), (0, PIp - PI)))     # (1, PIp)

    return dict(wih0=wih0, whh0=whh0, b0=b0, w1=w1, b1=b1, wfc=wfc, bfc=bfc)


def _reference_forward(x, raw, predict_size):
    """Pure-JAX reference (PyTorch semantics, unpadded weights)."""
    B, T, I = x.shape
    H = raw["w_hh_l0"].shape[1]

    def cell(xt, h, c, w_ih, w_hh, b_ih, b_hh):
        g = xt @ w_ih.T + b_ih + h @ w_hh.T + b_hh
        i_g = jax.nn.sigmoid(g[:, 0 * H:1 * H])
        f_g = jax.nn.sigmoid(g[:, 1 * H:2 * H])
        g_g = jnp.tanh(g[:, 2 * H:3 * H])
        o_g = jax.nn.sigmoid(g[:, 3 * H:4 * H])
        c_new = f_g * c + i_g * g_g
        return o_g * jnp.tanh(c_new), c_new

    def step(carry, xt):
        h1, c1, h2, c2 = carry
        h1, c1 = cell(xt, h1, c1, raw["w_ih_l0"], raw["w_hh_l0"],
                      raw["b_ih_l0"], raw["b_hh_l0"])
        h2, c2 = cell(h1, h2, c2, raw["w_ih_l1"], raw["w_hh_l1"],
                      raw["b_ih_l1"], raw["b_hh_l1"])
        return (h1, c1, h2, c2), None

    z = jnp.zeros((B, H), jnp.float32)
    (_, _, h2, _), _ = lax.scan(step, (z, z, z, z), jnp.transpose(x, (1, 0, 2)))
    out = h2 @ raw["w_fc"].T + raw["b_fc"]
    return out.reshape(B, predict_size, I)


if __name__ == "__main__":
    key = jax.random.PRNGKey(0)
    k_x, k_p = jax.random.split(key)

    batch, window, input_size = 2, 8, 6
    hidden_size, predict_size = 64, 10

    x = jax.random.normal(k_x, (batch, window, input_size), jnp.float32)
    raw = init_raw_params(k_p, input_size=input_size,
                          hidden_size=hidden_size, predict_size=predict_size)
    params = pack_params(raw, hidden_size)

    out = lstm_model_forward(x, params, predict_size)
    out = jax.block_until_ready(out)

    assert out.shape == (batch, predict_size, input_size), out.shape

    ref = _reference_forward(x, raw, predict_size)
    assert jnp.allclose(out, ref, atol=1e-4, rtol=1e-4), \
        float(jnp.max(jnp.abs(out - ref)))

    print("KERNEL_OK")
</pallas_src>

<mosaic_0001>
module attributes {stable_mosaic.version = 11 : i64} {
  func.func @_lstm_fc_kernel(%arg0: memref<64x6xf32, #tpu.memory_space<vmem>>, %arg1: memref<6x512xf32, #tpu.memory_space<vmem>>, %arg2: memref<128x512xf32, #tpu.memory_space<vmem>>, %arg3: memref<1x512xf32, #tpu.memory_space<vmem>>, %arg4: memref<256x512xf32, #tpu.memory_space<vmem>>, %arg5: memref<1x512xf32, #tpu.memory_space<vmem>>, %arg6: memref<128x128xf32, #tpu.memory_space<vmem>>, %arg7: memref<1x128xf32, #tpu.memory_space<vmem>>, %arg8: memref<8x128xf32, #tpu.memory_space<vmem>>, %arg9: memref<64x512xf32, #tpu.memory_space<vmem>>) attributes {dimension_semantics = [], scalar_prefetch = 0 : i64, scratch_operands = 1 : i64, tpu.core_type = #tpu.core_type<tc>} {
    %c0 = arith.constant 0 : index
    %c0_0 = arith.constant 0 : index
    %0 = vector.load %arg0[%c0, %c0_0] : memref<64x6xf32, #tpu.memory_space<vmem>>, vector<64x6xf32>
    %c0_1 = arith.constant 0 : index
    %c0_2 = arith.constant 0 : index
    %1 = vector.load %arg1[%c0_1, %c0_2] : memref<6x512xf32, #tpu.memory_space<vmem>>, vector<6x512xf32>
    %cst = arith.constant dense<0.000000e+00> : vector<64x512xf32>
    %2 = tpu.matmul %0, %1, %cst {dimension_numbers = #tpu.dot_dimension_numbers<[1], [0], [0], [1], [0, 0, 1, 1], [], []>} : vector<64x6xf32>, vector<6x512xf32>, vector<64x512xf32> -> vector<64x512xf32>
    %c0_3 = arith.constant 0 : index
    %c0_4 = arith.constant 0 : index
    %3 = vector.load %arg3[%c0_3, %c0_4] : memref<1x512xf32, #tpu.memory_space<vmem>>, vector<1x512xf32>
    %4 = vector.broadcast %3 : vector<1x512xf32> to vector<64x512xf32>
    %5 = arith.addf %2, %4 : vector<64x512xf32>
    %c0_5 = arith.constant 0 : index
    %c0_6 = arith.constant 0 : index
    %6 = vector.load %arg9[%c0_5, %c0_6] : memref<64x512xf32, #tpu.memory_space<vmem>>, vector<64x512xf32>
    tpu.vector_store %arg9[%c0_5, %c0_6], %5 {strides = array<i32>} : memref<64x512xf32, #tpu.memory_space<vmem>>, vector<64x512xf32>,
    %c0_7 = arith.constant 0 : index
    %c0_8 = arith.constant 0 : index
    %7 = vector.load %arg5[%c0_7, %c0_8] : memref<1x512xf32, #tpu.memory_space<vmem>>, vector<1x512xf32>
    %8 = vector.shape_cast %7 : vector<1x512xf32> to vector<1x512xf32>
    %9 = vector.broadcast %8 : vector<1x512xf32> to vector<8x512xf32>
    %cst_9 = arith.constant 0.000000e+00 : f32
    %10 = vector.broadcast %cst_9 : f32 to vector<8x128xf32>
    %c0_i32 = arith.constant 0 : i32
    %c8_i32 = arith.constant 8 : i32
    %11 = arith.muli %c0_i32, %c8_i32 : i32
    %12 = tpu.assume_multiple %11, 8 : i32
    %13 = arith.index_cast %12 : i32 to index
    %c0_10 = arith.constant 0 : index
    %14 = vector.load %arg9[%13, %c0_10] : memref<64x512xf32, #tpu.memory_space<vmem>>, vector<8x512xf32>
    %c0_11 = arith.constant 0 : index
    %c0_12 = arith.constant 0 : index
    %15 = vector.load %arg2[%c0_11, %c0_12] : memref<128x512xf32, #tpu.memory_space<vmem>>, vector<128x512xf32>
    %cst_13 = arith.constant dense<0.000000e+00> : vector<8x512xf32>
    %16 = tpu.matmul %10, %15, %cst_13 {dimension_numbers = #tpu.dot_dimension_numbers<[1], [0], [0], [1], [0, 0, 1, 1], [], []>} : vector<8x128xf32>, vector<128x512xf32>, vector<8x512xf32> -> vector<8x512xf32>
    %17 = arith.addf %14, %16 : vector<8x512xf32>
    %18 = vector.extract_strided_slice %17 {offsets = [0, 0], sizes = [8, 128], strides = [1, 1]} : vector<8x512xf32> to vector<8x128xf32>
    %19 = arith.negf %18 : vector<8x128xf32>
    %20 = math.exp %19 : vector<8x128xf32>
    %cst_14 = arith.constant 1.000000e+00 : f32
    %21 = vector.broadcast %cst_14 : f32 to vector<8x128xf32>
    %22 = arith.addf %21, %20 : vector<8x128xf32>
    %23 = arith.divf %21, %22 : vector<8x128xf32>
    %24 = vector.extract_strided_slice %17 {offsets = [0, 128], sizes = [8, 128], strides = [1, 1]} : vector<8x512xf32> to vector<8x128xf32>
    %25 = arith.negf %24 : vector<8x128xf32>
    %26 = math.exp %25 : vector<8x128xf32>
    %cst_15 = arith.constant 1.000000e+00 : f32
    %27 = vector.broadcast %cst_15 : f32 to vector<8x128xf32>
    %28 = arith.addf %27, %26 : vector<8x128xf32>
    %29 = arith.divf %27, %28 : vector<8x128xf32>
    %30 = vector.extract_strided_slice %17 {offsets = [0, 256], sizes = [8, 128], strides = [1, 1]} : vector<8x512xf32> to vector<8x128xf32>
    %31 = math.tanh %30 : vector<8x128xf32>
    %32 = vector.extract_strided_slice %17 {offsets = [0, 384], sizes = [8, 128], strides = [1, 1]} : vector<8x512xf32> to vector<8x128xf32>
    %33 = arith.negf %32 : vector<8x128xf32>
    %34 = math.exp %33 : vector<8x128xf32>
    %cst_16 = arith.constant 1.000000e+00 : f32
    %35 = vector.broadcast %cst_16 : f32 to vector<8x128xf32>
    %36 = arith.addf %35, %34 : vector<8x128xf32>
    %37 = arith.divf %35, %36 : vector<8x128xf32>
    %38 = arith.mulf %29, %10 : vector<8x128xf32>
    %39 = arith.mulf %23, %31 : vector<8x128xf32>
    %40 = arith.addf %38, %39 : vector<8x128xf32>
    %41 = math.tanh %40 : vector<8x128xf32>
    %42 = arith.mulf %37, %41 : vector<8x128xf32>
    %43 = tpu.concatenate %42, %10 in 1 : vector<8x128xf32>, vector<8x128xf32> -> vector<8x256xf32>
    %c0_17 = arith.constant 0 : index
    %c0_18 = arith.constant 0 : index
    %44 = vector.load %arg4[%c0_17, %c0_18] : memref<256x512xf32, #tpu.memory_space<vmem>>, vector<256x512xf32>
    %cst_19 = arith.constant dense<0.000000e+00> : vector<8x512xf32>
    %45 = tpu.matmul %43, %44, %cst_19 {dimension_numbers = #tpu.dot_dimension_numbers<[1], [0], [0], [1], [0, 0, 1, 1], [], []>} : vector<8x256xf32>, vector<256x512xf32>, vector<8x512xf32> -> vector<8x512xf32>
    %46 = arith.addf %45, %9 : vector<8x512xf32>
    %47 = vector.extract_strided_slice %46 {offsets = [0, 0], sizes = [8, 128], strides = [1, 1]} : vector<8x512xf32> to vector<8x128xf32>
    %48 = arith.negf %47 : vector<8x128xf32>
    %49 = math.exp %48 : vector<8x128xf32>
    %cst_20 = arith.constant 1.000000e+00 : f32
    %50 = vector.broadcast %cst_20 : f32 to vector<8x128xf32>
    %51 = arith.addf %50, %49 : vector<8x128xf32>
    %52 = arith.divf %50, %51 : vector<8x128xf32>
    %53 = vector.extract_strided_slice %46 {offsets = [0, 128], sizes = [8, 128], strides = [1, 1]} : vector<8x512xf32> to vector<8x128xf32>
    %54 = arith.negf %53 : vector<8x128xf32>
    %55 = math.exp %54 : vector<8x128xf32>
    %cst_21 = arith.constant 1.000000e+00 : f32
    %56 = vector.broadcast %cst_21 : f32 to vector<8x128xf32>
    %57 = arith.addf %56, %55 : vector<8x128xf32>
    %58 = arith.divf %56, %57 : vector<8x128xf32>
    %59 = vector.extract_strided_slice %46 {offsets = [0, 256], sizes = [8, 128], strides = [1, 1]} : vector<8x512xf32> to vector<8x128xf32>
    %60 = math.tanh %59 : vector<8x128xf32>
    %61 = vector.extract_strided_slice %46 {offsets = [0, 384], sizes = [8, 128], strides = [1, 1]} : vector<8x512xf32> to vector<8x128xf32>
    %62 = arith.negf %61 : vector<8x128xf32>
    %63 = math.exp %62 : vector<8x128xf32>
    %cst_22 = arith.constant 1.000000e+00 : f32
    %64 = vector.broadcast %cst_22 : f32 to vector<8x128xf32>
    %65 = arith.addf %64, %63 : vector<8x128xf32>
    %66 = arith.divf %64, %65 : vector<8x128xf32>
    %67 = arith.mulf %58, %10 : vector<8x128xf32>
    %68 = arith.mulf %52, %60 : vector<8x128xf32>
    %69 = arith.addf %67, %68 : vector<8x128xf32>
    %70 = math.tanh %69 : vector<8x128xf32>
    %71 = arith.mulf %66, %70 : vector<8x128xf32>
    %c1_i32 = arith.constant 1 : i32
    %c8_i32_23 = arith.constant 8 : i32
    %72 = arith.muli %c1_i32, %c8_i32_23 : i32
    %73 = tpu.assume_multiple %72, 8 : i32
    %74 = arith.index_cast %73 : i32 to index
    %c0_24 = arith.constant 0 : index
    %75 = vector.load %arg9[%74, %c0_24] : memref<64x512xf32, #tpu.memory_space<vmem>>, vector<8x512xf32>
    %c0_25 = arith.constant 0 : index
    %c0_26 = arith.constant 0 : index
    %76 = vector.load %arg2[%c0_25, %c0_26] : memref<128x512xf32, #tpu.memory_space<vmem>>, vector<128x512xf32>
    %cst_27 = arith.constant dense<0.000000e+00> : vector<8x512xf32>
    %77 = tpu.matmul %42, %76, %cst_27 {dimension_numbers = #tpu.dot_dimension_numbers<[1], [0], [0], [1], [0, 0, 1, 1], [], []>} : vector<8x128xf32>, vector<128x512xf32>, vector<8x512xf32> -> vector<8x512xf32>
    %78 = arith.addf %75, %77 : vector<8x512xf32>
    %79 = vector.extract_strided_slice %78 {offsets = [0, 0], sizes = [8, 128], strides = [1, 1]} : vector<8x512xf32> to vector<8x128xf32>
    %80 = arith.negf %79 : vector<8x128xf32>
    %81 = math.exp %80 : vector<8x128xf32>
    %cst_28 = arith.constant 1.000000e+00 : f32
    %82 = vector.broadcast %cst_28 : f32 to vector<8x128xf32>
    %83 = arith.addf %82, %81 : vector<8x128xf32>
    %84 = arith.divf %82, %83 : vector<8x128xf32>
    %85 = vector.extract_strided_slice %78 {offsets = [0, 128], sizes = [8, 128], strides = [1, 1]} : vector<8x512xf32> to vector<8x128xf32>
    %86 = arith.negf %85 : vector<8x128xf32>
    %87 = math.exp %86 : vector<8x128xf32>
    %cst_29 = arith.constant 1.000000e+00 : f32
    %88 = vector.broadcast %cst_29 : f32 to vector<8x128xf32>
    %89 = arith.addf %88, %87 : vector<8x128xf32>
    %90 = arith.divf %88, %89 : vector<8x128xf32>
    %91 = vector.extract_strided_slice %78 {offsets = [0, 256], sizes = [8, 128], strides = [1, 1]} : vector<8x512xf32> to vector<8x128xf32>
    %92 = math.tanh %91 : vector<8x128xf32>
    %93 = vector.extract_strided_slice %78 {offsets = [0, 384], sizes = [8, 128], strides = [1, 1]} : vector<8x512xf32> to vector<8x128xf32>
    %94 = arith.negf %93 : vector<8x128xf32>
    %95 = math.exp %94 : vector<8x128xf32>
    %cst_30 = arith.constant 1.000000e+00 : f32
    %96 = vector.broadcast %cst_30 : f32 to vector<8x128xf32>
    %97 = arith.addf %96, %95 : vector<8x128xf32>
    %98 = arith.divf %96, %97 : vector<8x128xf32>
    %99 = arith.mulf %90, %40 : vector<8x128xf32>
    %100 = arith.mulf %84, %92 : vector<8x128xf32>
    %101 = arith.addf %99, %100 : vector<8x128xf32>
    %102 = math.tanh %101 : vector<8x128xf32>
    %103 = arith.mulf %98, %102 : vector<8x128xf32>
    %104 = tpu.concatenate %103, %71 in 1 : vector<8x128xf32>, vector<8x128xf32> -> vector<8x256xf32>
    %c0_31 = arith.constant 0 : index
    %c0_32 = arith.constant 0 : index
    %105 = vector.load %arg4[%c0_31, %c0_32] : memref<256x512xf32, #tpu.memory_space<vmem>>, vector<256x512xf32>
    %cst_33 = arith.constant dense<0.000000e+00> : vector<8x512xf32>
    %106 = tpu.matmul %104, %105, %cst_33 {dimension_numbers = #tpu.dot_dimension_numbers<[1], [0], [0], [1], [0, 0, 1, 1], [], []>} : vector<8x256xf32>, vector<256x512xf32>, vector<8x512xf32> -> vector<8x512xf32>
    %107 = arith.addf %106, %9 : vector<8x512xf32>
    %108 = vector.extract_strided_slice %107 {offsets = [0, 0], sizes = [8, 128], strides = [1, 1]} : vector<8x512xf32> to vector<8x128xf32>
    %109 = arith.negf %108 : vector<8x128xf32>
    %110 = math.exp %109 : vector<8x128xf32>
    %cst_34 = arith.constant 1.000000e+00 : f32
    %111 = vector.broadcast %cst_34 : f32 to vector<8x128xf32>
    %112 = arith.addf %111, %110 : vector<8x128xf32>
    %113 = arith.divf %111, %112 : vector<8x128xf32>
    %114 = vector.extract_strided_slice %107 {offsets = [0, 128], sizes = [8, 128], strides = [1, 1]} : vector<8x512xf32> to vector<8x128xf32>
    %115 = arith.negf %114 : vector<8x128xf32>
    %116 = math.exp %115 : vector<8x128xf32>
    %cst_35 = arith.constant 1.000000e+00 : f32
    %117 = vector.broadcast %cst_35 : f32 to vector<8x128xf32>
    %118 = arith.addf %117, %116 : vector<8x128xf32>
    %119 = arith.divf %117, %118 : vector<8x128xf32>
    %120 = vector.extract_strided_slice %107 {offsets = [0, 256], sizes = [8, 128], strides = [1, 1]} : vector<8x512xf32> to vector<8x128xf32>
    %121 = math.tanh %120 : vector<8x128xf32>
    %122 = vector.extract_strided_slice %107 {offsets = [0, 384], sizes = [8, 128], strides = [1, 1]} : vector<8x512xf32> to vector<8x128xf32>
    %123 = arith.negf %122 : vector<8x128xf32>
    %124 = math.exp %123 : vector<8x128xf32>
    %cst_36 = arith.constant 1.000000e+00 : f32
    %125 = vector.broadcast %cst_36 : f32 to vector<8x128xf32>
    %126 = arith.addf %125, %124 : vector<8x128xf32>
    %127 = arith.divf %125, %126 : vector<8x128xf32>
    %128 = arith.mulf %119, %69 : vector<8x128xf32>
    %129 = arith.mulf %113, %121 : vector<8x128xf32>
    %130 = arith.addf %128, %129 : vector<8x128xf32>
    %131 = math.tanh %130 : vector<8x128xf32>
    %132 = arith.mulf %127, %131 : vector<8x128xf32>
    %c2_i32 = arith.constant 2 : i32
    %c8_i32_37 = arith.constant 8 : i32
    %133 = arith.muli %c2_i32, %c8_i32_37 : i32
    %134 = tpu.assume_multiple %133, 8 : i32
    %135 = arith.index_cast %134 : i32 to index
    %c0_38 = arith.constant 0 : index
    %136 = vector.load %arg9[%135, %c0_38] : memref<64x512xf32, #tpu.memory_space<vmem>>, vector<8x512xf32>
    %c0_39 = arith.constant 0 : index
    %c0_40 = arith.constant 0 : index
    %137 = vector.load %arg2[%c0_39, %c0_40] : memref<128x512xf32, #tpu.memory_space<vmem>>, vector<128x512xf32>
    %cst_41 = arith.constant dense<0.000000e+00> : vector<8x512xf32>
    %138 = tpu.matmul %103, %137, %cst_41 {dimension_numbers = #tpu.dot_dimension_numbers<[1], [0], [0], [1], [0, 0, 1, 1], [], []>} : vector<8x128xf32>, vector<128x512xf32>, vector<8x512xf32> -> vector<8x512xf32>
    %139 = arith.addf %136, %138 : vector<8x512xf32>
    %140 = vector.extract_strided_slice %139 {offsets = [0, 0], sizes = [8, 128], strides = [1, 1]} : vector<8x512xf32> to vector<8x128xf32>
    %141 = arith.negf %140 : vector<8x128xf32>
    %142 = math.exp %141 : vector<8x128xf32>
    %cst_42 = arith.constant 1.000000e+00 : f32
    %143 = vector.broadcast %cst_42 : f32 to vector<8x128xf32>
    %144 = arith.addf %143, %142 : vector<8x128xf32>
    %145 = arith.divf %143, %144 : vector<8x128xf32>
    %146 = vector.extract_strided_slice %139 {offsets = [0, 128], sizes = [8, 128], strides = [1, 1]} : vector<8x512xf32> to vector<8x128xf32>
    %147 = arith.negf %146 : vector<8x128xf32>
    %148 = math.exp %147 : vector<8x128xf32>
    %cst_43 = arith.constant 1.000000e+00 : f32
    %149 = vector.broadcast %cst_43 : f32 to vector<8x128xf32>
    %150 = arith.addf %149, %148 : vector<8x128xf32>
    %151 = arith.divf %149, %150 : vector<8x128xf32>
    %152 = vector.extract_strided_slice %139 {offsets = [0, 256], sizes = [8, 128], strides = [1, 1]} : vector<8x512xf32> to vector<8x128xf32>
    %153 = math.tanh %152 : vector<8x128xf32>
    %154 = vector.extract_strided_slice %139 {offsets = [0, 384], sizes = [8, 128], strides = [1, 1]} : vector<8x512xf32> to vector<8x128xf32>
    %155 = arith.negf %154 : vector<8x128xf32>
    %156 = math.exp %155 : vector<8x128xf32>
    %cst_44 = arith.constant 1.000000e+00 : f32
    %157 = vector.broadcast %cst_44 : f32 to vector<8x128xf32>
    %158 = arith.addf %157, %156 : vector<8x128xf32>
    %159 = arith.divf %157, %158 : vector<8x128xf32>
    %160 = arith.mulf %151, %101 : vector<8x128xf32>
    %161 = arith.mulf %145, %153 : vector<8x128xf32>
    %162 = arith.addf %160, %161 : vector<8x128xf32>
    %163 = math.tanh %162 : vector<8x128xf32>
    %164 = arith.mulf %159, %163 : vector<8x128xf32>
    %165 = tpu.concatenate %164, %132 in 1 : vector<8x128xf32>, vector<8x128xf32> -> vector<8x256xf32>
    %c0_45 = arith.constant 0 : index
    %c0_46 = arith.constant 0 : index
    %166 = vector.load %arg4[%c0_45, %c0_46] : memref<256x512xf32, #tpu.memory_space<vmem>>, vector<256x512xf32>
    %cst_47 = arith.constant dense<0.000000e+00> : vector<8x512xf32>
    %167 = tpu.matmul %165, %166, %cst_47 {dimension_numbers = #tpu.dot_dimension_numbers<[1], [0], [0], [1], [0, 0, 1, 1], [], []>} : vector<8x256xf32>, vector<256x512xf32>, vector<8x512xf32> -> vector<8x512xf32>
    %168 = arith.addf %167, %9 : vector<8x512xf32>
    %169 = vector.extract_strided_slice %168 {offsets = [0, 0], sizes = [8, 128], strides = [1, 1]} : vector<8x512xf32> to vector<8x128xf32>
    %170 = arith.negf %169 : vector<8x128xf32>
    %171 = math.exp %170 : vector<8x128xf32>
    %cst_48 = arith.constant 1.000000e+00 : f32
    %172 = vector.broadcast %cst_48 : f32 to vector<8x128xf32>
    %173 = arith.addf %172, %171 : vector<8x128xf32>
    %174 = arith.divf %172, %173 : vector<8x128xf32>
    %175 = vector.extract_strided_slice %168 {offsets = [0, 128], sizes = [8, 128], strides = [1, 1]} : vector<8x512xf32> to vector<8x128xf32>
    %176 = arith.negf %175 : vector<8x128xf32>
    %177 = math.exp %176 : vector<8x128xf32>
    %cst_49 = arith.constant 1.000000e+00 : f32
    %178 = vector.broadcast %cst_49 : f32 to vector<8x128xf32>
    %179 = arith.addf %178, %177 : vector<8x128xf32>
    %180 = arith.divf %178, %179 : vector<8x128xf32>
    %181 = vector.extract_strided_slice %168 {offsets = [0, 256], sizes = [8, 128], strides = [1, 1]} : vector<8x512xf32> to vector<8x128xf32>
    %182 = math.tanh %181 : vector<8x128xf32>
    %183 = vector.extract_strided_slice %168 {offsets = [0, 384], sizes = [8, 128], strides = [1, 1]} : vector<8x512xf32> to vector<8x128xf32>
    %184 = arith.negf %183 : vector<8x128xf32>
    %185 = math.exp %184 : vector<8x128xf32>
    %cst_50 = arith.constant 1.000000e+00 : f32
    %186 = vector.broadcast %cst_50 : f32 to vector<8x128xf32>
    %187 = arith.addf %186, %185 : vector<8x128xf32>
    %188 = arith.divf %186, %187 : vector<8x128xf32>
    %189 = arith.mulf %180, %130 : vector<8x128xf32>
    %190 = arith.mulf %174, %182 : vector<8x128xf32>
    %191 = arith.addf %189, %190 : vector<8x128xf32>
    %192 = math.tanh %191 : vector<8x128xf32>
    %193 = arith.mulf %188, %192 : vector<8x128xf32>
    %c3_i32 = arith.constant 3 : i32
    %c8_i32_51 = arith.constant 8 : i32
    %194 = arith.muli %c3_i32, %c8_i32_51 : i32
    %195 = tpu.assume_multiple %194, 8 : i32
    %196 = arith.index_cast %195 : i32 to index
    %c0_52 = arith.constant 0 : index
    %197 = vector.load %arg9[%196, %c0_52] : memref<64x512xf32, #tpu.memory_space<vmem>>, vector<8x512xf32>
    %c0_53 = arith.constant 0 : index
    %c0_54 = arith.constant 0 : index
    %198 = vector.load %arg2[%c0_53, %c0_54] : memref<128x512xf32, #tpu.memory_space<vmem>>, vector<128x512xf32>
    %cst_55 = arith.constant dense<0.000000e+00> : vector<8x512xf32>
    %199 = tpu.matmul %164, %198, %cst_55 {dimension_numbers = #tpu.dot_dimension_numbers<[1], [0], [0], [1], [0, 0, 1, 1], [], []>} : vector<8x128xf32>, vector<128x512xf32>, vector<8x512xf32> -> vector<8x512xf32>
    %200 = arith.addf %197, %199 : vector<8x512xf32>
    %201 = vector.extract_strided_slice %200 {offsets = [0, 0], sizes = [8, 128], strides = [1, 1]} : vector<8x512xf32> to vector<8x128xf32>
    %202 = arith.negf %201 : vector<8x128xf32>
    %203 = math.exp %202 : vector<8x128xf32>
    %cst_56 = arith.constant 1.000000e+00 : f32
    %204 = vector.broadcast %cst_56 : f32 to vector<8x128xf32>
    %205 = arith.addf %204, %203 : vector<8x128xf32>
    %206 = arith.divf %204, %205 : vector<8x128xf32>
    %207 = vector.extract_strided_slice %200 {offsets = [0, 128], sizes = [8, 128], strides = [1, 1]} : vector<8x512xf32> to vector<8x128xf32>
    %208 = arith.negf %207 : vector<8x128xf32>
    %209 = math.exp %208 : vector<8x128xf32>
    %cst_57 = arith.constant 1.000000e+00 : f32
    %210 = vector.broadcast %cst_57 : f32 to vector<8x128xf32>
    %211 = arith.addf %210, %209 : vector<8x128xf32>
    %212 = arith.divf %210, %211 : vector<8x128xf32>
    %213 = vector.extract_strided_slice %200 {offsets = [0, 256], sizes = [8, 128], strides = [1, 1]} : vector<8x512xf32> to vector<8x128xf32>
    %214 = math.tanh %213 : vector<8x128xf32>
    %215 = vector.extract_strided_slice %200 {offsets = [0, 384], sizes = [8, 128], strides = [1, 1]} : vector<8x512xf32> to vector<8x128xf32>
    %216 = arith.negf %215 : vector<8x128xf32>
    %217 = math.exp %216 : vector<8x128xf32>
    %cst_58 = arith.constant 1.000000e+00 : f32
    %218 = vector.broadcast %cst_58 : f32 to vector<8x128xf32>
    %219 = arith.addf %218, %217 : vector<8x128xf32>
    %220 = arith.divf %218, %219 : vector<8x128xf32>
    %221 = arith.mulf %212, %162 : vector<8x128xf32>
    %222 = arith.mulf %206, %214 : vector<8x128xf32>
    %223 = arith.addf %221, %222 : vector<8x128xf32>
    %224 = math.tanh %223 : vector<8x128xf32>
    %225 = arith.mulf %220, %224 : vector<8x128xf32>
    %226 = tpu.concatenate %225, %193 in 1 : vector<8x128xf32>, vector<8x128xf32> -> vector<8x256xf32>
    %c0_59 = arith.constant 0 : index
    %c0_60 = arith.constant 0 : index
    %227 = vector.load %arg4[%c0_59, %c0_60] : memref<256x512xf32, #tpu.memory_space<vmem>>, vector<256x512xf32>
    %cst_61 = arith.constant dense<0.000000e+00> : vector<8x512xf32>
    %228 = tpu.matmul %226, %227, %cst_61 {dimension_numbers = #tpu.dot_dimension_numbers<[1], [0], [0], [1], [0, 0, 1, 1], [], []>} : vector<8x256xf32>, vector<256x512xf32>, vector<8x512xf32> -> vector<8x512xf32>
    %229 = arith.addf %228, %9 : vector<8x512xf32>
    %230 = vector.extract_strided_slice %229 {offsets = [0, 0], sizes = [8, 128], strides = [1, 1]} : vector<8x512xf32> to vector<8x128xf32>
    %231 = arith.negf %230 : vector<8x128xf32>
    %232 = math.exp %231 : vector<8x128xf32>
    %cst_62 = arith.constant 1.000000e+00 : f32
    %233 = vector.broadcast %cst_62 : f32 to vector<8x128xf32>
    %234 = arith.addf %233, %232 : vector<8x128xf32>
    %235 = arith.divf %233, %234 : vector<8x128xf32>
    %236 = vector.extract_strided_slice %229 {offsets = [0, 128], sizes = [8, 128], strides = [1, 1]} : vector<8x512xf32> to vector<8x128xf32>
    %237 = arith.negf %236 : vector<8x128xf32>
    %238 = math.exp %237 : vector<8x128xf32>
    %cst_63 = arith.constant 1.000000e+00 : f32
    %239 = vector.broadcast %cst_63 : f32 to vector<8x128xf32>
    %240 = arith.addf %239, %238 : vector<8x128xf32>
    %241 = arith.divf %239, %240 : vector<8x128xf32>
    %242 = vector.extract_strided_slice %229 {offsets = [0, 256], sizes = [8, 128], strides = [1, 1]} : vector<8x512xf32> to vector<8x128xf32>
    %243 = math.tanh %242 : vector<8x128xf32>
    %244 = vector.extract_strided_slice %229 {offsets = [0, 384], sizes = [8, 128], strides = [1, 1]} : vector<8x512xf32> to vector<8x128xf32>
    %245 = arith.negf %244 : vector<8x128xf32>
    %246 = math.exp %245 : vector<8x128xf32>
    %cst_64 = arith.constant 1.000000e+00 : f32
    %247 = vector.broadcast %cst_64 : f32 to vector<8x128xf32>
    %248 = arith.addf %247, %246 : vector<8x128xf32>
    %249 = arith.divf %247, %248 : vector<8x128xf32>
    %250 = arith.mulf %241, %191 : vector<8x128xf32>
    %251 = arith.mulf %235, %243 : vector<8x128xf32>
    %252 = arith.addf %250, %251 : vector<8x128xf32>
    %253 = math.tanh %252 : vector<8x128xf32>
    %254 = arith.mulf %249, %253 : vector<8x128xf32>
    %c4_i32 = arith.constant 4 : i32
    %c8_i32_65 = arith.constant 8 : i32
    %255 = arith.muli %c4_i32, %c8_i32_65 : i32
    %256 = tpu.assume_multiple %255, 8 : i32
    %257 = arith.index_cast %256 : i32 to index
    %c0_66 = arith.constant 0 : index
    %258 = vector.load %arg9[%257, %c0_66] : memref<64x512xf32, #tpu.memory_space<vmem>>, vector<8x512xf32>
    %c0_67 = arith.constant 0 : index
    %c0_68 = arith.constant 0 : index
    %259 = vector.load %arg2[%c0_67, %c0_68] : memref<128x512xf32, #tpu.memory_space<vmem>>, vector<128x512xf32>
    %cst_69 = arith.constant dense<0.000000e+00> : vector<8x512xf32>
    %260 = tpu.matmul %225, %259, %cst_69 {dimension_numbers = #tpu.dot_dimension_numbers<[1], [0], [0], [1], [0, 0, 1, 1], [], []>} : vector<8x128xf32>, vector<128x512xf32>, vector<8x512xf32> -> vector<8x512xf32>
    %261 = arith.addf %258, %260 : vector<8x512xf32>
    %262 = vector.extract_strided_slice %261 {offsets = [0, 0], sizes = [8, 128], strides = [1, 1]} : vector<8x512xf32> to vector<8x128xf32>
    %263 = arith.negf %262 : vector<8x128xf32>
    %264 = math.exp %263 : vector<8x128xf32>
    %cst_70 = arith.constant 1.000000e+00 : f32
    %265 = vector.broadcast %cst_70 : f32 to vector<8x128xf32>
    %266 = arith.addf %265, %264 : vector<8x128xf32>
    %267 = arith.divf %265, %266 : vector<8x128xf32>
    %268 = vector.extract_strided_slice %261 {offsets = [0, 128], sizes = [8, 128], strides = [1, 1]} : vector<8x512xf32> to vector<8x128xf32>
    %269 = arith.negf %268 : vector<8x128xf32>
    %270 = math.exp %269 : vector<8x128xf32>
    %cst_71 = arith.constant 1.000000e+00 : f32
    %271 = vector.broadcast %cst_71 : f32 to vector<8x128xf32>
    %272 = arith.addf %271, %270 : vector<8x128xf32>
    %273 = arith.divf %271, %272 : vector<8x128xf32>
    %274 = vector.extract_strided_slice %261 {offsets = [0, 256], sizes = [8, 128], strides = [1, 1]} : vector<8x512xf32> to vector<8x128xf32>
    %275 = math.tanh %274 : vector<8x128xf32>
    %276 = vector.extract_strided_slice %261 {offsets = [0, 384], sizes = [8, 128], strides = [1, 1]} : vector<8x512xf32> to vector<8x128xf32>
    %277 = arith.negf %276 : vector<8x128xf32>
    %278 = math.exp %277 : vector<8x128xf32>
    %cst_72 = arith.constant 1.000000e+00 : f32
    %279 = vector.broadcast %cst_72 : f32 to vector<8x128xf32>
    %280 = arith.addf %279, %278 : vector<8x128xf32>
    %281 = arith.divf %279, %280 : vector<8x128xf32>
    %282 = arith.mulf %273, %223 : vector<8x128xf32>
    %283 = arith.mulf %267, %275 : vector<8x128xf32>
    %284 = arith.addf %282, %283 : vector<8x128xf32>
    %285 = math.tanh %284 : vector<8x128xf32>
    %286 = arith.mulf %281, %285 : vector<8x128xf32>
    %287 = tpu.concatenate %286, %254 in 1 : vector<8x128xf32>, vector<8x128xf32> -> vector<8x256xf32>
    %c0_73 = arith.constant 0 : index
    %c0_74 = arith.constant 0 : index
    %288 = vector.load %arg4[%c0_73, %c0_74] : memref<256x512xf32, #tpu.memory_space<vmem>>, vector<256x512xf32>
    %cst_75 = arith.constant dense<0.000000e+00> : vector<8x512xf32>
    %289 = tpu.matmul %287, %288, %cst_75 {dimension_numbers = #tpu.dot_dimension_numbers<[1], [0], [0], [1], [0, 0, 1, 1], [], []>} : vector<8x256xf32>, vector<256x512xf32>, vector<8x512xf32> -> vector<8x512xf32>
    %290 = arith.addf %289, %9 : vector<8x512xf32>
    %291 = vector.extract_strided_slice %290 {offsets = [0, 0], sizes = [8, 128], strides = [1, 1]} : vector<8x512xf32> to vector<8x128xf32>
    %292 = arith.negf %291 : vector<8x128xf32>
    %293 = math.exp %292 : vector<8x128xf32>
    %cst_76 = arith.constant 1.000000e+00 : f32
    %294 = vector.broadcast %cst_76 : f32 to vector<8x128xf32>
    %295 = arith.addf %294, %293 : vector<8x128xf32>
    %296 = arith.divf %294, %295 : vector<8x128xf32>
    %297 = vector.extract_strided_slice %290 {offsets = [0, 128], sizes = [8, 128], strides = [1, 1]} : vector<8x512xf32> to vector<8x128xf32>
    %298 = arith.negf %297 : vector<8x128xf32>
    %299 = math.exp %298 : vector<8x128xf32>
    %cst_77 = arith.constant 1.000000e+00 : f32
    %300 = vector.broadcast %cst_77 : f32 to vector<8x128xf32>
    %301 = arith.addf %300, %299 : vector<8x128xf32>
    %302 = arith.divf %300, %301 : vector<8x128xf32>
    %303 = vector.extract_strided_slice %290 {offsets = [0, 256], sizes = [8, 128], strides = [1, 1]} : vector<8x512xf32> to vector<8x128xf32>
    %304 = math.tanh %303 : vector<8x128xf32>
    %305 = vector.extract_strided_slice %290 {offsets = [0, 384], sizes = [8, 128], strides = [1, 1]} : vector<8x512xf32> to vector<8x128xf32>
    %306 = arith.negf %305 : vector<8x128xf32>
    %307 = math.exp %306 : vector<8x128xf32>
    %cst_78 = arith.constant 1.000000e+00 : f32
    %308 = vector.broadcast %cst_78 : f32 to vector<8x128xf32>
    %309 = arith.addf %308, %307 : vector<8x128xf32>
    %310 = arith.divf %308, %309 : vector<8x128xf32>
    %311 = arith.mulf %302, %252 : vector<8x128xf32>
    %312 = arith.mulf %296, %304 : vector<8x128xf32>
    %313 = arith.addf %311, %312 : vector<8x128xf32>
    %314 = math.tanh %313 : vector<8x128xf32>
    %315 = arith.mulf %310, %314 : vector<8x128xf32>
    %c5_i32 = arith.constant 5 : i32
    %c8_i32_79 = arith.constant 8 : i32
    %316 = arith.muli %c5_i32, %c8_i32_79 : i32
    %317 = tpu.assume_multiple %316, 8 : i32
    %318 = arith.index_cast %317 : i32 to index
    %c0_80 = arith.constant 0 : index
    %319 = vector.load %arg9[%318, %c0_80] : memref<64x512xf32, #tpu.memory_space<vmem>>, vector<8x512xf32>
    %c0_81 = arith.constant 0 : index
    %c0_82 = arith.constant 0 : index
    %320 = vector.load %arg2[%c0_81, %c0_82] : memref<128x512xf32, #tpu.memory_space<vmem>>, vector<128x512xf32>
    %cst_83 = arith.constant dense<0.000000e+00> : vector<8x512xf32>
    %321 = tpu.matmul %286, %320, %cst_83 {dimension_numbers = #tpu.dot_dimension_numbers<[1], [0], [0], [1], [0, 0, 1, 1], [], []>} : vector<8x128xf32>, vector<128x512xf32>, vector<8x512xf32> -> vector<8x512xf32>
    %322 = arith.addf %319, %321 : vector<8x512xf32>
    %323 = vector.extract_strided_slice %322 {offsets = [0, 0], sizes = [8, 128], strides = [1, 1]} : vector<8x512xf32> to vector<8x128xf32>
    %324 = arith.negf %323 : vector<8x128xf32>
    %325 = math.exp %324 : vector<8x128xf32>
    %cst_84 = arith.constant 1.000000e+00 : f32
    %326 = vector.broadcast %cst_84 : f32 to vector<8x128xf32>
    %327 = arith.addf %326, %325 : vector<8x128xf32>
    %328 = arith.divf %326, %327 : vector<8x128xf32>
    %329 = vector.extract_strided_slice %322 {offsets = [0, 128], sizes = [8, 128], strides = [1, 1]} : vector<8x512xf32> to vector<8x128xf32>
    %330 = arith.negf %329 : vector<8x128xf32>
    %331 = math.exp %330 : vector<8x128xf32>
    %cst_85 = arith.constant 1.000000e+00 : f32
    %332 = vector.broadcast %cst_85 : f32 to vector<8x128xf32>
    %333 = arith.addf %332, %331 : vector<8x128xf32>
    %334 = arith.divf %332, %333 : vector<8x128xf32>
    %335 = vector.extract_strided_slice %322 {offsets = [0, 256], sizes = [8, 128], strides = [1, 1]} : vector<8x512xf32> to vector<8x128xf32>
    %336 = math.tanh %335 : vector<8x128xf32>
    %337 = vector.extract_strided_slice %322 {offsets = [0, 384], sizes = [8, 128], strides = [1, 1]} : vector<8x512xf32> to vector<8x128xf32>
    %338 = arith.negf %337 : vector<8x128xf32>
    %339 = math.exp %338 : vector<8x128xf32>
    %cst_86 = arith.constant 1.000000e+00 : f32
    %340 = vector.broadcast %cst_86 : f32 to vector<8x128xf32>
    %341 = arith.addf %340, %339 : vector<8x128xf32>
    %342 = arith.divf %340, %341 : vector<8x128xf32>
    %343 = arith.mulf %334, %284 : vector<8x128xf32>
    %344 = arith.mulf %328, %336 : vector<8x128xf32>
    %345 = arith.addf %343, %344 : vector<8x128xf32>
    %346 = math.tanh %345 : vector<8x128xf32>
    %347 = arith.mulf %342, %346 : vector<8x128xf32>
    %348 = tpu.concatenate %347, %315 in 1 : vector<8x128xf32>, vector<8x128xf32> -> vector<8x256xf32>
    %c0_87 = arith.constant 0 : index
    %c0_88 = arith.constant 0 : index
    %349 = vector.load %arg4[%c0_87, %c0_88] : memref<256x512xf32, #tpu.memory_space<vmem>>, vector<256x512xf32>
    %cst_89 = arith.constant dense<0.000000e+00> : vector<8x512xf32>
    %350 = tpu.matmul %348, %349, %cst_89 {dimension_numbers = #tpu.dot_dimension_numbers<[1], [0], [0], [1], [0, 0, 1, 1], [], []>} : vector<8x256xf32>, vector<256x512xf32>, vector<8x512xf32> -> vector<8x512xf32>
    %351 = arith.addf %350, %9 : vector<8x512xf32>
    %352 = vector.extract_strided_slice %351 {offsets = [0, 0], sizes = [8, 128], strides = [1, 1]} : vector<8x512xf32> to vector<8x128xf32>
    %353 = arith.negf %352 : vector<8x128xf32>
    %354 = math.exp %353 : vector<8x128xf32>
    %cst_90 = arith.constant 1.000000e+00 : f32
    %355 = vector.broadcast %cst_90 : f32 to vector<8x128xf32>
    %356 = arith.addf %355, %354 : vector<8x128xf32>
    %357 = arith.divf %355, %356 : vector<8x128xf32>
    %358 = vector.extract_strided_slice %351 {offsets = [0, 128], sizes = [8, 128], strides = [1, 1]} : vector<8x512xf32> to vector<8x128xf32>
    %359 = arith.negf %358 : vector<8x128xf32>
    %360 = math.exp %359 : vector<8x128xf32>
    %cst_91 = arith.constant 1.000000e+00 : f32
    %361 = vector.broadcast %cst_91 : f32 to vector<8x128xf32>
    %362 = arith.addf %361, %360 : vector<8x128xf32>
    %363 = arith.divf %361, %362 : vector<8x128xf32>
    %364 = vector.extract_strided_slice %351 {offsets = [0, 256], sizes = [8, 128], strides = [1, 1]} : vector<8x512xf32> to vector<8x128xf32>
    %365 = math.tanh %364 : vector<8x128xf32>
    %366 = vector.extract_strided_slice %351 {offsets = [0, 384], sizes = [8, 128], strides = [1, 1]} : vector<8x512xf32> to vector<8x128xf32>
    %367 = arith.negf %366 : vector<8x128xf32>
    %368 = math.exp %367 : vector<8x128xf32>
    %cst_92 = arith.constant 1.000000e+00 : f32
    %369 = vector.broadcast %cst_92 : f32 to vector<8x128xf32>
    %370 = arith.addf %369, %368 : vector<8x128xf32>
    %371 = arith.divf %369, %370 : vector<8x128xf32>
    %372 = arith.mulf %363, %313 : vector<8x128xf32>
    %373 = arith.mulf %357, %365 : vector<8x128xf32>
    %374 = arith.addf %372, %373 : vector<8x128xf32>
    %375 = math.tanh %374 : vector<8x128xf32>
    %376 = arith.mulf %371, %375 : vector<8x128xf32>
    %c6_i32 = arith.constant 6 : i32
    %c8_i32_93 = arith.constant 8 : i32
    %377 = arith.muli %c6_i32, %c8_i32_93 : i32
    %378 = tpu.assume_multiple %377, 8 : i32
    %379 = arith.index_cast %378 : i32 to index
    %c0_94 = arith.constant 0 : index
    %380 = vector.load %arg9[%379, %c0_94] : memref<64x512xf32, #tpu.memory_space<vmem>>, vector<8x512xf32>
    %c0_95 = arith.constant 0 : index
    %c0_96 = arith.constant 0 : index
    %381 = vector.load %arg2[%c0_95, %c0_96] : memref<128x512xf32, #tpu.memory_space<vmem>>, vector<128x512xf32>
    %cst_97 = arith.constant dense<0.000000e+00> : vector<8x512xf32>
    %382 = tpu.matmul %347, %381, %cst_97 {dimension_numbers = #tpu.dot_dimension_numbers<[1], [0], [0], [1], [0, 0, 1, 1], [], []>} : vector<8x128xf32>, vector<128x512xf32>, vector<8x512xf32> -> vector<8x512xf32>
    %383 = arith.addf %380, %382 : vector<8x512xf32>
    %384 = vector.extract_strided_slice %383 {offsets = [0, 0], sizes = [8, 128], strides = [1, 1]} : vector<8x512xf32> to vector<8x128xf32>
    %385 = arith.negf %384 : vector<8x128xf32>
    %386 = math.exp %385 : vector<8x128xf32>
    %cst_98 = arith.constant 1.000000e+00 : f32
    %387 = vector.broadcast %cst_98 : f32 to vector<8x128xf32>
    %388 = arith.addf %387, %386 : vector<8x128xf32>
    %389 = arith.divf %387, %388 : vector<8x128xf32>
    %390 = vector.extract_strided_slice %383 {offsets = [0, 128], sizes = [8, 128], strides = [1, 1]} : vector<8x512xf32> to vector<8x128xf32>
    %391 = arith.negf %390 : vector<8x128xf32>
    %392 = math.exp %391 : vector<8x128xf32>
    %cst_99 = arith.constant 1.000000e+00 : f32
    %393 = vector.broadcast %cst_99 : f32 to vector<8x128xf32>
    %394 = arith.addf %393, %392 : vector<8x128xf32>
    %395 = arith.divf %393, %394 : vector<8x128xf32>
    %396 = vector.extract_strided_slice %383 {offsets = [0, 256], sizes = [8, 128], strides = [1, 1]} : vector<8x512xf32> to vector<8x128xf32>
    %397 = math.tanh %396 : vector<8x128xf32>
    %398 = vector.extract_strided_slice %383 {offsets = [0, 384], sizes = [8, 128], strides = [1, 1]} : vector<8x512xf32> to vector<8x128xf32>
    %399 = arith.negf %398 : vector<8x128xf32>
    %400 = math.exp %399 : vector<8x128xf32>
    %cst_100 = arith.constant 1.000000e+00 : f32
    %401 = vector.broadcast %cst_100 : f32 to vector<8x128xf32>
    %402 = arith.addf %401, %400 : vector<8x128xf32>
    %403 = arith.divf %401, %402 : vector<8x128xf32>
    %404 = arith.mulf %395, %345 : vector<8x128xf32>
    %405 = arith.mulf %389, %397 : vector<8x128xf32>
    %406 = arith.addf %404, %405 : vector<8x128xf32>
    %407 = math.tanh %406 : vector<8x128xf32>
    %408 = arith.mulf %403, %407 : vector<8x128xf32>
    %409 = tpu.concatenate %408, %376 in 1 : vector<8x128xf32>, vector<8x128xf32> -> vector<8x256xf32>
    %c0_101 = arith.constant 0 : index
    %c0_102 = arith.constant 0 : index
    %410 = vector.load %arg4[%c0_101, %c0_102] : memref<256x512xf32, #tpu.memory_space<vmem>>, vector<256x512xf32>
    %cst_103 = arith.constant dense<0.000000e+00> : vector<8x512xf32>
    %411 = tpu.matmul %409, %410, %cst_103 {dimension_numbers = #tpu.dot_dimension_numbers<[1], [0], [0], [1], [0, 0, 1, 1], [], []>} : vector<8x256xf32>, vector<256x512xf32>, vector<8x512xf32> -> vector<8x512xf32>
    %412 = arith.addf %411, %9 : vector<8x512xf32>
    %413 = vector.extract_strided_slice %412 {offsets = [0, 0], sizes = [8, 128], strides = [1, 1]} : vector<8x512xf32> to vector<8x128xf32>
    %414 = arith.negf %413 : vector<8x128xf32>
    %415 = math.exp %414 : vector<8x128xf32>
    %cst_104 = arith.constant 1.000000e+00 : f32
    %416 = vector.broadcast %cst_104 : f32 to vector<8x128xf32>
    %417 = arith.addf %416, %415 : vector<8x128xf32>
    %418 = arith.divf %416, %417 : vector<8x128xf32>
    %419 = vector.extract_strided_slice %412 {offsets = [0, 128], sizes = [8, 128], strides = [1, 1]} : vector<8x512xf32> to vector<8x128xf32>
    %420 = arith.negf %419 : vector<8x128xf32>
    %421 = math.exp %420 : vector<8x128xf32>
    %cst_105 = arith.constant 1.000000e+00 : f32
    %422 = vector.broadcast %cst_105 : f32 to vector<8x128xf32>
    %423 = arith.addf %422, %421 : vector<8x128xf32>
    %424 = arith.divf %422, %423 : vector<8x128xf32>
    %425 = vector.extract_strided_slice %412 {offsets = [0, 256], sizes = [8, 128], strides = [1, 1]} : vector<8x512xf32> to vector<8x128xf32>
    %426 = math.tanh %425 : vector<8x128xf32>
    %427 = vector.extract_strided_slice %412 {offsets = [0, 384], sizes = [8, 128], strides = [1, 1]} : vector<8x512xf32> to vector<8x128xf32>
    %428 = arith.negf %427 : vector<8x128xf32>
    %429 = math.exp %428 : vector<8x128xf32>
    %cst_106 = arith.constant 1.000000e+00 : f32
    %430 = vector.broadcast %cst_106 : f32 to vector<8x128xf32>
    %431 = arith.addf %430, %429 : vector<8x128xf32>
    %432 = arith.divf %430, %431 : vector<8x128xf32>
    %433 = arith.mulf %424, %374 : vector<8x128xf32>
    %434 = arith.mulf %418, %426 : vector<8x128xf32>
    %435 = arith.addf %433, %434 : vector<8x128xf32>
    %436 = math.tanh %435 : vector<8x128xf32>
    %437 = arith.mulf %432, %436 : vector<8x128xf32>
    %c7_i32 = arith.constant 7 : i32
    %c8_i32_107 = arith.constant 8 : i32
    %438 = arith.muli %c7_i32, %c8_i32_107 : i32
    %439 = tpu.assume_multiple %438, 8 : i32
    %440 = arith.index_cast %439 : i32 to index
    %c0_108 = arith.constant 0 : index
    %441 = vector.load %arg9[%440, %c0_108] : memref<64x512xf32, #tpu.memory_space<vmem>>, vector<8x512xf32>
    %c0_109 = arith.constant 0 : index
    %c0_110 = arith.constant 0 : index
    %442 = vector.load %arg2[%c0_109, %c0_110] : memref<128x512xf32, #tpu.memory_space<vmem>>, vector<128x512xf32>
    %cst_111 = arith.constant dense<0.000000e+00> : vector<8x512xf32>
    %443 = tpu.matmul %408, %442, %cst_111 {dimension_numbers = #tpu.dot_dimension_numbers<[1], [0], [0], [1], [0, 0, 1, 1], [], []>} : vector<8x128xf32>, vector<128x512xf32>, vector<8x512xf32> -> vector<8x512xf32>
    %444 = arith.addf %441, %443 : vector<8x512xf32>
    %445 = vector.extract_strided_slice %444 {offsets = [0, 0], sizes = [8, 128], strides = [1, 1]} : vector<8x512xf32> to vector<8x128xf32>
    %446 = arith.negf %445 : vector<8x128xf32>
    %447 = math.exp %446 : vector<8x128xf32>
    %cst_112 = arith.constant 1.000000e+00 : f32
    %448 = vector.broadcast %cst_112 : f32 to vector<8x128xf32>
    %449 = arith.addf %448, %447 : vector<8x128xf32>
    %450 = arith.divf %448, %449 : vector<8x128xf32>
    %451 = vector.extract_strided_slice %444 {offsets = [0, 128], sizes = [8, 128], strides = [1, 1]} : vector<8x512xf32> to vector<8x128xf32>
    %452 = arith.negf %451 : vector<8x128xf32>
    %453 = math.exp %452 : vector<8x128xf32>
    %cst_113 = arith.constant 1.000000e+00 : f32
    %454 = vector.broadcast %cst_113 : f32 to vector<8x128xf32>
    %455 = arith.addf %454, %453 : vector<8x128xf32>
    %456 = arith.divf %454, %455 : vector<8x128xf32>
    %457 = vector.extract_strided_slice %444 {offsets = [0, 256], sizes = [8, 128], strides = [1, 1]} : vector<8x512xf32> to vector<8x128xf32>
    %458 = math.tanh %457 : vector<8x128xf32>
    %459 = vector.extract_strided_slice %444 {offsets = [0, 384], sizes = [8, 128], strides = [1, 1]} : vector<8x512xf32> to vector<8x128xf32>
    %460 = arith.negf %459 : vector<8x128xf32>
    %461 = math.exp %460 : vector<8x128xf32>
    %cst_114 = arith.constant 1.000000e+00 : f32
    %462 = vector.broadcast %cst_114 : f32 to vector<8x128xf32>
    %463 = arith.addf %462, %461 : vector<8x128xf32>
    %464 = arith.divf %462, %463 : vector<8x128xf32>
    %465 = arith.mulf %456, %406 : vector<8x128xf32>
    %466 = arith.mulf %450, %458 : vector<8x128xf32>
    %467 = arith.addf %465, %466 : vector<8x128xf32>
    %468 = math.tanh %467 : vector<8x128xf32>
    %469 = arith.mulf %464, %468 : vector<8x128xf32>
    %470 = tpu.concatenate %469, %437 in 1 : vector<8x128xf32>, vector<8x128xf32> -> vector<8x256xf32>
    %c0_115 = arith.constant 0 : index
    %c0_116 = arith.constant 0 : index
    %471 = vector.load %arg4[%c0_115, %c0_116] : memref<256x512xf32, #tpu.memory_space<vmem>>, vector<256x512xf32>
    %cst_117 = arith.constant dense<0.000000e+00> : vector<8x512xf32>
    %472 = tpu.matmul %470, %471, %cst_117 {dimension_numbers = #tpu.dot_dimension_numbers<[1], [0], [0], [1], [0, 0, 1, 1], [], []>} : vector<8x256xf32>, vector<256x512xf32>, vector<8x512xf32> -> vector<8x512xf32>
    %473 = arith.addf %472, %9 : vector<8x512xf32>
    %474 = vector.extract_strided_slice %473 {offsets = [0, 0], sizes = [8, 128], strides = [1, 1]} : vector<8x512xf32> to vector<8x128xf32>
    %475 = arith.negf %474 : vector<8x128xf32>
    %476 = math.exp %475 : vector<8x128xf32>
    %cst_118 = arith.constant 1.000000e+00 : f32
    %477 = vector.broadcast %cst_118 : f32 to vector<8x128xf32>
    %478 = arith.addf %477, %476 : vector<8x128xf32>
    %479 = arith.divf %477, %478 : vector<8x128xf32>
    %480 = vector.extract_strided_slice %473 {offsets = [0, 128], sizes = [8, 128], strides = [1, 1]} : vector<8x512xf32> to vector<8x128xf32>
    %481 = arith.negf %480 : vector<8x128xf32>
    %482 = math.exp %481 : vector<8x128xf32>
    %cst_119 = arith.constant 1.000000e+00 : f32
    %483 = vector.broadcast %cst_119 : f32 to vector<8x128xf32>
    %484 = arith.addf %483, %482 : vector<8x128xf32>
    %485 = arith.divf %483, %484 : vector<8x128xf32>
    %486 = vector.extract_strided_slice %473 {offsets = [0, 256], sizes = [8, 128], strides = [1, 1]} : vector<8x512xf32> to vector<8x128xf32>
    %487 = math.tanh %486 : vector<8x128xf32>
    %488 = vector.extract_strided_slice %473 {offsets = [0, 384], sizes = [8, 128], strides = [1, 1]} : vector<8x512xf32> to vector<8x128xf32>
    %489 = arith.negf %488 : vector<8x128xf32>
    %490 = math.exp %489 : vector<8x128xf32>
    %cst_120 = arith.constant 1.000000e+00 : f32
    %491 = vector.broadcast %cst_120 : f32 to vector<8x128xf32>
    %492 = arith.addf %491, %490 : vector<8x128xf32>
    %493 = arith.divf %491, %492 : vector<8x128xf32>
    %494 = arith.mulf %485, %435 : vector<8x128xf32>
    %495 = arith.mulf %479, %487 : vector<8x128xf32>
    %496 = arith.addf %494, %495 : vector<8x128xf32>
    %497 = math.tanh %496 : vector<8x128xf32>
    %498 = arith.mulf %493, %497 : vector<8x128xf32>
    %c8_i32_121 = arith.constant 8 : i32
    %c0_122 = arith.constant 0 : index
    %c0_123 = arith.constant 0 : index
    %499 = vector.load %arg6[%c0_122, %c0_123] : memref<128x128xf32, #tpu.memory_space<vmem>>, vector<128x128xf32>
    %cst_124 = arith.constant dense<0.000000e+00> : vector<8x128xf32>
    %500 = tpu.matmul %498, %499, %cst_124 {dimension_numbers = #tpu.dot_dimension_numbers<[1], [0], [0], [1], [0, 0, 1, 1], [], []>} : vector<8x128xf32>, vector<128x128xf32>, vector<8x128xf32> -> vector<8x128xf32>
    %c0_125 = arith.constant 0 : index
    %c0_126 = arith.constant 0 : index
    %501 = vector.load %arg7[%c0_125, %c0_126] : memref<1x128xf32, #tpu.memory_space<vmem>>, vector<1x128xf32>
    %502 = vector.broadcast %501 : vector<1x128xf32> to vector<8x128xf32>
    %503 = arith.addf %500, %502 : vector<8x128xf32>
    %c0_127 = arith.constant 0 : index
    %c0_128 = arith.constant 0 : index
    %504 = vector.load %arg8[%c0_127, %c0_128] : memref<8x128xf32, #tpu.memory_space<vmem>>, vector<8x128xf32>
    tpu.vector_store %arg8[%c0_127, %c0_128], %503 {strides = array<i32>} : memref<8x128xf32, #tpu.memory_space<vmem>>, vector<8x128xf32>,
    return
  }
}

</mosaic_0001>

<bundles_post_ra>
// kernel: lstm_model_forward.1
= control target key start
LH: loop header
LB: loop body
LE: loop exit
PB: predicated region body
PF: predicated region fallthrough
CT: control target
= control target key end

     0   :  { %13 = vsyncpa [#allocation4], 0  ;;  %s6978_s0 = inlined_call_operand.vmem [shape: f32[64,6], index: 0, kind: input, shape index: {}]   ;;  %s6979_s1 = inlined_call_operand.hbm [shape: f32[6,512], index: 1, kind: input, shape index: {}]   ;;  %s6980_s2 = inlined_call_operand.hbm [shape: f32[128,512], index: 2, kind: input, shape index: {}]   ;;  %s6981_s3 = inlined_call_operand.hbm [shape: f32[1,512], index: 3, kind: input, shape index: {}]   ;;  %s6982_s4 = inlined_call_operand.hbm [shape: f32[256,512], index: 4, kind: input, shape index: {}]   ;;  %s6983_s5 = inlined_call_operand.hbm [shape: f32[1,512], index: 5, kind: input, shape index: {}]   ;;  %s6984_s6 = inlined_call_operand.vmem [shape: f32[128,128], index: 6, kind: input, shape index: {}]   ;;  %s6985_s7 = inlined_call_operand.vmem [shape: f32[1,128], index: 7, kind: input, shape index: {}]   ;;  %s6986_s8 = inlined_call_operand.vmem [shape: f32[8,128], index: 8, kind: output, shape index: {}]  }
   0x1   :  { %14 = vsyncpa [#allocation6], 0 }
   0x2   :  { %15 = vsyncpa [#allocation9], 0  ;;  %s5614_s27 = smov [#allocation5]   ;;  %s5498_s9 = scalar_lea.hbm %s6980_s2, 8192 }
   0x3   :  { %s33_s28 = sshll.u32 %s5614_s27, 4  ;;  %p5499_p0 = scmp.ne.s32.totalorder %s6980_s2, %s5498_s9  ;;  %s34_s28 = int_to_ptr.vmem [resolvable:$true] %s33_s28 }
   0x4   :  { %p5502_p1 = scmp.lt.u32.totalorder %s5498_s9, %s6980_s2 }
   0x6   :  { %p5504_p2 = pnand %p5502_p1, %p5499_p0 }
   0x8   :  { %5507 = shalt.err (!%p5504_p2)
}
   0x9   :  { %s5508_s14 = scalar_lea.vmem %s34_s28, 8192  ;;  %p5513_p4 = scmp.lt.s32.totalorder %s34_s28, %s34_s28 }
   0xa   :  { %p5509_p3 = scmp.ne.s32.totalorder %s34_s28, %s5508_s14  ;;  %p5514_p5 = scmp.lt.s32.totalorder %s5508_s14, %s5508_s14 }
   0xc   :  { %p5515_p6 = por %p5514_p5, %p5513_p4 }
   0xe   :  { %p5516_p7 = pnand %p5515_p6, %p5509_p3 }
  0x10   :  { %5519 = shalt.err (!%p5516_p7)
}
  0x11   :  { %s5615_s15 = smov 512   ;;  %s5616_s16 = smov 32  }
  0x12   :  { %39 = dma.hbm_to_vmem [thread:$0]  %s6980_s2, 8192, %s34_s28, [#allocation6], %s5615_s15, %s5615_s15, %s5616_s16  }
  0x13   :  { %s5617_s19 = smov [#allocation8]   ;;  %s5618_s21 = smov [#allocation3]  }
  0x14   :  { %s55_s20 = sshll.u32 %s5617_s19, 4  ;;  %s24_s22 = sshll.u32 %s5618_s21, 4  ;;  %s56_s20 = int_to_ptr.vmem [resolvable:$true] %s55_s20  ;;  %s25_s22 = int_to_ptr.vmem [resolvable:$true] %s24_s22 }
  0x15   :  { %s5520_s25 = scalar_lea.hbm %s6982_s4, 16384 }
  0x16   :  { %p5521_p8 = scmp.ne.s32.totalorder %s6982_s4, %s5520_s25  ;;  %p5524_p9 = scmp.lt.u32.totalorder %s5520_s25, %s6982_s4 }
  0x18   :  { %p5526_p10 = pnand %p5524_p9, %p5521_p8 }
  0x1a   :  { %5529 = shalt.err (!%p5526_p10)
}
  0x1b   :  { %s5530_s2 = scalar_lea.vmem %s56_s20, 16384  ;;  %p5535_p12 = scmp.lt.s32.totalorder %s56_s20, %s56_s20 }
  0x1c   :  { %p5531_p11 = scmp.ne.s32.totalorder %s56_s20, %s5530_s2  ;;  %p5536_p13 = scmp.lt.s32.totalorder %s5530_s2, %s5530_s2 }
  0x1e   :  { %p5537_p0 = por %p5536_p13, %p5535_p12 }
  0x20   :  { %p5538_p1 = pnand %p5537_p0, %p5531_p11 }
  0x22   :  { %5541 = shalt.err (!%p5538_p1)
}
  0x23   :  { %61 = dma.hbm_to_vmem [thread:$0]  %s6982_s4, 16384, %s56_s20, [#allocation9], %s5615_s15, %s5615_s15, %s5616_s16  }
  0x24   :  { %s5542_s12 = scalar_lea.hbm %s6979_s1, 512 }
  0x25   :  { %p5543_p2 = scmp.ne.s32.totalorder %s6979_s1, %s5542_s12  ;;  %p5546_p3 = scmp.lt.u32.totalorder %s5542_s12, %s6979_s1 }
  0x27   :  { %p5548_p4 = pnand %p5546_p3, %p5543_p2 }
  0x29   :  { %5551 = shalt.err (!%p5548_p4)
}
  0x2a   :  { %s5552_s19 = scalar_lea.vmem %s25_s22, 512  ;;  %p5557_p6 = scmp.lt.s32.totalorder %s25_s22, %s25_s22 }
  0x2b   :  { %p5553_p5 = scmp.ne.s32.totalorder %s25_s22, %s5552_s19  ;;  %p5558_p7 = scmp.lt.s32.totalorder %s5552_s19, %s5552_s19 }
  0x2d   :  { %p5559_p8 = por %p5558_p7, %p5557_p6 }
  0x2f   :  { %p5560_p9 = pnand %p5559_p8, %p5553_p5 }
  0x31   :  { %5563 = shalt.err (!%p5560_p9)
}
  0x32   :  { %27 = dma.hbm_to_vmem [thread:$0]  %s6979_s1, 512, %s25_s22, [#allocation4]  }
  0x33   :  { %s5619_s16 = smov [#allocation7]   ;;  %s5620_s21 = smov [#allocation10]  }
  0x34   :  { %s46_s20 = sshll.u32 %s5619_s16, 4  ;;  %s68_s23 = sshll.u32 %s5620_s21, 4  ;;  %s47_s20 = int_to_ptr.vmem [resolvable:$true] %s46_s20  ;;  %s69_s23 = int_to_ptr.vmem [resolvable:$true] %s68_s23 }
  0x35   :  { %s5564_s26 = scalar_lea.hbm %s6981_s3, 64 }
  0x36   :  { %p5565_p10 = scmp.ne.s32.totalorder %s6981_s3, %s5564_s26  ;;  %p5568_p11 = scmp.lt.u32.totalorder %s5564_s26, %s6981_s3 }
  0x38   :  { %p5570_p12 = pnand %p5568_p11, %p5565_p10 }
  0x3a   :  { %5573 = shalt.err (!%p5570_p12)
}
  0x3b   :  { %s5574_s1 = scalar_lea.vmem %s47_s20, 64  ;;  %p5579_p0 = scmp.lt.s32.totalorder %s47_s20, %s47_s20 }
  0x3c   :  { %p5575_p13 = scmp.ne.s32.totalorder %s47_s20, %s5574_s1  ;;  %p5580_p1 = scmp.lt.s32.totalorder %s5574_s1, %s5574_s1 }
  0x3e   :  { %p5581_p2 = por %p5580_p1, %p5579_p0 }
  0x40   :  { %p5582_p3 = pnand %p5581_p2, %p5575_p13 }
  0x42   :  { %5585 = shalt.err (!%p5582_p3)
}
  0x43   :  { %49 = dma.hbm_to_vmem [thread:$0]  %s6981_s3, 64, %s47_s20, [#allocation6]  }
  0x44   :  { %s5586_s11 = scalar_lea.hbm %s6983_s5, 64 }
  0x45   :  { %p5587_p4 = scmp.ne.s32.totalorder %s6983_s5, %s5586_s11  ;;  %p5590_p5 = scmp.lt.u32.totalorder %s5586_s11, %s6983_s5 }
  0x47   :  { %p5592_p6 = pnand %p5590_p5, %p5587_p4 }
  0x49   :  { %5595 = shalt.err (!%p5592_p6)
}
  0x4a   :  { %s5596_s18 = scalar_lea.vmem %s69_s23, 64  ;;  %p5601_p8 = scmp.lt.s32.totalorder %s69_s23, %s69_s23 }
  0x4b   :  { %p5597_p7 = scmp.ne.s32.totalorder %s69_s23, %s5596_s18  ;;  %p5602_p9 = scmp.lt.s32.totalorder %s5596_s18, %s5596_s18 }
  0x4d   :  { %p5603_p10 = por %p5602_p9, %p5601_p8 }
  0x4f   :  { %p5604_p11 = pnand %p5603_p10, %p5597_p7 }
  0x51   :  { %5607 = shalt.err (!%p5604_p11)
}
  0x52   :  { %71 = dma.hbm_to_vmem [thread:$0]  %s6983_s5, 64, %s69_s23, [#allocation9]  }
  0x53   :  { %5608 = dma.done.wait [#allocation4], 512  }
  0x54   :  { %5609 = vsyncadd [#allocation4], 4294966784 }
  0x55   :  { %5610 = dma.done.wait [#allocation6], 8256  }
  0x56   :  { %5611 = vsyncadd [#allocation6], 4294959040 }
  0x57   :  { %5612 = dma.done.wait [#allocation9], 16448  }
  0x58   :  { %5613 = vsyncadd [#allocation9], 4294950848  ;;  %v6987_v0 = vmov 0.0   ;;  %vm150_vm0 = vcmask 1045504   ;;  %vm125_vm1 = vcmask 48128   ;;  %v91_v5 = vld [vmem:[%s6978_s0] sm:$0xff] }
  0x59   :  { %227 = vmatprep.mubr.f32.mxu0 %v6987_v0  ;;  %340 = vmatprep.mubr.f32.mxu1 %v6987_v0  ;;  %v100_v1 = vld [vmem:[#allocation3 + $0x8] sm:$0x3f]  ;;  %v102_v2 = vld [vmem:[#allocation3 + $0x18] sm:$0x3f]  ;;  %v99_v3 = vld [vmem:[#allocation3] sm:$0x3f] }
  0x5a   :  { %3487 = vmatprep.subr.msk.mxu0 %vm150_vm0, %v100_v1  ;;  %3497 = vmatprep.subr.msk.mxu1 %vm150_vm0, %v102_v2  ;;  %v101_v4 = vld [vmem:[#allocation3 + $0x10] sm:$0x3f]  ;;  %v451_v6 = vld [vmem:[#allocation5 + $0x8] sm:$0xff]  ;;  %v453_v8 = vld [vmem:[#allocation5 + $0x18] sm:$0xff]  ;;  %vm5623_vm2 = vmmov 0  }
  0x5b   :  { %3488 = vmatpush1.msk.msra.mxu0 %vm150_vm0, %v99_v3  ;;  %3498 = vmatpush1.msk.msra.mxu1 %vm150_vm0, %v101_v4  ;;  %v455_v7 = vld [vmem:[#allocation5 + $0x28] sm:$0xff]  ;;  %v457_v9 = vld [vmem:[#allocation5 + $0x38] sm:$0xff]  ;;  %v450_v12 = vld [vmem:[#allocation5] sm:$0xff] }
  0x5c   :  { %3489 = vmatmul.mubr.msk.f32.vlgmr.msra.gmra.mrb[0].mxu0 %vm125_vm1, %v91_v5  ;;  %3499 = vmatmul.mubr.msk.f32.vlgmr.msra.gmra.mrb[0].mxu1 %vm125_vm1, %v91_v5  ;;  %v5736_v10 = vpack.c.bf16 %v455_v7, %v451_v6  ;;  %v5738_v11 = vpack.c.bf16 %v457_v9, %v453_v8  ;;  %v454_v13 = vld [vmem:[#allocation5 + $0x20] sm:$0xff]  ;;  %v452_v14 = vld [vmem:[#allocation5 + $0x10] sm:$0xff]  ;;  %v92_v17 = vld [vmem:[%s6978_s0 + $0x8] sm:$0xff] }
  0x5d   :  { %v5740_v15 = vpack.c.bf16 %v454_v13, %v450_v12  ;;  %v456_v16 = vld [vmem:[#allocation5 + $0x30] sm:$0xff]  ;;  %233 = vmatprep.mubr.f32.mxu0 %v6987_v0  ;;  %346 = vmatprep.mubr.f32.mxu1 %v6987_v0  ;;  %v459_v18 = vld [vmem:[#allocation5 + $0x48] sm:$0xff]  ;;  %v461_v21 = vld [vmem:[#allocation5 + $0x58] sm:$0xff] }
  0x5e   :  { %7121 = vst [vmem:[#allocation14_spill] sm:$0xff] %v5736_v10  ;;  %7122 = vst [vmem:[#allocation15_spill] sm:$0xff] %v5738_v11  ;;  %3609 = vmatprep.subr.bf16.mxu0 %v5736_v10  ;;  %3641 = vmatprep.subr.bf16.mxu1 %v5738_v11  ;;  %v5749_v19 = vpack.c.bf16 %v456_v16, %v452_v14  ;;  %v463_v20 = vld [vmem:[#allocation5 + $0x68] sm:$0xff]  ;;  %v465_v22 = vld [vmem:[#allocation5 + $0x78] sm:$0xff] }
  0x5f   :  { %3611 = vmatpush1.bf16.msra.mxu0 %v5740_v15  ;;  %v5752_v23 = vpack.c.bf16 %v463_v20, %v459_v18  ;;  %v5754_v24 = vpack.c.bf16 %v465_v22, %v461_v21  ;;  %v458_v25 = vld [vmem:[#allocation5 + $0x40] sm:$0xff]  ;;  %v460_v27 = vld [vmem:[#allocation5 + $0x50] sm:$0xff]  ;;  %v467_v31 = vld [vmem:[#allocation5 + $0x88] sm:$0xff] }
  0x60   :  { %v462_v26 = vld [vmem:[#allocation5 + $0x60] sm:$0xff]  ;;  %3643 = vmatpush1.bf16.msra.mxu1 %v5749_v19  ;;  %3490 = vmatmul.mubr.msk.f32.gmra.mrb[2].mxu0 %vm125_vm1, %v92_v17  ;;  %v464_v29 = vld [vmem:[#allocation5 + $0x70] sm:$0xff]  ;;  %v471_v33 = vld [vmem:[#allocation5 + $0xa8] sm:$0xff] }
  0x61   :  { %v5758_v28 = vpack.c.bf16 %v462_v26, %v458_v25  ;;  %v93_v30 = vld [vmem:[%s6978_s0 + $0x10] sm:$0xff]  ;;  %3500 = vmatmul.mubr.msk.f32.gmra.mrb[2].mxu1 %vm125_vm1, %v92_v17  ;;  %3613 = vmatprep.subr.bf16.mxu0 %v5752_v23  ;;  %v5765_v32 = vpack.c.bf16 %v464_v29, %v460_v27  ;;  %v469_v34 = vld [vmem:[#allocation5 + $0x98] sm:$0xff]  ;;  %v5769_v36 = vpack.c.bf16 %v471_v33, %v467_v31  ;;  %v466_v38 = vld [vmem:[#allocation5 + $0x80] sm:$0xff] }
  0x62   :  { %v473_v35 = vld [vmem:[#allocation5 + $0xb8] sm:$0xff]  ;;  %3645 = vmatprep.subr.bf16.mxu1 %v5754_v24  ;;  %239 = vmatprep.mubr.f32.mxu0 %v6987_v0  ;;  %v470_v39 = vld [vmem:[#allocation5 + $0xa0] sm:$0xff]  ;;  %v468_v40 = vld [vmem:[#allocation5 + $0x90] sm:$0xff] }
  0x63   :  { %v5771_v37 = vpack.c.bf16 %v473_v35, %v469_v34  ;;  %3615 = vmatpush1.bf16.msra.mxu0 %v5758_v28  ;;  %352 = vmatprep.mubr.f32.mxu1 %v6987_v0  ;;  %v5775_v41 = vpack.c.bf16 %v470_v39, %v466_v38  ;;  %v472_v42 = vld [vmem:[#allocation5 + $0xb0] sm:$0xff]  ;;  %v94_v43 = vld [vmem:[%s6978_s0 + $0x18] sm:$0xff]  ;;  %v475_v44 = vld [vmem:[#allocation5 + $0xc8] sm:$0xff] }
  0x64   :  { %3647 = vmatpush1.bf16.msra.mxu1 %v5765_v32  ;;  %3491 = vmatmul.mubr.msk.f32.gmra.mrb[4].mxu0 %vm125_vm1, %v93_v30  ;;  %v5782_v45 = vpack.c.bf16 %v472_v42, %v468_v40  ;;  %v479_v46 = vld [vmem:[#allocation5 + $0xe8] sm:$0xff]  ;;  %v477_v47 = vld [vmem:[#allocation5 + $0xd8] sm:$0xff]  ;;  %v474_v50 = vld [vmem:[#allocation5 + $0xc0] sm:$0xff] }
  0x65   :  { %v481_v48 = vld [vmem:[#allocation5 + $0xf8] sm:$0xff]  ;;  %3501 = vmatmul.mubr.msk.f32.gmra.mrb[4].mxu1 %vm125_vm1, %v93_v30  ;;  %3617 = vmatprep.subr.bf16.mxu0 %v5769_v36  ;;  %v5786_v49 = vpack.c.bf16 %v479_v46, %v475_v44  ;;  %v478_v51 = vld [vmem:[#allocation5 + $0xe0] sm:$0xff]  ;;  %v476_v52 = vld [vmem:[#allocation5 + $0xd0] sm:$0xff] }
  0x66   :  { %3649 = vmatprep.subr.bf16.mxu1 %v5771_v37  ;;  %245 = vmatprep.mubr.f32.mxu0 %v6987_v0  ;;  %v5790_v53 = vpack.c.bf16 %v481_v48, %v477_v47  ;;  %v480_v54 = vld [vmem:[#allocation5 + $0xf0] sm:$0xff]  ;;  %v483_v55 = vld [vmem:[#allocation5 + $0x108] sm:$0xff]  ;;  %v5794_v56 = vpack.c.bf16 %v478_v51, %v474_v50  ;;  %v485_v58 = vld [vmem:[#allocation5 + $0x118] sm:$0xff] }
  0x67   :  { %3619 = vmatpush1.bf16.msra.mxu0 %v5775_v41  ;;  %358 = vmatprep.mubr.f32.mxu1 %v6987_v0  ;;  %v487_v57 = vld [vmem:[#allocation5 + $0x128] sm:$0xff]  ;;  %v489_v59 = vld [vmem:[#allocation5 + $0x138] sm:$0xff]  ;;  %v5798_v60 = vpack.c.bf16 %v480_v54, %v476_v52  ;;  %v482_v61 = vld [vmem:[#allocation5 + $0x100] sm:$0xff] }
  0x68   :  { %3651 = vmatpush1.bf16.msra.mxu1 %v5782_v45  ;;  %3492 = vmatmul.mubr.msk.f32.gmra.mrb[6].mxu0 %vm125_vm1, %v94_v43  ;;  %v486_v62 = vld [vmem:[#allocation5 + $0x120] sm:$0xff]  ;;  %v5805_v1 = vpack.c.bf16 %v487_v57, %v483_v55  ;;  %v484_v2 = vld [vmem:[#allocation5 + $0x110] sm:$0xff]  ;;  %v5809_v4 = vpack.c.bf16 %v489_v59, %v485_v58  ;;  %v491_v5 = vld [vmem:[#allocation5 + $0x148] sm:$0xff] }
  0x69   :  { %3502 = vmatmul.mubr.msk.f32.gmra.mrb[6].mxu1 %vm125_vm1, %v94_v43  ;;  %3621 = vmatprep.subr.bf16.mxu0 %v5786_v49  ;;  %v95_v63 = vld [vmem:[%s6978_s0 + $0x20] sm:$0xff]  ;;  %v488_v3 = vld [vmem:[#allocation5 + $0x130] sm:$0xff]  ;;  %v495_v6 = vld [vmem:[#allocation5 + $0x168] sm:$0xff]  ;;  %v5813_v7 = vpack.c.bf16 %v486_v62, %v482_v61 }
  0x6a   :  { %3653 = vmatprep.subr.bf16.mxu1 %v5790_v53  ;;  %251 = vmatprep.mubr.f32.mxu0 %v6987_v0  ;;  %v493_v8 = vld [vmem:[#allocation5 + $0x158] sm:$0xff]  ;;  %v5817_v12 = vpack.c.bf16 %v488_v3, %v484_v2  ;;  %v490_v13 = vld [vmem:[#allocation5 + $0x140] sm:$0xff]  ;;  %v96_v16 = vld [vmem:[%s6978_s0 + $0x28] sm:$0xff]  ;;  %v5824_v17 = vpack.c.bf16 %v495_v6, %v491_v5 }
  0x6b   :  { %3623 = vmatpush1.bf16.msra.mxu0 %v5794_v56  ;;  %364 = vmatprep.mubr.f32.mxu1 %v6987_v0  ;;  %v497_v9 = vld [vmem:[#allocation5 + $0x178] sm:$0xff]  ;;  %v494_v14 = vld [vmem:[#allocation5 + $0x160] sm:$0xff]  ;;  %v492_v18 = vld [vmem:[#allocation5 + $0x150] sm:$0xff] }
  0x6c   :  { %3655 = vmatpush1.bf16.msra.mxu1 %v5798_v60  ;;  %3493 = vmatmul.mubr.msk.f32.gmra.mrb[8].mxu0 %vm125_vm1, %v95_v63  ;;  %v496_v20 = vld [vmem:[#allocation5 + $0x170] sm:$0xff]  ;;  %v5828_v21 = vpack.c.bf16 %v497_v9, %v493_v8  ;;  %v499_v22 = vld [vmem:[#allocation5 + $0x188] sm:$0xff]  ;;  %v5832_v26 = vpack.c.bf16 %v494_v14, %v490_v13  ;;  %v501_v27 = vld [vmem:[#allocation5 + $0x198] sm:$0xff] }
  0x6d   :  { %3503 = vmatmul.mubr.msk.f32.gmra.mrb[8].mxu1 %vm125_vm1, %v95_v63  ;;  %3625 = vmatprep.subr.bf16.mxu0 %v5805_v1  ;;  %v503_v25 = vld [vmem:[#allocation5 + $0x1a8] sm:$0xff]  ;;  %v505_v29 = vld [vmem:[#allocation5 + $0x1b8] sm:$0xff]  ;;  %v5836_v30 = vpack.c.bf16 %v496_v20, %v492_v18  ;;  %v498_v31 = vld [vmem:[#allocation5 + $0x180] sm:$0xff] }
  0x6e   :  { %3657 = vmatprep.subr.bf16.mxu1 %v5809_v4  ;;  %257 = vmatprep.mubr.f32.mxu0 %v6987_v0  ;;  %v502_v33 = vld [vmem:[#allocation5 + $0x1a0] sm:$0xff]  ;;  %v97_v34 = vld [vmem:[%s6978_s0 + $0x30] sm:$0xff]  ;;  %v5843_v35 = vpack.c.bf16 %v503_v25, %v499_v22  ;;  %v5847_v40 = vpack.c.bf16 %v505_v29, %v501_v27  ;;  %v507_v42 = vld [vmem:[#allocation5 + $0x1c8] sm:$0xff] }
  0x6f   :  { %3627 = vmatpush1.bf16.msra.mxu0 %v5813_v7  ;;  %370 = vmatprep.mubr.f32.mxu1 %v6987_v0  ;;  %v500_v38 = vld [vmem:[#allocation5 + $0x190] sm:$0xff]  ;;  %v511_v43 = vld [vmem:[#allocation5 + $0x1e8] sm:$0xff]  ;;  %v5851_v44 = vpack.c.bf16 %v502_v33, %v498_v31  ;;  %v98_v46 = vld [vmem:[%s6978_s0 + $0x38] sm:$0xff] }
  0x70   :  { %3659 = vmatpush1.bf16.msra.mxu1 %v5817_v12  ;;  %3494 = vmatmul.mubr.msk.f32.gmra.mrb[10].mxu0 %vm125_vm1, %v96_v16  ;;  %v504_v39 = vld [vmem:[#allocation5 + $0x1b0] sm:$0xff]  ;;  %v509_v47 = vld [vmem:[#allocation5 + $0x1d8] sm:$0xff]  ;;  %v506_v51 = vld [vmem:[#allocation5 + $0x1c0] sm:$0xff]  ;;  %v5862_v55 = vpack.c.bf16 %v511_v43, %v507_v42 }
  0x71   :  { %3504 = vmatmul.mubr.msk.f32.gmra.mrb[10].mxu1 %vm125_vm1, %v96_v16  ;;  %3629 = vmatprep.subr.bf16.mxu0 %v5824_v17  ;;  %v513_v48 = vld [vmem:[#allocation5 + $0x1f8] sm:$0xff]  ;;  %v5858_v50 = vpack.c.bf16 %v504_v39, %v500_v38  ;;  %v510_v52 = vld [vmem:[#allocation5 + $0x1e0] sm:$0xff]  ;;  %v508_v54 = vld [vmem:[#allocation5 + $0x1d0] sm:$0xff] }
  0x72   :  { %3661 = vmatprep.subr.bf16.mxu1 %v5828_v21  ;;  %263 = vmatprep.mubr.f32.mxu0 %v6987_v0  ;;  %v512_v57 = vld [vmem:[#allocation5 + $0x1f0] sm:$0xff]  ;;  %v5866_v61 = vpack.c.bf16 %v513_v48, %v509_v47  ;;  %v687_v62 = vld [vmem:[#allocation8 + $0x18] sm:$0xff]  ;;  %v5870_v2 = vpack.c.bf16 %v510_v52, %v506_v51  ;;  %v684_v6 = vld [vmem:[#allocation8] sm:$0xff] }
  0x73   :  { %3631 = vmatpush1.bf16.msra.mxu0 %v5832_v26  ;;  %376 = vmatprep.mubr.f32.mxu1 %v6987_v0  ;;  %v685_v58 = vld [vmem:[#allocation8 + $0x8] sm:$0xff]  ;;  %v691_v63 = vld [vmem:[#allocation8 + $0x38] sm:$0xff]  ;;  %v5874_v3 = vpack.c.bf16 %v512_v57, %v508_v54  ;;  %v688_v8 = vld [vmem:[#allocation8 + $0x20] sm:$0xff] }
  0x74   :  { %3663 = vmatpush1.bf16.msra.mxu1 %v5836_v30  ;;  %3495 = vmatmul.mubr.msk.f32.gmra.mrb[12].mxu0 %vm125_vm1, %v97_v34  ;;  %v689_v59 = vld [vmem:[#allocation8 + $0x28] sm:$0xff]  ;;  %v686_v9 = vld [vmem:[#allocation8 + $0x10] sm:$0xff]  ;;  %v5880_v13 = vpack.c.bf16 %v691_v63, %v687_v62  ;;  %v695_v20 = vld [vmem:[#allocation8 + $0x58] sm:$0xff]  ;;  %v5886_v25 = vpack.c.bf16 %v688_v8, %v684_v6 }
  0x75   :  { %3505 = vmatmul.mubr.msk.f32.gmra.mrb[12].mxu1 %vm125_vm1, %v97_v34  ;;  %3633 = vmatprep.subr.bf16.mxu0 %v5843_v35  ;;  %v5876_v5 = vpack.c.bf16 %v689_v59, %v685_v58  ;;  %v690_v14 = vld [vmem:[#allocation8 + $0x30] sm:$0xff]  ;;  %v693_v16 = vld [vmem:[#allocation8 + $0x48] sm:$0xff]  ;;  %v699_v22 = vld [vmem:[#allocation8 + $0x78] sm:$0xff] }
  0x76   :  { %3665 = vmatprep.subr.bf16.mxu1 %v5847_v40  ;;  %269 = vmatprep.mubr.f32.mxu0 %v6987_v0  ;;  %v697_v18 = vld [vmem:[#allocation8 + $0x68] sm:$0xff]  ;;  %v5890_v27 = vpack.c.bf16 %v690_v14, %v686_v9  ;;  %v692_v31 = vld [vmem:[#allocation8 + $0x40] sm:$0xff]  ;;  %v694_v34 = vld [vmem:[#allocation8 + $0x50] sm:$0xff]  ;;  %v5895_v38 = vpack.c.bf16 %v699_v22, %v695_v20 }
  0x77   :  { %3635 = vmatpush1.bf16.msra.mxu0 %v5851_v44  ;;  %382 = vmatprep.mubr.f32.mxu1 %v6987_v0  ;;  %v5892_v29 = vpack.c.bf16 %v697_v18, %v693_v16  ;;  %v696_v33 = vld [vmem:[#allocation8 + $0x60] sm:$0xff]  ;;  %v698_v39 = vld [vmem:[#allocation8 + $0x70] sm:$0xff]  ;;  %v701_v42 = vld [vmem:[#allocation8 + $0x88] sm:$0xff] }
  0x78   :  { %3667 = vmatpush1.bf16.msra.mxu1 %v5858_v50  ;;  %3496 = vmatmul.mubr.msk.f32.gmra.mrb[14].mxu0 %vm125_vm1, %v98_v46  ;;  %v705_v43 = vld [vmem:[#allocation8 + $0xa8] sm:$0xff]  ;;  %v707_v47 = vld [vmem:[#allocation8 + $0xb8] sm:$0xff]  ;;  %v5900_v48 = vpack.c.bf16 %v696_v33, %v692_v31  ;;  %v5904_v51 = vpack.c.bf16 %v698_v39, %v694_v34  ;;  %v700_v54 = vld [vmem:[#allocation8 + $0x80] sm:$0xff] }
  0x79   :  { %3506 = vmatmul.mubr.msk.f32.gmra.mrb[14].mxu1 %vm125_vm1, %v98_v46  ;;  %3637 = vmatprep.subr.bf16.mxu0 %v5862_v55  ;;  %v703_v46 = vld [vmem:[#allocation8 + $0x98] sm:$0xff]  ;;  %v5906_v52 = vpack.c.bf16 %v705_v43, %v701_v42  ;;  %v704_v57 = vld [vmem:[#allocation8 + $0xa0] sm:$0xff]  ;;  %v702_v58 = vld [vmem:[#allocation8 + $0x90] sm:$0xff] }
  0x7a   :  { %3669 = vmatprep.subr.bf16.mxu1 %v5866_v61  ;;  %578 = vmatprep.mubr.f32.mxu0 %v6987_v0  ;;  %v5909_v59 = vpack.c.bf16 %v707_v47, %v703_v46  ;;  %v706_v62 = vld [vmem:[#allocation8 + $0xb0] sm:$0xff]  ;;  %v709_v63 = vld [vmem:[#allocation8 + $0xc8] sm:$0xff]  ;;  %v711_v8 = vld [vmem:[#allocation8 + $0xd8] sm:$0xff]  ;;  %v5914_v14 = vpack.c.bf16 %v704_v57, %v700_v54 }
  0x7b   :  { %3639 = vmatpush1.bf16.msra.mxu0 %v5870_v2  ;;  %649 = vmatprep.mubr.f32.mxu1 %v6987_v0  ;;  %v713_v6 = vld [vmem:[#allocation8 + $0xe8] sm:$0xff]  ;;  %v715_v9 = vld [vmem:[#allocation8 + $0xf8] sm:$0xff]  ;;  %v5918_v16 = vpack.c.bf16 %v706_v62, %v702_v58  ;;  %v708_v20 = vld [vmem:[#allocation8 + $0xc0] sm:$0xff] }
  0x7c   :  { %3671 = vmatpush1.bf16.msra.mxu1 %v5874_v3  ;;  %3673 = vmatprep.subr.bf16.mxu0 %v5876_v5  ;;  %7123 = vst [vmem:[#allocation16_spill] sm:$0xff] %v5914_v14  ;;  %v5920_v18 = vpack.c.bf16 %v713_v6, %v709_v63  ;;  %v712_v22 = vld [vmem:[#allocation8 + $0xe0] sm:$0xff]  ;;  %v710_v31 = vld [vmem:[#allocation8 + $0xd0] sm:$0xff]  ;;  %v5923_v33 = vpack.c.bf16 %v715_v9, %v711_v8  ;;  %v717_v39 = vld [vmem:[#allocation8 + $0x108] sm:$0xff] }
  0x7d   :  { %3737 = vmatprep.subr.bf16.mxu1 %v5880_v13  ;;  %7124 = vst [vmem:[#allocation17_spill] sm:$0xff] %v5918_v16  ;;  %v714_v34 = vld [vmem:[#allocation8 + $0xf0] sm:$0xff]  ;;  %v721_v42 = vld [vmem:[#allocation8 + $0x128] sm:$0xff]  ;;  %v719_v43 = vld [vmem:[#allocation8 + $0x118] sm:$0xff]  ;;  %v5926_v47 = vpack.c.bf16 %v712_v22, %v708_v20 }
  0x7e   :  { %579 = vmatmul.mubr.f32.vlgmr.msra.gmra.mrb[0].mxu0 %v6987_v0  ;;  %7125 = vst [vmem:[#allocation18_spill] sm:$0xff] %v5920_v18  ;;  %7126 = vst [vmem:[#allocation19_spill] sm:$0xff] %v5923_v33  ;;  %v723_v46 = vld [vmem:[#allocation8 + $0x138] sm:$0xff]  ;;  %v5930_v54 = vpack.c.bf16 %v714_v34, %v710_v31  ;;  %v5932_v57 = vpack.c.bf16 %v721_v42, %v717_v39  ;;  %v716_v58 = vld [vmem:[#allocation8 + $0x100] sm:$0xff] }
  0x7f   :  { %650 = vmatmul.mubr.f32.vlgmr.msra.gmra.mrb[0].mxu1 %v6987_v0  ;;  %3675 = vmatpush1.bf16.msra.mxu0 %v5886_v25  ;;  %7127 = vst [vmem:[#allocation20_spill] sm:$0xff] %v5926_v47  ;;  %v720_v62 = vld [vmem:[#allocation8 + $0x120] sm:$0xff]  ;;  %v5935_v63 = vpack.c.bf16 %v723_v46, %v719_v43  ;;  %v718_v6 = vld [vmem:[#allocation8 + $0x110] sm:$0xff]  ;;  %v725_v22 = vld [vmem:[#allocation8 + $0x148] sm:$0xff] }
  0x80   :  { %3739 = vmatpush1.bf16.msra.mxu1 %v5890_v27  ;;  %3677 = vmatprep.subr.bf16.mxu0 %v5892_v29  ;;  %7128 = vst [vmem:[#allocation21_spill] sm:$0xff] %v5930_v54  ;;  %7129 = vst [vmem:[#allocation22_spill] sm:$0xff] %v5932_v57  ;;  %v722_v8 = vld [vmem:[#allocation8 + $0x130] sm:$0xff]  ;;  %v5938_v9 = vpack.c.bf16 %v720_v62, %v716_v58  ;;  %v729_v31 = vld [vmem:[#allocation8 + $0x168] sm:$0xff] }
  0x81   :  { %3741 = vmatprep.subr.bf16.mxu1 %v5895_v38  ;;  %876 = vmatprep.mubr.f32.mxu0 %v6987_v0  ;;  %7130 = vst [vmem:[#allocation23_spill] sm:$0xff] %v5935_v63  ;;  %v5942_v20 = vpack.c.bf16 %v722_v8, %v718_v6  ;;  %v727_v34 = vld [vmem:[#allocation8 + $0x158] sm:$0xff]  ;;  %v5947_v39 = vpack.c.bf16 %v729_v31, %v725_v22  ;;  %v724_v43 = vld [vmem:[#allocation8 + $0x140] sm:$0xff]  ;;  %v726_v6 = vld [vmem:[#allocation8 + $0x150] sm:$0xff] }
  0x82   :  { %947 = vmatprep.mubr.f32.mxu1 %v6987_v0  ;;  %7131 = vst [vmem:[#allocation24_spill] sm:$0xff] %v5938_v9  ;;  %v731_v42 = vld [vmem:[#allocation8 + $0x178] sm:$0xff]  ;;  %v728_v46 = vld [vmem:[#allocation8 + $0x160] sm:$0xff]  ;;  %v730_v8 = vld [vmem:[#allocation8 + $0x170] sm:$0xff] }
  0x83   :  { %3679 = vmatpush1.bf16.msra.mxu0 %v5900_v48  ;;  %7132 = vst [vmem:[#allocation25_spill] sm:$0xff] %v5942_v20  ;;  %7133 = vst [vmem:[#allocation26_spill] sm:$0xff] %v5947_v39  ;;  %v5949_v58 = vpack.c.bf16 %v731_v42, %v727_v34  ;;  %v5951_v62 = vpack.c.bf16 %v728_v46, %v724_v43  ;;  %v5954_v0 = vpack.c.bf16 %v730_v8, %v726_v6  ;;  %v737_v22 = vld [vmem:[#allocation8 + $0x1a8] sm:$0xff]  ;;  %v735_v31 = vld [vmem:[#allocation8 + $0x198] sm:$0xff] }
  0x84   :  { %3743 = vmatpush1.bf16.msra.mxu1 %v5904_v51  ;;  %3681 = vmatprep.subr.bf16.mxu0 %v5906_v52  ;;  %v739_v34 = vld [vmem:[#allocation8 + $0x1b8] sm:$0xff]  ;;  %v732_v42 = vld [vmem:[#allocation8 + $0x180] sm:$0xff]  ;;  %v734_v6 = vld [vmem:[#allocation8 + $0x190] sm:$0xff] }
  0x85   :  { %3745 = vmatprep.subr.bf16.mxu1 %v5909_v59  ;;  %7134 = vst [vmem:[#allocation27_spill] sm:$0xff] %v5949_v58  ;;  %7135 = vst [vmem:[#allocation28_spill] sm:$0xff] %v5951_v62  ;;  %v736_v43 = vld [vmem:[#allocation8 + $0x1a0] sm:$0xff]  ;;  %v5961_v46 = vpack.c.bf16 %v739_v34, %v735_v31  ;;  %v738_v8 = vld [vmem:[#allocation8 + $0x1b0] sm:$0xff] }
  0x86   :  { %7136 = vst [vmem:[#allocation29_spill] sm:$0xff] %v5954_v0  ;;  %v747_v31 = vld [vmem:[#allocation8 + $0x1f8] sm:$0xff]  ;;  %v740_v34 = vld [vmem:[#allocation8 + $0x1c0] sm:$0xff] }
  0x87   :  { %3683 = vmatpush1.bf16.msra.mxu0 %v5914_v14  ;;  %7138 = vst [vmem:[#allocation31_spill] sm:$0xff] %v5961_v46 }
  0x88   :  { %3747 = vmatpush1.bf16.msra.mxu1 %v5918_v16  ;;  %3685 = vmatprep.subr.bf16.mxu0 %v5920_v18 }
  0x89   :  { %3749 = vmatprep.subr.bf16.mxu1 %v5923_v33 }
  0x8b   :  { %3687 = vmatpush1.bf16.msra.mxu0 %v5926_v47 }
  0x8c   :  { %3751 = vmatpush1.bf16.msra.mxu1 %v5930_v54  ;;  %3689 = vmatprep.subr.bf16.mxu0 %v5932_v57  ;;  %v799_v57 = vld [vmem:[#allocation8 + $0x398] sm:$0xff] }
  0x8d   :  { %3753 = vmatprep.subr.bf16.mxu1 %v5935_v63  ;;  %v5963_v63 = vpack.c.bf16 %v736_v43, %v732_v42  ;;  %v744_v42 = vld [vmem:[#allocation8 + $0x1e0] sm:$0xff]  ;;  %v803_v54 = vld [vmem:[#allocation8 + $0x3b8] sm:$0xff] }
  0x8f   :  { %3691 = vmatpush1.bf16.msra.mxu0 %v5938_v9  ;;  %7139 = vst [vmem:[#allocation32_spill] sm:$0xff] %v5963_v63 }
  0x90   :  { %3755 = vmatpush1.bf16.msra.mxu1 %v5942_v20  ;;  %3693 = vmatprep.subr.bf16.mxu0 %v5947_v39  ;;  %v733_v20 = vld [vmem:[#allocation8 + $0x188] sm:$0xff]  ;;  %v5975_v39 = vpack.c.bf16 %v744_v42, %v740_v34  ;;  %v752_v34 = vld [vmem:[#allocation8 + $0x220] sm:$0xff] }
  0x91   :  { %3757 = vmatprep.subr.bf16.mxu1 %v5949_v58  ;;  %v5959_v9 = vpack.c.bf16 %v737_v22, %v733_v20  ;;  %v5966_v58 = vpack.c.bf16 %v738_v8, %v734_v6  ;;  %v745_v20 = vld [vmem:[#allocation8 + $0x1e8] sm:$0xff]  ;;  %v743_v22 = vld [vmem:[#allocation8 + $0x1d8] sm:$0xff]  ;;  %v742_v6 = vld [vmem:[#allocation8 + $0x1d0] sm:$0xff] }
  0x92   :  { %v5973_v43 = vpack.c.bf16 %v747_v31, %v743_v22  ;;  %7143 = vst [vmem:[#allocation36_spill] sm:$0xff] %v5975_v39  ;;  %v746_v8 = vld [vmem:[#allocation8 + $0x1f0] sm:$0xff]  ;;  %v755_v22 = vld [vmem:[#allocation8 + $0x238] sm:$0xff]  ;;  %v748_v31 = vld [vmem:[#allocation8 + $0x200] sm:$0xff] }
  0x93   :  { %3695 = vmatpush1.bf16.msra.mxu0 %v5951_v62  ;;  %7137 = vst [vmem:[#allocation30_spill] sm:$0xff] %v5959_v9  ;;  %7140 = vst [vmem:[#allocation33_spill] sm:$0xff] %v5966_v58 }
  0x94   :  { %3759 = vmatpush1.bf16.msra.mxu1 %v5954_v0  ;;  %3697 = vmatprep.subr.bf16.mxu0 %v5959_v9  ;;  %v741_v0 = vld [vmem:[#allocation8 + $0x1c8] sm:$0xff]  ;;  %7142 = vst [vmem:[#allocation35_spill] sm:$0xff] %v5973_v43  ;;  %v5987_v9 = vpack.c.bf16 %v752_v34, %v748_v31  ;;  %v760_v31 = vld [vmem:[#allocation8 + $0x260] sm:$0xff] }
  0x95   :  { %3761 = vmatprep.subr.bf16.mxu1 %v5961_v46  ;;  %v5971_v62 = vpack.c.bf16 %v745_v20, %v741_v0  ;;  %v5978_v46 = vpack.c.bf16 %v746_v8, %v742_v6  ;;  %v753_v0 = vld [vmem:[#allocation8 + $0x228] sm:$0xff]  ;;  %v751_v20 = vld [vmem:[#allocation8 + $0x218] sm:$0xff]  ;;  %v750_v6 = vld [vmem:[#allocation8 + $0x210] sm:$0xff] }
  0x96   :  { %v5985_v42 = vpack.c.bf16 %v755_v22, %v751_v20  ;;  %7147 = vst [vmem:[#allocation40_spill] sm:$0xff] %v5987_v9  ;;  %v754_v8 = vld [vmem:[#allocation8 + $0x230] sm:$0xff]  ;;  %v763_v20 = vld [vmem:[#allocation8 + $0x278] sm:$0xff]  ;;  %v756_v22 = vld [vmem:[#allocation8 + $0x240] sm:$0xff] }
  0x97   :  { %3699 = vmatpush1.bf16.msra.mxu0 %v5963_v63  ;;  %7141 = vst [vmem:[#allocation34_spill] sm:$0xff] %v5971_v62  ;;  %7144 = vst [vmem:[#allocation37_spill] sm:$0xff] %v5978_v46 }
  0x98   :  { %3763 = vmatpush1.bf16.msra.mxu1 %v5966_v58  ;;  %3701 = vmatprep.subr.bf16.mxu0 %v5971_v62  ;;  %v749_v58 = vld [vmem:[#allocation8 + $0x208] sm:$0xff]  ;;  %7146 = vst [vmem:[#allocation39_spill] sm:$0xff] %v5985_v42  ;;  %v5999_v62 = vpack.c.bf16 %v760_v31, %v756_v22  ;;  %v768_v22 = vld [vmem:[#allocation8 + $0x2a0] sm:$0xff] }
  0x99   :  { %3765 = vmatprep.subr.bf16.mxu1 %v5973_v43  ;;  %v5983_v63 = vpack.c.bf16 %v753_v0, %v749_v58  ;;  %v5990_v43 = vpack.c.bf16 %v754_v8, %v750_v6  ;;  %v761_v58 = vld [vmem:[#allocation8 + $0x268] sm:$0xff]  ;;  %v759_v0 = vld [vmem:[#allocation8 + $0x258] sm:$0xff]  ;;  %v758_v6 = vld [vmem:[#allocation8 + $0x250] sm:$0xff] }
  0x9a   :  { %v5997_v34 = vpack.c.bf16 %v763_v20, %v759_v0  ;;  %7151 = vst [vmem:[#allocation44_spill] sm:$0xff] %v5999_v62  ;;  %v762_v8 = vld [vmem:[#allocation8 + $0x270] sm:$0xff]  ;;  %v771_v0 = vld [vmem:[#allocation8 + $0x2b8] sm:$0xff]  ;;  %v764_v20 = vld [vmem:[#allocation8 + $0x280] sm:$0xff] }
  0x9b   :  { %3703 = vmatpush1.bf16.msra.mxu0 %v5975_v39  ;;  %7145 = vst [vmem:[#allocation38_spill] sm:$0xff] %v5983_v63  ;;  %7148 = vst [vmem:[#allocation41_spill] sm:$0xff] %v5990_v43 }
  0x9c   :  { %3767 = vmatpush1.bf16.msra.mxu1 %v5978_v46  ;;  %3705 = vmatprep.subr.bf16.mxu0 %v5983_v63  ;;  %v757_v46 = vld [vmem:[#allocation8 + $0x248] sm:$0xff]  ;;  %7150 = vst [vmem:[#allocation43_spill] sm:$0xff] %v5997_v34  ;;  %v6011_v63 = vpack.c.bf16 %v768_v22, %v764_v20  ;;  %v776_v20 = vld [vmem:[#allocation8 + $0x2e0] sm:$0xff] }
  0x9d   :  { %3769 = vmatprep.subr.bf16.mxu1 %v5985_v42  ;;  %v5995_v39 = vpack.c.bf16 %v761_v58, %v757_v46  ;;  %v6002_v42 = vpack.c.bf16 %v762_v8, %v758_v6  ;;  %v769_v46 = vld [vmem:[#allocation8 + $0x2a8] sm:$0xff]  ;;  %v767_v58 = vld [vmem:[#allocation8 + $0x298] sm:$0xff]  ;;  %v766_v6 = vld [vmem:[#allocation8 + $0x290] sm:$0xff] }
  0x9e   :  { %v6009_v31 = vpack.c.bf16 %v771_v0, %v767_v58  ;;  %7155 = vst [vmem:[#allocation48_spill] sm:$0xff] %v6011_v63  ;;  %v770_v8 = vld [vmem:[#allocation8 + $0x2b0] sm:$0xff]  ;;  %v779_v58 = vld [vmem:[#allocation8 + $0x2f8] sm:$0xff]  ;;  %v772_v0 = vld [vmem:[#allocation8 + $0x2c0] sm:$0xff] }
  0x9f   :  { %3707 = vmatpush1.bf16.msra.mxu0 %v5987_v9  ;;  %7149 = vst [vmem:[#allocation42_spill] sm:$0xff] %v5995_v39  ;;  %7152 = vst [vmem:[#allocation45_spill] sm:$0xff] %v6002_v42 }
  0xa0   :  { %3771 = vmatpush1.bf16.msra.mxu1 %v5990_v43  ;;  %3709 = vmatprep.subr.bf16.mxu0 %v5995_v39  ;;  %v765_v43 = vld [vmem:[#allocation8 + $0x288] sm:$0xff]  ;;  %7154 = vst [vmem:[#allocation47_spill] sm:$0xff] %v6009_v31  ;;  %v6023_v39 = vpack.c.bf16 %v776_v20, %v772_v0  ;;  %v784_v0 = vld [vmem:[#allocation8 + $0x320] sm:$0xff] }
  0xa1   :  { %3773 = vmatprep.subr.bf16.mxu1 %v5997_v34  ;;  %v6007_v9 = vpack.c.bf16 %v769_v46, %v765_v43  ;;  %v6014_v34 = vpack.c.bf16 %v770_v8, %v766_v6  ;;  %v777_v43 = vld [vmem:[#allocation8 + $0x2e8] sm:$0xff]  ;;  %v775_v46 = vld [vmem:[#allocation8 + $0x2d8] sm:$0xff]  ;;  %v774_v6 = vld [vmem:[#allocation8 + $0x2d0] sm:$0xff] }
  0xa2   :  { %v6021_v22 = vpack.c.bf16 %v779_v58, %v775_v46  ;;  %7159 = vst [vmem:[#allocation52_spill] sm:$0xff] %v6023_v39  ;;  %v778_v8 = vld [vmem:[#allocation8 + $0x2f0] sm:$0xff]  ;;  %v787_v46 = vld [vmem:[#allocation8 + $0x338] sm:$0xff]  ;;  %v780_v58 = vld [vmem:[#allocation8 + $0x300] sm:$0xff] }
  0xa3   :  { %3711 = vmatpush1.bf16.msra.mxu0 %v5999_v62  ;;  %7153 = vst [vmem:[#allocation46_spill] sm:$0xff] %v6007_v9  ;;  %7156 = vst [vmem:[#allocation49_spill] sm:$0xff] %v6014_v34 }
  0xa4   :  { %3775 = vmatpush1.bf16.msra.mxu1 %v6002_v42  ;;  %3713 = vmatprep.subr.bf16.mxu0 %v6007_v9  ;;  %v773_v42 = vld [vmem:[#allocation8 + $0x2c8] sm:$0xff]  ;;  %7158 = vst [vmem:[#allocation51_spill] sm:$0xff] %v6021_v22  ;;  %v6035_v9 = vpack.c.bf16 %v784_v0, %v780_v58  ;;  %v792_v58 = vld [vmem:[#allocation8 + $0x360] sm:$0xff] }
  0xa5   :  { %3777 = vmatprep.subr.bf16.mxu1 %v6009_v31  ;;  %v6019_v62 = vpack.c.bf16 %v777_v43, %v773_v42  ;;  %v6026_v31 = vpack.c.bf16 %v778_v8, %v774_v6  ;;  %v785_v42 = vld [vmem:[#allocation8 + $0x328] sm:$0xff]  ;;  %v783_v43 = vld [vmem:[#allocation8 + $0x318] sm:$0xff]  ;;  %v782_v6 = vld [vmem:[#allocation8 + $0x310] sm:$0xff] }
  0xa6   :  { %v6033_v20 = vpack.c.bf16 %v787_v46, %v783_v43  ;;  %7163 = vst [vmem:[#allocation56_spill] sm:$0xff] %v6035_v9  ;;  %v786_v8 = vld [vmem:[#allocation8 + $0x330] sm:$0xff]  ;;  %v795_v43 = vld [vmem:[#allocation8 + $0x378] sm:$0xff]  ;;  %v788_v46 = vld [vmem:[#allocation8 + $0x340] sm:$0xff] }
  0xa7   :  { %3715 = vmatpush1.bf16.msra.mxu0 %v6011_v63  ;;  %7157 = vst [vmem:[#allocation50_spill] sm:$0xff] %v6019_v62  ;;  %7160 = vst [vmem:[#allocation53_spill] sm:$0xff] %v6026_v31 }
  0xa8   :  { %3779 = vmatpush1.bf16.msra.mxu1 %v6014_v34  ;;  %3717 = vmatprep.subr.bf16.mxu0 %v6019_v62  ;;  %v781_v34 = vld [vmem:[#allocation8 + $0x308] sm:$0xff]  ;;  %7162 = vst [vmem:[#allocation55_spill] sm:$0xff] %v6033_v20  ;;  %v6047_v62 = vpack.c.bf16 %v792_v58, %v788_v46  ;;  %v798_v46 = vld [vmem:[#allocation8 + $0x390] sm:$0xff] }
  0xa9   :  { %3781 = vmatprep.subr.bf16.mxu1 %v6021_v22  ;;  %v6031_v63 = vpack.c.bf16 %v785_v42, %v781_v34  ;;  %v6038_v22 = vpack.c.bf16 %v786_v8, %v782_v6  ;;  %v793_v34 = vld [vmem:[#allocation8 + $0x368] sm:$0xff]  ;;  %v791_v42 = vld [vmem:[#allocation8 + $0x358] sm:$0xff]  ;;  %v790_v6 = vld [vmem:[#allocation8 + $0x350] sm:$0xff] }
  0xaa   :  { %v6045_v0 = vpack.c.bf16 %v795_v43, %v791_v42  ;;  %7167 = vst [vmem:[#allocation60_spill] sm:$0xff] %v6047_v62  ;;  %v794_v8 = vld [vmem:[#allocation8 + $0x370] sm:$0xff]  ;;  %v796_v42 = vld [vmem:[#allocation8 + $0x380] sm:$0xff] }
  0xab   :  { %3719 = vmatpush1.bf16.msra.mxu0 %v6023_v39  ;;  %7161 = vst [vmem:[#allocation54_spill] sm:$0xff] %v6031_v63  ;;  %7164 = vst [vmem:[#allocation57_spill] sm:$0xff] %v6038_v22  ;;  %v800_v43 = vld [vmem:[#allocation8 + $0x3a0] sm:$0xff] }
  0xac   :  { %3783 = vmatpush1.bf16.msra.mxu1 %v6026_v31  ;;  %3721 = vmatprep.subr.bf16.mxu0 %v6031_v63  ;;  %v789_v31 = vld [vmem:[#allocation8 + $0x348] sm:$0xff]  ;;  %7166 = vst [vmem:[#allocation59_spill] sm:$0xff] %v6045_v0  ;;  %v6059_v58 = vpack.c.bf16 %v800_v43, %v796_v42  ;;  %v810_v42 = vld [vmem:[#allocation8 + $0x3f0] sm:$0xff] }
  0xad   :  { %3785 = vmatprep.subr.bf16.mxu1 %v6033_v20  ;;  %v6043_v39 = vpack.c.bf16 %v793_v34, %v789_v31  ;;  %v797_v63 = vld [vmem:[#allocation8 + $0x388] sm:$0xff]  ;;  %v6056_v34 = vpack.c.bf16 %v803_v54, %v799_v57  ;;  %v807_v54 = vld [vmem:[#allocation8 + $0x3d8] sm:$0xff] }
  0xae   :  { %v801_v20 = vld [vmem:[#allocation8 + $0x3a8] sm:$0xff]  ;;  %7171 = vst [vmem:[#allocation64_spill] sm:$0xff] %v6059_v58  ;;  %v811_v57 = vld [vmem:[#allocation8 + $0x3f8] sm:$0xff] }
  0xaf   :  { %3723 = vmatpush1.bf16.msra.mxu0 %v6035_v9  ;;  %7165 = vst [vmem:[#allocation58_spill] sm:$0xff] %v6043_v39  ;;  %v6050_v9 = vpack.c.bf16 %v794_v8, %v790_v6  ;;  %v6054_v31 = vpack.c.bf16 %v801_v20, %v797_v63  ;;  %7170 = vst [vmem:[#allocation63_spill] sm:$0xff] %v6056_v34  ;;  %v802_v6 = vld [vmem:[#allocation8 + $0x3b0] sm:$0xff]  ;;  %v805_v8 = vld [vmem:[#allocation8 + $0x3c8] sm:$0xff] }
  0xb0   :  { %3787 = vmatpush1.bf16.msra.mxu1 %v6038_v22  ;;  %3725 = vmatprep.subr.bf16.mxu0 %v6043_v39  ;;  %v809_v39 = vld [vmem:[#allocation8 + $0x3e8] sm:$0xff]  ;;  %v804_v20 = vld [vmem:[#allocation8 + $0x3c0] sm:$0xff] }
  0xb1   :  { %7168 = vst [vmem:[#allocation61_spill] sm:$0xff] %v6050_v9  ;;  %3789 = vmatprep.subr.bf16.mxu1 %v6045_v0  ;;  %7169 = vst [vmem:[#allocation62_spill] sm:$0xff] %v6054_v31  ;;  %v6063_v0 = vpack.c.bf16 %v802_v6, %v798_v46  ;;  %v6065_v63 = vpack.c.bf16 %v809_v39, %v805_v8  ;;  %v808_v22 = vld [vmem:[#allocation8 + $0x3e0] sm:$0xff]  ;;  %v105_v39 = vlaneseq  ;;  %v103_v8 = vld [vmem:[#allocation7] sm:$0xf] }
  0xb2   :  { %v6070_v43 = vpack.c.bf16 %v808_v22, %v804_v20 }
  0xb3   :  { %3727 = vmatpush1.bf16.msra.mxu0 %v6047_v62  ;;  %7172 = vst [vmem:[#allocation65_spill] sm:$0xff] %v6063_v0  ;;  %7173 = vst [vmem:[#allocation66_spill] sm:$0xff] %v6065_v63  ;;  %v6067_v62 = vpack.c.bf16 %v811_v57, %v807_v54  ;;  %v6081_v6 = vshrl.u32 %v105_v39, 7 }
  0xb4   :  { %3791 = vmatpush1.bf16.msra.mxu1 %v6050_v9  ;;  %3729 = vmatprep.subr.bf16.mxu0 %v6054_v31  ;;  %v806_v9 = vld [vmem:[#allocation8 + $0x3d0] sm:$0xff]  ;;  %7175 = vst [vmem:[#allocation68_spill] sm:$0xff] %v6070_v43 }
  0xb5   :  { %3793 = vmatprep.subr.bf16.mxu1 %v6056_v34  ;;  %7174 = vst [vmem:[#allocation67_spill] sm:$0xff] %v6067_v62  ;;  %v6074_v46 = vpack.c.bf16 %v810_v42, %v806_v9  ;;  %7177 = vst [vmem:[#allocation70_spill] sm:$0xff] %v6081_v6  ;;  %v7083_v22 = vsub.s32 0, %v6081_v6  ;;  %v7084_v54 = vsub.s32 1, %v6081_v6  ;;  %v7091_v42 = vsub.s32 3, %v6081_v6 }
  0xb7   :  { %3731 = vmatpush1.bf16.msra.mxu0 %v6059_v58  ;;  %7176 = vst [vmem:[#allocation69_spill] sm:$0xff] %v6074_v46  ;;  %v6087_v9 = vrot.slane %v103_v8, %v7083_v22  ;;  %v6091_v57 = vrot.slane %v103_v8, %v7084_v54  ;;  %v6098_v22 = vrot.slane %v103_v8, %v7091_v42  ;;  %v7100_v54 = vsub.s32 2, %v6081_v6 }
  0xb8   :  { %3795 = vmatpush1.bf16.msra.mxu1 %v6063_v0  ;;  %3733 = vmatprep.subr.bf16.mxu0 %v6065_v63 }
  0xb9   :  { %3797 = vmatprep.subr.bf16.mxu1 %v6067_v62  ;;  %7178 = vst [vmem:[#allocation71_spill] sm:$0xff] %v6087_v9  ;;  %7179 = vst [vmem:[#allocation72_spill] sm:$0xff] %v6091_v57 }
  0xba   :  { %7180 = vst [vmem:[#allocation73_spill] sm:$0xff] %v6098_v22 }
  0xbb   :  { %3735 = vmatpush1.bf16.msra.mxu0 %v6070_v43 }
  0xbc   :  { %3799 = vmatpush1.bf16.msra.mxu1 %v6074_v46  ;;  %3801 = vmatprep.subr.bf16.mxu0 %v5736_v10 }
  0xbd   :  { %3833 = vmatprep.subr.bf16.mxu1 %v5738_v11 }
 0x151   :  { %v580_v20 = vpop.f32.mrb[0].mxu0 }
 0x152   :  { %v5168_v11 = vadd.f32 %v580_v20, %v6087_v9  ;;  %v651_v39 = vpop.f32.mrb[0].mxu1  ;;  %v582_v10 = vpop.f32.mrb[1].mxu0  ;;  %v6104_v20 = vrot.slane %v103_v8, %v7100_v54  ;;  %v7196_v54 = vld [vmem:[#allocation35_spill] sm:$0xff] }
 0x153   :  { %v5169_v46 = vadd.f32 %v582_v10, %v6091_v57  ;;  %v653_v43 = vpop.f32.mrb[1].mxu1 }
 0x154   :  { %v3507_v62 = vmul.f32 -1.442695, %v5168_v11  ;;  %v5185_v0 = vadd.f32 %v653_v43, %v6098_v22  ;;  %v5184_v10 = vadd.f32 %v651_v39, %v6104_v20 }
 0x155   :  { %v3508_v63 = vmul.f32 -1.442695, %v5169_v46 }
 0x156   :  { %5242 = vpow2.f32 %v3507_v62  ;;  %v3509_v9 = vmul.f32 -1.442695, %v5185_v0 }
 0x157   :  { %5244 = vpow2.f32 %v3508_v63 }
 0x158   :  { %5246 = vpow2.f32 %v3509_v9  ;;  %v7185_v9 = vld [vmem:[#allocation24_spill] sm:$0xff] }
 0x159   :  { %5248 = vtanh.f32 %v5184_v10  ;;  %v7187_v10 = vld [vmem:[#allocation26_spill] sm:$0xff] }
 0x160   :  { %v5243_v57 = vpop.eup %5242 }
 0x161   :  { %v5245_v11 = vpop.eup %5244  ;;  %v663_v46 = vadd.f32 1.0, %v5243_v57 }
 0x162   :  { %v669_v42 = vadd.f32 1.0, %v5245_v11  ;;  %v5247_v62 = vpop.eup %5246  ;;  %v7188_v11 = vld [vmem:[#allocation27_spill] sm:$0xff] }
 0x163   :  { %5250 = vrcp.f32 %v663_v46  ;;  %v5249_v58 = vpop.eup %5248  ;;  %v676_v22 = vadd.f32 1.0, %v5247_v62  ;;  %v7189_v46 = vld [vmem:[#allocation28_spill] sm:$0xff]  ;;  %v7190_v62 = vld [vmem:[#allocation29_spill] sm:$0xff] }
 0x164   :  { %5252 = vrcp.f32 %v669_v42  ;;  %v7186_v42 = vld [vmem:[#allocation25_spill] sm:$0xff] }
 0x165   :  { %5254 = vrcp.f32 %v676_v22  ;;  %v7184_v22 = vld [vmem:[#allocation23_spill] sm:$0xff] }
 0x16d   :  { %v5251_v63 = vpop.eup %5250 }
 0x16e   :  { %v5253_v34 = vpop.eup %5252  ;;  %v680_v43 = vmul.f32 %v5251_v63, %v5249_v58  ;;  %v7181_v58 = vmov 0.0   ;;  %v7191_v63 = vld [vmem:[#allocation30_spill] sm:$0xff] }
 0x16f   :  { %v679_v6 = vmul.f32 0.0, %v5253_v34  ;;  %v5255_v0 = vpop.eup %5254  ;;  %v7182_v34 = vld [vmem:[#allocation21_spill] sm:$0xff] }
 0x171   :  { %v6107_v8 = vadd.f32 %v680_v43, %v679_v6  ;;  %v7183_v6 = vld [vmem:[#allocation22_spill] sm:$0xff]  ;;  %v7192_v43 = vld [vmem:[#allocation31_spill] sm:$0xff] }
 0x173   :  { %5256 = vtanh.f32 %v6107_v8 }
 0x17d   :  { %v5257_v39 = vpop.eup %5256 }
 0x17e   :  { %v683_v57 = vmul.f32 %v5257_v39, %v5255_v0  ;;  %v7193_v0 = vld [vmem:[#allocation32_spill] sm:$0xff]  ;;  %v7194_v39 = vld [vmem:[#allocation33_spill] sm:$0xff] }
 0x180   :  { %877 = vmatmul.mubr.f32.vlgmr.msra.gmra.mrb[16].mxu0 %v683_v57  ;;  %948 = vmatmul.mubr.f32.vlgmr.msra.gmra.mrb[16].mxu1 %v683_v57 }
 0x181   :  { %3803 = vmatpush1.bf16.msra.mxu0 %v5740_v15  ;;  %3835 = vmatpush1.bf16.msra.mxu1 %v5749_v19 }
 0x182   :  { %3805 = vmatprep.subr.bf16.mxu0 %v5752_v23  ;;  %3837 = vmatprep.subr.bf16.mxu1 %v5754_v24 }
 0x183   :  { %1049 = vmatprep.mubr.f32.mxu0 %v7181_v58  ;;  %1120 = vmatprep.mubr.f32.mxu1 %v7181_v58 }
 0x185   :  { %3807 = vmatpush1.bf16.msra.mxu0 %v5758_v28  ;;  %3839 = vmatpush1.bf16.msra.mxu1 %v5765_v32 }
 0x186   :  { %3809 = vmatprep.subr.bf16.mxu0 %v5769_v36  ;;  %3841 = vmatprep.subr.bf16.mxu1 %v5771_v37 }
 0x189   :  { %3811 = vmatpush1.bf16.msra.mxu0 %v5775_v41  ;;  %3843 = vmatpush1.bf16.msra.mxu1 %v5782_v45 }
 0x18a   :  { %3813 = vmatprep.subr.bf16.mxu0 %v5786_v49  ;;  %3845 = vmatprep.subr.bf16.mxu1 %v5790_v53 }
 0x18d   :  { %3815 = vmatpush1.bf16.msra.mxu0 %v5794_v56  ;;  %3847 = vmatpush1.bf16.msra.mxu1 %v5798_v60 }
 0x18e   :  { %3817 = vmatprep.subr.bf16.mxu0 %v5805_v1  ;;  %3849 = vmatprep.subr.bf16.mxu1 %v5809_v4 }
 0x191   :  { %3819 = vmatpush1.bf16.msra.mxu0 %v5813_v7  ;;  %3851 = vmatpush1.bf16.msra.mxu1 %v5817_v12 }
 0x192   :  { %3821 = vmatprep.subr.bf16.mxu0 %v5824_v17  ;;  %3853 = vmatprep.subr.bf16.mxu1 %v5828_v21 }
 0x195   :  { %3823 = vmatpush1.bf16.msra.mxu0 %v5832_v26  ;;  %3855 = vmatpush1.bf16.msra.mxu1 %v5836_v30 }
 0x196   :  { %3825 = vmatprep.subr.bf16.mxu0 %v5843_v35  ;;  %3857 = vmatprep.subr.bf16.mxu1 %v5847_v40 }
 0x199   :  { %3827 = vmatpush1.bf16.msra.mxu0 %v5851_v44  ;;  %3859 = vmatpush1.bf16.msra.mxu1 %v5858_v50 }
 0x19a   :  { %3829 = vmatprep.subr.bf16.mxu0 %v5862_v55  ;;  %3861 = vmatprep.subr.bf16.mxu1 %v5866_v61 }
 0x19d   :  { %3831 = vmatpush1.bf16.msra.mxu0 %v5870_v2  ;;  %3863 = vmatpush1.bf16.msra.mxu1 %v5874_v3 }
 0x19e   :  { %3865 = vmatprep.subr.bf16.mxu0 %v5876_v5  ;;  %3929 = vmatprep.subr.bf16.mxu1 %v5880_v13 }
 0x1a0   :  { %1050 = vmatmul.mubr.f32.vlgmr.msra.gmra.mrb[2].mxu0 %v683_v57  ;;  %1121 = vmatmul.mubr.f32.vlgmr.msra.gmra.mrb[2].mxu1 %v683_v57  ;;  %v7195_v57 = vld [vmem:[#allocation34_spill] sm:$0xff] }
 0x1a1   :  { %3867 = vmatpush1.bf16.msra.mxu0 %v5886_v25  ;;  %3931 = vmatpush1.bf16.msra.mxu1 %v5890_v27 }
 0x1a2   :  { %3869 = vmatprep.subr.bf16.mxu0 %v5892_v29  ;;  %3933 = vmatprep.subr.bf16.mxu1 %v5895_v38 }
 0x1a5   :  { %3871 = vmatpush1.bf16.msra.mxu0 %v5900_v48  ;;  %3935 = vmatpush1.bf16.msra.mxu1 %v5904_v51 }
 0x1a6   :  { %3873 = vmatprep.subr.bf16.mxu0 %v5906_v52  ;;  %3937 = vmatprep.subr.bf16.mxu1 %v5909_v59 }
 0x1a9   :  { %3875 = vmatpush1.bf16.msra.mxu0 %v5914_v14  ;;  %3939 = vmatpush1.bf16.msra.mxu1 %v5918_v16 }
 0x1aa   :  { %3877 = vmatprep.subr.bf16.mxu0 %v5920_v18  ;;  %3941 = vmatprep.subr.bf16.mxu1 %v5923_v33 }
 0x1ad   :  { %3879 = vmatpush1.bf16.msra.mxu0 %v5926_v47  ;;  %3943 = vmatpush1.bf16.msra.mxu1 %v7182_v34 }
 0x1ae   :  { %3881 = vmatprep.subr.bf16.mxu0 %v7183_v6  ;;  %3945 = vmatprep.subr.bf16.mxu1 %v7184_v22 }
 0x1b1   :  { %3883 = vmatpush1.bf16.msra.mxu0 %v7185_v9  ;;  %3947 = vmatpush1.bf16.msra.mxu1 %v7186_v42  ;;  %v7197_v42 = vld [vmem:[#allocation36_spill] sm:$0xff] }
 0x1b2   :  { %3885 = vmatprep.subr.bf16.mxu0 %v7187_v10  ;;  %3949 = vmatprep.subr.bf16.mxu1 %v7188_v11  ;;  %v7198_v10 = vld [vmem:[#allocation37_spill] sm:$0xff]  ;;  %v7199_v11 = vld [vmem:[#allocation38_spill] sm:$0xff] }
 0x1b5   :  { %3887 = vmatpush1.bf16.msra.mxu0 %v7189_v46  ;;  %3951 = vmatpush1.bf16.msra.mxu1 %v7190_v62  ;;  %v7200_v46 = vld [vmem:[#allocation39_spill] sm:$0xff]  ;;  %v7201_v62 = vld [vmem:[#allocation40_spill] sm:$0xff] }
 0x1b6   :  { %3889 = vmatprep.subr.bf16.mxu0 %v7191_v63  ;;  %3953 = vmatprep.subr.bf16.mxu1 %v7192_v43  ;;  %v7202_v63 = vld [vmem:[#allocation41_spill] sm:$0xff]  ;;  %v7203_v43 = vld [vmem:[#allocation42_spill] sm:$0xff] }
 0x1b9   :  { %3891 = vmatpush1.bf16.msra.mxu0 %v7193_v0  ;;  %3955 = vmatpush1.bf16.msra.mxu1 %v7194_v39  ;;  %v7204_v0 = vld [vmem:[#allocation43_spill] sm:$0xff]  ;;  %v7205_v39 = vld [vmem:[#allocation44_spill] sm:$0xff] }
 0x1ba   :  { %3893 = vmatprep.subr.bf16.mxu0 %v7195_v57  ;;  %3957 = vmatprep.subr.bf16.mxu1 %v7196_v54  ;;  %v7206_v57 = vld [vmem:[#allocation45_spill] sm:$0xff]  ;;  %v7207_v54 = vld [vmem:[#allocation46_spill] sm:$0xff] }
 0x1bd   :  { %3895 = vmatpush1.bf16.msra.mxu0 %v7197_v42  ;;  %3959 = vmatpush1.bf16.msra.mxu1 %v7198_v10  ;;  %v7208_v42 = vld [vmem:[#allocation47_spill] sm:$0xff]  ;;  %v7209_v10 = vld [vmem:[#allocation48_spill] sm:$0xff] }
 0x1be   :  { %3897 = vmatprep.subr.bf16.mxu0 %v7199_v11  ;;  %3961 = vmatprep.subr.bf16.mxu1 %v7200_v46  ;;  %v7210_v11 = vld [vmem:[#allocation49_spill] sm:$0xff]  ;;  %v7211_v46 = vld [vmem:[#allocation50_spill] sm:$0xff] }
 0x1c1   :  { %3899 = vmatpush1.bf16.msra.mxu0 %v7201_v62  ;;  %3963 = vmatpush1.bf16.msra.mxu1 %v7202_v63  ;;  %v7212_v62 = vld [vmem:[#allocation51_spill] sm:$0xff]  ;;  %v7213_v63 = vld [vmem:[#allocation52_spill] sm:$0xff] }
 0x1c2   :  { %3901 = vmatprep.subr.bf16.mxu0 %v7203_v43  ;;  %3965 = vmatprep.subr.bf16.mxu1 %v7204_v0  ;;  %v7214_v43 = vld [vmem:[#allocation53_spill] sm:$0xff]  ;;  %v7215_v0 = vld [vmem:[#allocation54_spill] sm:$0xff] }
 0x1c5   :  { %3903 = vmatpush1.bf16.msra.mxu0 %v7205_v39  ;;  %3967 = vmatpush1.bf16.msra.mxu1 %v7206_v57  ;;  %v7216_v39 = vld [vmem:[#allocation55_spill] sm:$0xff]  ;;  %v7217_v57 = vld [vmem:[#allocation56_spill] sm:$0xff] }
 0x1c6   :  { %3905 = vmatprep.subr.bf16.mxu0 %v7207_v54  ;;  %3969 = vmatprep.subr.bf16.mxu1 %v7208_v42  ;;  %v7218_v54 = vld [vmem:[#allocation57_spill] sm:$0xff]  ;;  %v7219_v42 = vld [vmem:[#allocation58_spill] sm:$0xff] }
 0x1c9   :  { %3907 = vmatpush1.bf16.msra.mxu0 %v7209_v10  ;;  %3971 = vmatpush1.bf16.msra.mxu1 %v7210_v11  ;;  %v7220_v10 = vld [vmem:[#allocation59_spill] sm:$0xff]  ;;  %v7221_v11 = vld [vmem:[#allocation60_spill] sm:$0xff] }
 0x1ca   :  { %3909 = vmatprep.subr.bf16.mxu0 %v7211_v46  ;;  %3973 = vmatprep.subr.bf16.mxu1 %v7212_v62  ;;  %v7222_v46 = vld [vmem:[#allocation61_spill] sm:$0xff] }
 0x1cd   :  { %3911 = vmatpush1.bf16.msra.mxu0 %v7213_v63  ;;  %3975 = vmatpush1.bf16.msra.mxu1 %v7214_v43  ;;  %v7223_v63 = vld [vmem:[#allocation63_spill] sm:$0xff]  ;;  %v7224_v43 = vld [vmem:[#allocation64_spill] sm:$0xff] }
 0x1ce   :  { %3913 = vmatprep.subr.bf16.mxu0 %v7215_v0  ;;  %3977 = vmatprep.subr.bf16.mxu1 %v7216_v39  ;;  %v7225_v0 = vld [vmem:[#allocation65_spill] sm:$0xff]  ;;  %v7226_v39 = vld [vmem:[#allocation66_spill] sm:$0xff] }
 0x1d1   :  { %3915 = vmatpush1.bf16.msra.mxu0 %v7217_v57  ;;  %3979 = vmatpush1.bf16.msra.mxu1 %v7218_v54  ;;  %v7227_v57 = vld [vmem:[#allocation67_spill] sm:$0xff]  ;;  %v7228_v54 = vld [vmem:[#allocation68_spill] sm:$0xff] }
 0x1d2   :  { %3917 = vmatprep.subr.bf16.mxu0 %v7219_v42  ;;  %3981 = vmatprep.subr.bf16.mxu1 %v7220_v10  ;;  %v7229_v42 = vld [vmem:[#allocation69_spill] sm:$0xff]  ;;  %v7230_v10 = vld [vmem:[#allocation14_spill] sm:$0xff] }
 0x1d5   :  { %3919 = vmatpush1.bf16.msra.mxu0 %v7221_v11  ;;  %3983 = vmatpush1.bf16.msra.mxu1 %v7222_v46  ;;  %v7231_v11 = vld [vmem:[#allocation15_spill] sm:$0xff]  ;;  %v421_v46 = vld [vmem:[#allocation10] sm:$0xf] }
 0x1d6   :  { %3921 = vmatprep.subr.bf16.mxu0 %v6054_v31  ;;  %3985 = vmatprep.subr.bf16.mxu1 %v7223_v63  ;;  %v7232_v31 = vld [vmem:[#allocation70_spill] sm:$0xff] }
 0x1d7   :  { %v7233_v62 = vsub.s32 0, %v7232_v31 }
 0x1d9   :  { %3923 = vmatpush1.bf16.msra.mxu0 %v7224_v43  ;;  %3987 = vmatpush1.bf16.msra.mxu1 %v7225_v0  ;;  %v6210_v63 = vrot.slane %v421_v46, %v7233_v62  ;;  %v7235_v43 = vsub.s32 1, %v7232_v31 }
 0x1da   :  { %3925 = vmatprep.subr.bf16.mxu0 %v7226_v39  ;;  %3989 = vmatprep.subr.bf16.mxu1 %v7227_v57 }
 0x1db   :  { %7234 = vst [vmem:[#allocation70_spill] sm:$0xff] %v6210_v63  ;;  %v6214_v0 = vrot.slane %v421_v46, %v7235_v43  ;;  %v7239_v43 = vsub.s32 2, %v7232_v31 }
 0x1dd   :  { %3927 = vmatpush1.bf16.msra.mxu0 %v7228_v54  ;;  %3991 = vmatpush1.bf16.msra.mxu1 %v7229_v42  ;;  %7236 = vst [vmem:[#allocation74_spill] sm:$0xff] %v6214_v0  ;;  %v6225_v47 = vrot.slane %v421_v46, %v7239_v43 }
 0x1de   :  { %3993 = vmatprep.subr.bf16.mxu0 %v7230_v10  ;;  %4025 = vmatprep.subr.bf16.mxu1 %v7231_v11  ;;  %v7237_v11 = vsub.s32 3, %v7232_v31 }
 0x1df   :  { %7240 = vst [vmem:[#allocation76_spill] sm:$0xff] %v6225_v47 }
 0x1e0   :  { %v6220_v34 = vrot.slane %v421_v46, %v7237_v11 }
 0x1e2   :  { %7238 = vst [vmem:[#allocation75_spill] sm:$0xff] %v6220_v34 }
 0x253   :  { %v878_v39 = vpop.f32.mrb[16].mxu0  ;;  %v949_v9 = vpop.f32.mrb[16].mxu1 }
 0x254   :  { %v879_v57 = vadd.f32 %v878_v39, %v6210_v63  ;;  %v880_v54 = vpop.f32.mrb[17].mxu0  ;;  %v951_v22 = vpop.f32.mrb[17].mxu1  ;;  %v950_v39 = vadd.f32 %v949_v9, %v6225_v47  ;;  %v7241_v9 = vld [vmem:[#allocation71_spill] sm:$0xff] }
 0x255   :  { %v881_v42 = vadd.f32 %v880_v54, %v6214_v0  ;;  %v952_v62 = vadd.f32 %v951_v22, %v6220_v34 }
 0x256   :  { %v3510_v10 = vmul.f32 -1.442695, %v879_v57 }
 0x257   :  { %v3511_v6 = vmul.f32 -1.442695, %v881_v42  ;;  %v3512_v33 = vmul.f32 -1.442695, %v952_v62 }
 0x258   :  { %5258 = vpow2.f32 %v3510_v10 }
 0x259   :  { %5260 = vpow2.f32 %v3511_v6 }
 0x25a   :  { %5262 = vpow2.f32 %v3512_v33 }
 0x25b   :  { %5264 = vtanh.f32 %v950_v39 }
 0x262   :  { %v5259_v63 = vpop.eup %5258 }
 0x263   :  { %v5261_v18 = vpop.eup %5260  ;;  %v957_v54 = vadd.f32 1.0, %v5259_v63 }
 0x264   :  { %v963_v42 = vadd.f32 1.0, %v5261_v18  ;;  %v5263_v11 = vpop.eup %5262  ;;  %v7242_v18 = vld [vmem:[#allocation72_spill] sm:$0xff] }
 0x265   :  { %5266 = vrcp.f32 %v957_v54  ;;  %v5265_v10 = vpop.eup %5264  ;;  %v970_v34 = vadd.f32 1.0, %v5263_v11 }
 0x266   :  { %5268 = vrcp.f32 %v963_v42 }
 0x267   :  { %5270 = vrcp.f32 %v970_v34 }
 0x26f   :  { %v5267_v6 = vpop.eup %5266 }
 0x270   :  { %v5269_v57 = vpop.eup %5268  ;;  %v974_v22 = vmul.f32 %v5267_v6, %v5265_v10  ;;  %v7243_v10 = vld [vmem:[#allocation73_spill] sm:$0xff] }
 0x271   :  { %v973_v31 = vmul.f32 0.0, %v5269_v57  ;;  %v5271_v6 = vpop.eup %5270 }
 0x273   :  { %v6228_v46 = vadd.f32 %v974_v22, %v973_v31  ;;  %v1051_v62 = vpop.f32.mrb[2].mxu0  ;;  %v1122_v43 = vpop.f32.mrb[2].mxu1 }
 0x274   :  { %v5170_v47 = vadd.f32 %v1051_v62, %v7241_v9  ;;  %v1053_v63 = vpop.f32.mrb[3].mxu0  ;;  %v1124_v33 = vpop.f32.mrb[3].mxu1  ;;  %v5186_v31 = vadd.f32 %v1122_v43, %v6104_v20 }
 0x275   :  { %5272 = vtanh.f32 %v6228_v46  ;;  %v5171_v39 = vadd.f32 %v1053_v63, %v7242_v18  ;;  %v5187_v11 = vadd.f32 %v1124_v33, %v7243_v10 }
 0x276   :  { %v3513_v54 = vmul.f32 -1.442695, %v5170_v47 }
 0x277   :  { %v3514_v42 = vmul.f32 -1.442695, %v5171_v39  ;;  %v3515_v22 = vmul.f32 -1.442695, %v5187_v11 }
 0x278   :  { %5274 = vpow2.f32 %v3513_v54 }
 0x279   :  { %5276 = vpow2.f32 %v3514_v42 }
 0x27a   :  { %5278 = vpow2.f32 %v3515_v22  ;;  %v7247_v22 = vld [vmem:[#allocation21_spill] sm:$0xff] }
 0x27b   :  { %5280 = vtanh.f32 %v5186_v31  ;;  %v7248_v31 = vld [vmem:[#allocation22_spill] sm:$0xff] }
 0x27f   :  { %v5273_v57 = vpop.eup %5272 }
 0x280   :  { %v977_v34 = vmul.f32 %v5273_v57, %v5271_v6 }
 0x282   :  { %v5275_v0 = vpop.eup %5274  ;;  %1219 = vmatprep.mubr.f32.mxu0 %v977_v34  ;;  %1290 = vmatprep.mubr.f32.mxu1 %v977_v34  ;;  %v7249_v34 = vld [vmem:[#allocation23_spill] sm:$0xff] }
 0x283   :  { %v5277_v62 = vpop.eup %5276  ;;  %v1134_v9 = vadd.f32 1.0, %v5275_v0 }
 0x284   :  { %v1140_v63 = vadd.f32 1.0, %v5277_v62  ;;  %v5279_v47 = vpop.eup %5278  ;;  %v7250_v62 = vld [vmem:[#allocation24_spill] sm:$0xff] }
 0x285   :  { %5282 = vrcp.f32 %v1134_v9  ;;  %v5281_v39 = vpop.eup %5280  ;;  %v1147_v10 = vadd.f32 1.0, %v5279_v47  ;;  %v7245_v9 = vld [vmem:[#allocation19_spill] sm:$0xff]  ;;  %v7252_v47 = vld [vmem:[#allocation26_spill] sm:$0xff] }
 0x286   :  { %5284 = vrcp.f32 %v1140_v63  ;;  %v7251_v63 = vld [vmem:[#allocation25_spill] sm:$0xff] }
 0x287   :  { %5286 = vrcp.f32 %v1147_v10  ;;  %v7246_v10 = vld [vmem:[#allocation20_spill] sm:$0xff] }
 0x28f   :  { %v5283_v54 = vpop.eup %5282 }
 0x290   :  { %v5285_v33 = vpop.eup %5284  ;;  %v1151_v42 = vmul.f32 %v5283_v54, %v5281_v39  ;;  %v7253_v39 = vld [vmem:[#allocation27_spill] sm:$0xff]  ;;  %v7254_v54 = vld [vmem:[#allocation28_spill] sm:$0xff] }
 0x291   :  { %v1150_v11 = vmul.f32 %v5285_v33, %v6107_v8  ;;  %v5287_v6 = vpop.eup %5286  ;;  %v7244_v8 = vld [vmem:[#allocation18_spill] sm:$0xff]  ;;  %v7255_v33 = vld [vmem:[#allocation29_spill] sm:$0xff] }
 0x293   :  { %v6236_v43 = vadd.f32 %v1151_v42, %v1150_v11  ;;  %v7256_v42 = vld [vmem:[#allocation30_spill] sm:$0xff]  ;;  %v7257_v11 = vld [vmem:[#allocation31_spill] sm:$0xff] }
 0x295   :  { %5288 = vtanh.f32 %v6236_v43 }
 0x29f   :  { %v5289_v0 = vpop.eup %5288 }
 0x2a0   :  { %v1154_v57 = vmul.f32 %v5289_v0, %v5287_v6  ;;  %v7258_v6 = vld [vmem:[#allocation32_spill] sm:$0xff]  ;;  %v7259_v0 = vld [vmem:[#allocation33_spill] sm:$0xff] }
 0x2a2   :  { %1220 = vmatmul.mubr.f32.vlgmr.msra.gmra.mrb[18].mxu0 %v1154_v57  ;;  %1291 = vmatmul.mubr.f32.vlgmr.msra.gmra.mrb[18].mxu1 %v1154_v57 }
 0x2a3   :  { %3995 = vmatpush1.bf16.msra.mxu0 %v5740_v15  ;;  %4027 = vmatpush1.bf16.msra.mxu1 %v5749_v19 }
 0x2a4   :  { %3997 = vmatprep.subr.bf16.mxu0 %v5752_v23  ;;  %4029 = vmatprep.subr.bf16.mxu1 %v5754_v24 }
 0x2a5   :  { %1392 = vmatprep.mubr.f32.mxu0 %v7181_v58  ;;  %1463 = vmatprep.mubr.f32.mxu1 %v7181_v58 }
 0x2a7   :  { %3999 = vmatpush1.bf16.msra.mxu0 %v5758_v28  ;;  %4031 = vmatpush1.bf16.msra.mxu1 %v5765_v32 }
 0x2a8   :  { %4001 = vmatprep.subr.bf16.mxu0 %v5769_v36  ;;  %4033 = vmatprep.subr.bf16.mxu1 %v5771_v37 }
 0x2ab   :  { %4003 = vmatpush1.bf16.msra.mxu0 %v5775_v41  ;;  %4035 = vmatpush1.bf16.msra.mxu1 %v5782_v45 }
 0x2ac   :  { %4005 = vmatprep.subr.bf16.mxu0 %v5786_v49  ;;  %4037 = vmatprep.subr.bf16.mxu1 %v5790_v53 }
 0x2af   :  { %4007 = vmatpush1.bf16.msra.mxu0 %v5794_v56  ;;  %4039 = vmatpush1.bf16.msra.mxu1 %v5798_v60 }
 0x2b0   :  { %4009 = vmatprep.subr.bf16.mxu0 %v5805_v1  ;;  %4041 = vmatprep.subr.bf16.mxu1 %v5809_v4 }
 0x2b3   :  { %4011 = vmatpush1.bf16.msra.mxu0 %v5813_v7  ;;  %4043 = vmatpush1.bf16.msra.mxu1 %v5817_v12 }
 0x2b4   :  { %4013 = vmatprep.subr.bf16.mxu0 %v5824_v17  ;;  %4045 = vmatprep.subr.bf16.mxu1 %v5828_v21 }
 0x2b7   :  { %4015 = vmatpush1.bf16.msra.mxu0 %v5832_v26  ;;  %4047 = vmatpush1.bf16.msra.mxu1 %v5836_v30 }
 0x2b8   :  { %4017 = vmatprep.subr.bf16.mxu0 %v5843_v35  ;;  %4049 = vmatprep.subr.bf16.mxu1 %v5847_v40 }
 0x2bb   :  { %4019 = vmatpush1.bf16.msra.mxu0 %v5851_v44  ;;  %4051 = vmatpush1.bf16.msra.mxu1 %v5858_v50 }
 0x2bc   :  { %4021 = vmatprep.subr.bf16.mxu0 %v5862_v55  ;;  %4053 = vmatprep.subr.bf16.mxu1 %v5866_v61 }
 0x2bf   :  { %4023 = vmatpush1.bf16.msra.mxu0 %v5870_v2  ;;  %4055 = vmatpush1.bf16.msra.mxu1 %v5874_v3 }
 0x2c0   :  { %4057 = vmatprep.subr.bf16.mxu0 %v5876_v5  ;;  %4121 = vmatprep.subr.bf16.mxu1 %v5880_v13 }
 0x2c2   :  { %1393 = vmatmul.mubr.f32.vlgmr.msra.gmra.mrb[4].mxu0 %v1154_v57  ;;  %1464 = vmatmul.mubr.f32.vlgmr.msra.gmra.mrb[4].mxu1 %v1154_v57  ;;  %v7260_v57 = vld [vmem:[#allocation34_spill] sm:$0xff] }
 0x2c3   :  { %4059 = vmatpush1.bf16.msra.mxu0 %v5886_v25  ;;  %4123 = vmatpush1.bf16.msra.mxu1 %v5890_v27 }
 0x2c4   :  { %4061 = vmatprep.subr.bf16.mxu0 %v5892_v29  ;;  %4125 = vmatprep.subr.bf16.mxu1 %v5895_v38 }
 0x2c7   :  { %4063 = vmatpush1.bf16.msra.mxu0 %v5900_v48  ;;  %4127 = vmatpush1.bf16.msra.mxu1 %v5904_v51 }
 0x2c8   :  { %4065 = vmatprep.subr.bf16.mxu0 %v5906_v52  ;;  %4129 = vmatprep.subr.bf16.mxu1 %v5909_v59 }
 0x2cb   :  { %4067 = vmatpush1.bf16.msra.mxu0 %v5914_v14  ;;  %4131 = vmatpush1.bf16.msra.mxu1 %v5918_v16 }
 0x2cc   :  { %4069 = vmatprep.subr.bf16.mxu0 %v7244_v8  ;;  %4133 = vmatprep.subr.bf16.mxu1 %v7245_v9 }
 0x2cf   :  { %4071 = vmatpush1.bf16.msra.mxu0 %v7246_v10  ;;  %4135 = vmatpush1.bf16.msra.mxu1 %v7247_v22  ;;  %v7299_v22 = vld [vmem:[#allocation74_spill] sm:$0xff] }
 0x2d0   :  { %4073 = vmatprep.subr.bf16.mxu0 %v7248_v31  ;;  %4137 = vmatprep.subr.bf16.mxu1 %v7249_v34  ;;  %v7298_v34 = vld [vmem:[#allocation70_spill] sm:$0xff] }
 0x2d3   :  { %4075 = vmatpush1.bf16.msra.mxu0 %v7250_v62  ;;  %4139 = vmatpush1.bf16.msra.mxu1 %v7251_v63  ;;  %v7261_v62 = vld [vmem:[#allocation35_spill] sm:$0xff]  ;;  %v7262_v63 = vld [vmem:[#allocation36_spill] sm:$0xff] }
 0x2d4   :  { %4077 = vmatprep.subr.bf16.mxu0 %v7252_v47  ;;  %4141 = vmatprep.subr.bf16.mxu1 %v7253_v39  ;;  %v7263_v47 = vld [vmem:[#allocation37_spill] sm:$0xff]  ;;  %v7264_v39 = vld [vmem:[#allocation38_spill] sm:$0xff] }
 0x2d7   :  { %4079 = vmatpush1.bf16.msra.mxu0 %v7254_v54  ;;  %4143 = vmatpush1.bf16.msra.mxu1 %v7255_v33  ;;  %v7265_v54 = vld [vmem:[#allocation39_spill] sm:$0xff]  ;;  %v7266_v33 = vld [vmem:[#allocation40_spill] sm:$0xff] }
 0x2d8   :  { %4081 = vmatprep.subr.bf16.mxu0 %v7256_v42  ;;  %4145 = vmatprep.subr.bf16.mxu1 %v7257_v11  ;;  %v7267_v42 = vld [vmem:[#allocation41_spill] sm:$0xff]  ;;  %v7268_v11 = vld [vmem:[#allocation42_spill] sm:$0xff] }
 0x2db   :  { %4083 = vmatpush1.bf16.msra.mxu0 %v7258_v6  ;;  %4147 = vmatpush1.bf16.msra.mxu1 %v7259_v0  ;;  %v7269_v6 = vld [vmem:[#allocation43_spill] sm:$0xff]  ;;  %v7270_v0 = vld [vmem:[#allocation44_spill] sm:$0xff] }
 0x2dc   :  { %4085 = vmatprep.subr.bf16.mxu0 %v7260_v57  ;;  %4149 = vmatprep.subr.bf16.mxu1 %v7261_v62  ;;  %v7271_v57 = vld [vmem:[#allocation45_spill] sm:$0xff]  ;;  %v7272_v62 = vld [vmem:[#allocation46_spill] sm:$0xff] }
 0x2df   :  { %4087 = vmatpush1.bf16.msra.mxu0 %v7262_v63  ;;  %4151 = vmatpush1.bf16.msra.mxu1 %v7263_v47  ;;  %v7273_v63 = vld [vmem:[#allocation47_spill] sm:$0xff]  ;;  %v7274_v47 = vld [vmem:[#allocation48_spill] sm:$0xff] }
 0x2e0   :  { %4089 = vmatprep.subr.bf16.mxu0 %v7264_v39  ;;  %4153 = vmatprep.subr.bf16.mxu1 %v7265_v54  ;;  %v7275_v39 = vld [vmem:[#allocation49_spill] sm:$0xff]  ;;  %v7276_v54 = vld [vmem:[#allocation50_spill] sm:$0xff] }
 0x2e3   :  { %4091 = vmatpush1.bf16.msra.mxu0 %v7266_v33  ;;  %4155 = vmatpush1.bf16.msra.mxu1 %v7267_v42  ;;  %v7277_v33 = vld [vmem:[#allocation51_spill] sm:$0xff]  ;;  %v7278_v42 = vld [vmem:[#allocation52_spill] sm:$0xff] }
 0x2e4   :  { %4093 = vmatprep.subr.bf16.mxu0 %v7268_v11  ;;  %4157 = vmatprep.subr.bf16.mxu1 %v7269_v6  ;;  %v7279_v11 = vld [vmem:[#allocation53_spill] sm:$0xff]  ;;  %v7280_v6 = vld [vmem:[#allocation54_spill] sm:$0xff] }
 0x2e7   :  { %4095 = vmatpush1.bf16.msra.mxu0 %v7270_v0  ;;  %4159 = vmatpush1.bf16.msra.mxu1 %v7271_v57  ;;  %v7281_v0 = vld [vmem:[#allocation55_spill] sm:$0xff]  ;;  %v7282_v57 = vld [vmem:[#allocation56_spill] sm:$0xff] }
 0x2e8   :  { %4097 = vmatprep.subr.bf16.mxu0 %v7272_v62  ;;  %4161 = vmatprep.subr.bf16.mxu1 %v7273_v63  ;;  %v7283_v62 = vld [vmem:[#allocation57_spill] sm:$0xff]  ;;  %v7284_v63 = vld [vmem:[#allocation58_spill] sm:$0xff] }
 0x2eb   :  { %4099 = vmatpush1.bf16.msra.mxu0 %v7274_v47  ;;  %4163 = vmatpush1.bf16.msra.mxu1 %v7275_v39  ;;  %v7285_v47 = vld [vmem:[#allocation59_spill] sm:$0xff]  ;;  %v7286_v39 = vld [vmem:[#allocation60_spill] sm:$0xff] }
 0x2ec   :  { %4101 = vmatprep.subr.bf16.mxu0 %v7276_v54  ;;  %4165 = vmatprep.subr.bf16.mxu1 %v7277_v33  ;;  %v7287_v54 = vld [vmem:[#allocation61_spill] sm:$0xff]  ;;  %v7288_v33 = vld [vmem:[#allocation62_spill] sm:$0xff] }
 0x2ef   :  { %4103 = vmatpush1.bf16.msra.mxu0 %v7278_v42  ;;  %4167 = vmatpush1.bf16.msra.mxu1 %v7279_v11  ;;  %v7289_v42 = vld [vmem:[#allocation63_spill] sm:$0xff]  ;;  %v7290_v11 = vld [vmem:[#allocation64_spill] sm:$0xff] }
 0x2f0   :  { %4105 = vmatprep.subr.bf16.mxu0 %v7280_v6  ;;  %4169 = vmatprep.subr.bf16.mxu1 %v7281_v0  ;;  %v7291_v6 = vld [vmem:[#allocation65_spill] sm:$0xff]  ;;  %v7292_v0 = vld [vmem:[#allocation66_spill] sm:$0xff] }
 0x2f3   :  { %4107 = vmatpush1.bf16.msra.mxu0 %v7282_v57  ;;  %4171 = vmatpush1.bf16.msra.mxu1 %v7283_v62  ;;  %v7293_v57 = vld [vmem:[#allocation67_spill] sm:$0xff]  ;;  %v7294_v62 = vld [vmem:[#allocation68_spill] sm:$0xff] }
 0x2f4   :  { %4109 = vmatprep.subr.bf16.mxu0 %v7284_v63  ;;  %4173 = vmatprep.subr.bf16.mxu1 %v7285_v47  ;;  %v7295_v63 = vld [vmem:[#allocation69_spill] sm:$0xff]  ;;  %v7296_v47 = vld [vmem:[#allocation14_spill] sm:$0xff] }
 0x2f7   :  { %4111 = vmatpush1.bf16.msra.mxu0 %v7286_v39  ;;  %4175 = vmatpush1.bf16.msra.mxu1 %v7287_v54  ;;  %v7297_v39 = vld [vmem:[#allocation15_spill] sm:$0xff] }
 0x2f8   :  { %4113 = vmatprep.subr.bf16.mxu0 %v7288_v33  ;;  %4177 = vmatprep.subr.bf16.mxu1 %v7289_v42 }
 0x2fb   :  { %4115 = vmatpush1.bf16.msra.mxu0 %v7290_v11  ;;  %4179 = vmatpush1.bf16.msra.mxu1 %v7291_v6 }
 0x2fc   :  { %4117 = vmatprep.subr.bf16.mxu0 %v7292_v0  ;;  %4181 = vmatprep.subr.bf16.mxu1 %v7293_v57  ;;  %v7300_v57 = vld [vmem:[#allocation75_spill] sm:$0xff] }
 0x2ff   :  { %4119 = vmatpush1.bf16.msra.mxu0 %v7294_v62  ;;  %4183 = vmatpush1.bf16.msra.mxu1 %v7295_v63  ;;  %v7301_v63 = vld [vmem:[#allocation76_spill] sm:$0xff] }
 0x300   :  { %4185 = vmatprep.subr.bf16.mxu0 %v7296_v47  ;;  %4217 = vmatprep.subr.bf16.mxu1 %v7297_v39 }
 0x375   :  { %v1221_v54 = vpop.f32.mrb[18].mxu0  ;;  %v1292_v33 = vpop.f32.mrb[18].mxu1 }
 0x376   :  { %v1222_v42 = vadd.f32 %v1221_v54, %v7298_v34  ;;  %v1223_v31 = vpop.f32.mrb[19].mxu0  ;;  %v1294_v11 = vpop.f32.mrb[19].mxu1  ;;  %v1293_v8 = vadd.f32 %v1292_v33, %v7301_v63  ;;  %v7302_v33 = vld [vmem:[#allocation71_spill] sm:$0xff] }
 0x377   :  { %v1224_v6 = vadd.f32 %v1223_v31, %v7299_v22  ;;  %v1295_v62 = vadd.f32 %v1294_v11, %v7300_v57 }
 0x378   :  { %v3516_v10 = vmul.f32 -1.442695, %v1222_v42 }
 0x379   :  { %v3517_v0 = vmul.f32 -1.442695, %v1224_v6  ;;  %v3518_v9 = vmul.f32 -1.442695, %v1295_v62 }
 0x37a   :  { %5290 = vpow2.f32 %v3516_v10 }
 0x37b   :  { %5292 = vpow2.f32 %v3517_v0 }
 0x37c   :  { %5294 = vpow2.f32 %v3518_v9 }
 0x37d   :  { %5296 = vtanh.f32 %v1293_v8 }
 0x384   :  { %v5291_v47 = vpop.eup %5290 }
 0x385   :  { %v5293_v16 = vpop.eup %5292  ;;  %v1300_v39 = vadd.f32 1.0, %v5291_v47 }
 0x386   :  { %v1306_v14 = vadd.f32 1.0, %v5293_v16  ;;  %v5295_v54 = vpop.eup %5294 }
 0x387   :  { %5298 = vrcp.f32 %v1300_v39  ;;  %v5297_v34 = vpop.eup %5296  ;;  %v1313_v10 = vadd.f32 1.0, %v5295_v54 }
 0x388   :  { %5300 = vrcp.f32 %v1306_v14 }
 0x389   :  { %5302 = vrcp.f32 %v1313_v10 }
 0x391   :  { %v5299_v31 = vpop.eup %5298 }
 0x392   :  { %v5301_v42 = vpop.eup %5300  ;;  %v1317_v6 = vmul.f32 %v5299_v31, %v5297_v34  ;;  %v7303_v34 = vld [vmem:[#allocation73_spill] sm:$0xff] }
 0x393   :  { %v1316_v0 = vmul.f32 %v5301_v42, %v6228_v46  ;;  %v5303_v46 = vpop.eup %5302 }
 0x395   :  { %v1394_v11 = vpop.f32.mrb[4].mxu0  ;;  %v1465_v62 = vpop.f32.mrb[4].mxu1  ;;  %v6342_v57 = vadd.f32 %v1317_v6, %v1316_v0 }
 0x396   :  { %v5172_v47 = vadd.f32 %v1394_v11, %v7302_v33  ;;  %v1396_v9 = vpop.f32.mrb[5].mxu0  ;;  %v1467_v8 = vpop.f32.mrb[5].mxu1  ;;  %v5188_v6 = vadd.f32 %v1465_v62, %v6104_v20 }
 0x397   :  { %v5173_v16 = vadd.f32 %v1396_v9, %v7242_v18  ;;  %5304 = vtanh.f32 %v6342_v57  ;;  %v5189_v54 = vadd.f32 %v1467_v8, %v7303_v34 }
 0x398   :  { %v3519_v14 = vmul.f32 -1.442695, %v5172_v47 }
 0x399   :  { %v3520_v39 = vmul.f32 -1.442695, %v5173_v16  ;;  %v3521_v42 = vmul.f32 -1.442695, %v5189_v54 }
 0x39a   :  { %5306 = vpow2.f32 %v3519_v14 }
 0x39b   :  { %5308 = vpow2.f32 %v3520_v39 }
 0x39c   :  { %5310 = vpow2.f32 %v3521_v42 }
 0x39d   :  { %5312 = vtanh.f32 %v5188_v6  ;;  %v7307_v6 = vld [vmem:[#allocation19_spill] sm:$0xff] }
 0x3a1   :  { %v5305_v31 = vpop.eup %5304 }
 0x3a2   :  { %v1320_v10 = vmul.f32 %v5305_v31, %v5303_v46 }
 0x3a4   :  { %v5307_v0 = vpop.eup %5306  ;;  %1562 = vmatprep.mubr.f32.mxu0 %v1320_v10  ;;  %1633 = vmatprep.mubr.f32.mxu1 %v1320_v10  ;;  %v7308_v10 = vld [vmem:[#allocation20_spill] sm:$0xff] }
 0x3a5   :  { %v5309_v11 = vpop.eup %5308  ;;  %v1477_v33 = vadd.f32 1.0, %v5307_v0  ;;  %v7309_v0 = vld [vmem:[#allocation21_spill] sm:$0xff] }
 0x3a6   :  { %v1483_v9 = vadd.f32 1.0, %v5309_v11  ;;  %v5311_v47 = vpop.eup %5310  ;;  %v7310_v11 = vld [vmem:[#allocation22_spill] sm:$0xff] }
 0x3a7   :  { %5314 = vrcp.f32 %v1477_v33  ;;  %v5313_v16 = vpop.eup %5312  ;;  %v1490_v34 = vadd.f32 1.0, %v5311_v47  ;;  %v7305_v33 = vld [vmem:[#allocation17_spill] sm:$0xff]  ;;  %v7312_v47 = vld [vmem:[#allocation24_spill] sm:$0xff] }
 0x3a8   :  { %5316 = vrcp.f32 %v1483_v9  ;;  %v7311_v9 = vld [vmem:[#allocation23_spill] sm:$0xff] }
 0x3a9   :  { %5318 = vrcp.f32 %v1490_v34  ;;  %v7306_v34 = vld [vmem:[#allocation18_spill] sm:$0xff] }
 0x3b1   :  { %v5315_v14 = vpop.eup %5314 }
 0x3b2   :  { %v5317_v8 = vpop.eup %5316  ;;  %v1494_v39 = vmul.f32 %v5315_v14, %v5313_v16  ;;  %v7313_v16 = vld [vmem:[#allocation25_spill] sm:$0xff]  ;;  %v7314_v14 = vld [vmem:[#allocation26_spill] sm:$0xff] }
 0x3b3   :  { %v1493_v54 = vmul.f32 %v5317_v8, %v6236_v43  ;;  %v5319_v46 = vpop.eup %5318  ;;  %v7304_v43 = vld [vmem:[#allocation16_spill] sm:$0xff]  ;;  %v7315_v8 = vld [vmem:[#allocation27_spill] sm:$0xff] }
 0x3b5   :  { %v6350_v62 = vadd.f32 %v1494_v39, %v1493_v54  ;;  %v7316_v39 = vld [vmem:[#allocation28_spill] sm:$0xff]  ;;  %v7317_v54 = vld [vmem:[#allocation29_spill] sm:$0xff] }
 0x3b7   :  { %5320 = vtanh.f32 %v6350_v62 }
 0x3c1   :  { %v5321_v31 = vpop.eup %5320 }
 0x3c2   :  { %v1497_v42 = vmul.f32 %v5321_v31, %v5319_v46  ;;  %v7318_v46 = vld [vmem:[#allocation30_spill] sm:$0xff]  ;;  %v7319_v31 = vld [vmem:[#allocation31_spill] sm:$0xff] }
 0x3c4   :  { %1563 = vmatmul.mubr.f32.vlgmr.msra.gmra.mrb[20].mxu0 %v1497_v42  ;;  %1634 = vmatmul.mubr.f32.vlgmr.msra.gmra.mrb[20].mxu1 %v1497_v42 }
 0x3c5   :  { %4187 = vmatpush1.bf16.msra.mxu0 %v5740_v15  ;;  %4219 = vmatpush1.bf16.msra.mxu1 %v5749_v19 }
 0x3c6   :  { %4189 = vmatprep.subr.bf16.mxu0 %v5752_v23  ;;  %4221 = vmatprep.subr.bf16.mxu1 %v5754_v24 }
 0x3c7   :  { %1735 = vmatprep.mubr.f32.mxu0 %v7181_v58  ;;  %1806 = vmatprep.mubr.f32.mxu1 %v7181_v58 }
 0x3c9   :  { %4191 = vmatpush1.bf16.msra.mxu0 %v5758_v28  ;;  %4223 = vmatpush1.bf16.msra.mxu1 %v5765_v32 }
 0x3ca   :  { %4193 = vmatprep.subr.bf16.mxu0 %v5769_v36  ;;  %4225 = vmatprep.subr.bf16.mxu1 %v5771_v37 }
 0x3cd   :  { %4195 = vmatpush1.bf16.msra.mxu0 %v5775_v41  ;;  %4227 = vmatpush1.bf16.msra.mxu1 %v5782_v45 }
 0x3ce   :  { %4197 = vmatprep.subr.bf16.mxu0 %v5786_v49  ;;  %4229 = vmatprep.subr.bf16.mxu1 %v5790_v53 }
 0x3d1   :  { %4199 = vmatpush1.bf16.msra.mxu0 %v5794_v56  ;;  %4231 = vmatpush1.bf16.msra.mxu1 %v5798_v60 }
 0x3d2   :  { %4201 = vmatprep.subr.bf16.mxu0 %v5805_v1  ;;  %4233 = vmatprep.subr.bf16.mxu1 %v5809_v4 }
 0x3d5   :  { %4203 = vmatpush1.bf16.msra.mxu0 %v5813_v7  ;;  %4235 = vmatpush1.bf16.msra.mxu1 %v5817_v12 }
 0x3d6   :  { %4205 = vmatprep.subr.bf16.mxu0 %v5824_v17  ;;  %4237 = vmatprep.subr.bf16.mxu1 %v5828_v21 }
 0x3d9   :  { %4207 = vmatpush1.bf16.msra.mxu0 %v5832_v26  ;;  %4239 = vmatpush1.bf16.msra.mxu1 %v5836_v30 }
 0x3da   :  { %4209 = vmatprep.subr.bf16.mxu0 %v5843_v35  ;;  %4241 = vmatprep.subr.bf16.mxu1 %v5847_v40 }
 0x3dd   :  { %4211 = vmatpush1.bf16.msra.mxu0 %v5851_v44  ;;  %4243 = vmatpush1.bf16.msra.mxu1 %v5858_v50 }
 0x3de   :  { %4213 = vmatprep.subr.bf16.mxu0 %v5862_v55  ;;  %4245 = vmatprep.subr.bf16.mxu1 %v5866_v61 }
 0x3e1   :  { %4215 = vmatpush1.bf16.msra.mxu0 %v5870_v2  ;;  %4247 = vmatpush1.bf16.msra.mxu1 %v5874_v3 }
 0x3e2   :  { %4249 = vmatprep.subr.bf16.mxu0 %v5876_v5  ;;  %4313 = vmatprep.subr.bf16.mxu1 %v5880_v13 }
 0x3e4   :  { %1736 = vmatmul.mubr.f32.vlgmr.msra.gmra.mrb[6].mxu0 %v1497_v42  ;;  %1807 = vmatmul.mubr.f32.vlgmr.msra.gmra.mrb[6].mxu1 %v1497_v42  ;;  %v7320_v42 = vld [vmem:[#allocation32_spill] sm:$0xff] }
 0x3e5   :  { %4251 = vmatpush1.bf16.msra.mxu0 %v5886_v25  ;;  %4315 = vmatpush1.bf16.msra.mxu1 %v5890_v27 }
 0x3e6   :  { %4253 = vmatprep.subr.bf16.mxu0 %v5892_v29  ;;  %4317 = vmatprep.subr.bf16.mxu1 %v5895_v38 }
 0x3e9   :  { %4255 = vmatpush1.bf16.msra.mxu0 %v5900_v48  ;;  %4319 = vmatpush1.bf16.msra.mxu1 %v5904_v51 }
 0x3ea   :  { %4257 = vmatprep.subr.bf16.mxu0 %v5906_v52  ;;  %4321 = vmatprep.subr.bf16.mxu1 %v5909_v59 }
 0x3ed   :  { %4259 = vmatpush1.bf16.msra.mxu0 %v7304_v43  ;;  %4323 = vmatpush1.bf16.msra.mxu1 %v7305_v33 }
 0x3ee   :  { %4261 = vmatprep.subr.bf16.mxu0 %v7306_v34  ;;  %4325 = vmatprep.subr.bf16.mxu1 %v7307_v6 }
 0x3f1   :  { %4263 = vmatpush1.bf16.msra.mxu0 %v7308_v10  ;;  %4327 = vmatpush1.bf16.msra.mxu1 %v7309_v0  ;;  %v7360_v0 = vld [vmem:[#allocation70_spill] sm:$0xff] }
 0x3f2   :  { %4265 = vmatprep.subr.bf16.mxu0 %v7310_v11  ;;  %4329 = vmatprep.subr.bf16.mxu1 %v7311_v9  ;;  %v7321_v11 = vld [vmem:[#allocation33_spill] sm:$0xff]  ;;  %v7322_v9 = vld [vmem:[#allocation34_spill] sm:$0xff] }
 0x3f5   :  { %4267 = vmatpush1.bf16.msra.mxu0 %v7312_v47  ;;  %4331 = vmatpush1.bf16.msra.mxu1 %v7313_v16  ;;  %v7323_v47 = vld [vmem:[#allocation35_spill] sm:$0xff]  ;;  %v7324_v16 = vld [vmem:[#allocation36_spill] sm:$0xff] }
 0x3f6   :  { %4269 = vmatprep.subr.bf16.mxu0 %v7314_v14  ;;  %4333 = vmatprep.subr.bf16.mxu1 %v7315_v8  ;;  %v7325_v14 = vld [vmem:[#allocation37_spill] sm:$0xff]  ;;  %v7326_v8 = vld [vmem:[#allocation38_spill] sm:$0xff] }
 0x3f9   :  { %4271 = vmatpush1.bf16.msra.mxu0 %v7316_v39  ;;  %4335 = vmatpush1.bf16.msra.mxu1 %v7317_v54  ;;  %v7327_v39 = vld [vmem:[#allocation39_spill] sm:$0xff]  ;;  %v7328_v54 = vld [vmem:[#allocation40_spill] sm:$0xff] }
 0x3fa   :  { %4273 = vmatprep.subr.bf16.mxu0 %v7318_v46  ;;  %4337 = vmatprep.subr.bf16.mxu1 %v7319_v31  ;;  %v7329_v46 = vld [vmem:[#allocation41_spill] sm:$0xff]  ;;  %v7330_v31 = vld [vmem:[#allocation42_spill] sm:$0xff] }
 0x3fd   :  { %4275 = vmatpush1.bf16.msra.mxu0 %v7320_v42  ;;  %4339 = vmatpush1.bf16.msra.mxu1 %v7321_v11  ;;  %v7331_v42 = vld [vmem:[#allocation43_spill] sm:$0xff]  ;;  %v7332_v11 = vld [vmem:[#allocation44_spill] sm:$0xff] }
 0x3fe   :  { %4277 = vmatprep.subr.bf16.mxu0 %v7322_v9  ;;  %4341 = vmatprep.subr.bf16.mxu1 %v7323_v47  ;;  %v7333_v9 = vld [vmem:[#allocation45_spill] sm:$0xff]  ;;  %v7334_v47 = vld [vmem:[#allocation46_spill] sm:$0xff] }
 0x401   :  { %4279 = vmatpush1.bf16.msra.mxu0 %v7324_v16  ;;  %4343 = vmatpush1.bf16.msra.mxu1 %v7325_v14  ;;  %v7335_v16 = vld [vmem:[#allocation47_spill] sm:$0xff]  ;;  %v7336_v14 = vld [vmem:[#allocation48_spill] sm:$0xff] }
 0x402   :  { %4281 = vmatprep.subr.bf16.mxu0 %v7326_v8  ;;  %4345 = vmatprep.subr.bf16.mxu1 %v7327_v39  ;;  %v7337_v8 = vld [vmem:[#allocation49_spill] sm:$0xff]  ;;  %v7338_v39 = vld [vmem:[#allocation50_spill] sm:$0xff] }
 0x405   :  { %4283 = vmatpush1.bf16.msra.mxu0 %v7328_v54  ;;  %4347 = vmatpush1.bf16.msra.mxu1 %v7329_v46  ;;  %v7339_v54 = vld [vmem:[#allocation51_spill] sm:$0xff]  ;;  %v7340_v46 = vld [vmem:[#allocation52_spill] sm:$0xff] }
 0x406   :  { %4285 = vmatprep.subr.bf16.mxu0 %v7330_v31  ;;  %4349 = vmatprep.subr.bf16.mxu1 %v7331_v42  ;;  %v7341_v31 = vld [vmem:[#allocation53_spill] sm:$0xff]  ;;  %v7342_v42 = vld [vmem:[#allocation54_spill] sm:$0xff] }
 0x409   :  { %4287 = vmatpush1.bf16.msra.mxu0 %v7332_v11  ;;  %4351 = vmatpush1.bf16.msra.mxu1 %v7333_v9  ;;  %v7343_v11 = vld [vmem:[#allocation55_spill] sm:$0xff]  ;;  %v7344_v9 = vld [vmem:[#allocation56_spill] sm:$0xff] }
 0x40a   :  { %4289 = vmatprep.subr.bf16.mxu0 %v7334_v47  ;;  %4353 = vmatprep.subr.bf16.mxu1 %v7335_v16  ;;  %v7345_v47 = vld [vmem:[#allocation57_spill] sm:$0xff]  ;;  %v7346_v16 = vld [vmem:[#allocation58_spill] sm:$0xff] }
 0x40d   :  { %4291 = vmatpush1.bf16.msra.mxu0 %v7336_v14  ;;  %4355 = vmatpush1.bf16.msra.mxu1 %v7337_v8  ;;  %v7347_v14 = vld [vmem:[#allocation59_spill] sm:$0xff]  ;;  %v7348_v8 = vld [vmem:[#allocation60_spill] sm:$0xff] }
 0x40e   :  { %4293 = vmatprep.subr.bf16.mxu0 %v7338_v39  ;;  %4357 = vmatprep.subr.bf16.mxu1 %v7339_v54  ;;  %v7349_v39 = vld [vmem:[#allocation61_spill] sm:$0xff]  ;;  %v7350_v54 = vld [vmem:[#allocation62_spill] sm:$0xff] }
 0x411   :  { %4295 = vmatpush1.bf16.msra.mxu0 %v7340_v46  ;;  %4359 = vmatpush1.bf16.msra.mxu1 %v7341_v31  ;;  %v7351_v46 = vld [vmem:[#allocation63_spill] sm:$0xff]  ;;  %v7352_v31 = vld [vmem:[#allocation64_spill] sm:$0xff] }
 0x412   :  { %4297 = vmatprep.subr.bf16.mxu0 %v7342_v42  ;;  %4361 = vmatprep.subr.bf16.mxu1 %v7343_v11  ;;  %v7353_v42 = vld [vmem:[#allocation65_spill] sm:$0xff]  ;;  %v7354_v11 = vld [vmem:[#allocation66_spill] sm:$0xff] }
 0x415   :  { %4299 = vmatpush1.bf16.msra.mxu0 %v7344_v9  ;;  %4363 = vmatpush1.bf16.msra.mxu1 %v7345_v47  ;;  %v7355_v9 = vld [vmem:[#allocation67_spill] sm:$0xff]  ;;  %v7356_v47 = vld [vmem:[#allocation68_spill] sm:$0xff] }
 0x416   :  { %4301 = vmatprep.subr.bf16.mxu0 %v7346_v16  ;;  %4365 = vmatprep.subr.bf16.mxu1 %v7347_v14  ;;  %v7357_v16 = vld [vmem:[#allocation69_spill] sm:$0xff]  ;;  %v7358_v14 = vld [vmem:[#allocation14_spill] sm:$0xff] }
 0x419   :  { %4303 = vmatpush1.bf16.msra.mxu0 %v7348_v8  ;;  %4367 = vmatpush1.bf16.msra.mxu1 %v7349_v39  ;;  %v7359_v8 = vld [vmem:[#allocation15_spill] sm:$0xff] }
 0x41a   :  { %4305 = vmatprep.subr.bf16.mxu0 %v7350_v54  ;;  %4369 = vmatprep.subr.bf16.mxu1 %v7351_v46 }
 0x41d   :  { %4307 = vmatpush1.bf16.msra.mxu0 %v7352_v31  ;;  %4371 = vmatpush1.bf16.msra.mxu1 %v7353_v42 }
 0x41e   :  { %4309 = vmatprep.subr.bf16.mxu0 %v7354_v11  ;;  %4373 = vmatprep.subr.bf16.mxu1 %v7355_v9  ;;  %v7361_v9 = vld [vmem:[#allocation75_spill] sm:$0xff] }
 0x421   :  { %4311 = vmatpush1.bf16.msra.mxu0 %v7356_v47  ;;  %4375 = vmatpush1.bf16.msra.mxu1 %v7357_v16 }
 0x422   :  { %4377 = vmatprep.subr.bf16.mxu0 %v7358_v14  ;;  %4409 = vmatprep.subr.bf16.mxu1 %v7359_v8 }
 0x497   :  { %v1564_v39 = vpop.f32.mrb[20].mxu0  ;;  %v1635_v54 = vpop.f32.mrb[20].mxu1 }
 0x498   :  { %v1565_v46 = vadd.f32 %v1564_v39, %v7360_v0  ;;  %v1566_v10 = vpop.f32.mrb[21].mxu0  ;;  %v1637_v31 = vpop.f32.mrb[21].mxu1  ;;  %v1636_v16 = vadd.f32 %v1635_v54, %v7301_v63  ;;  %v7362_v54 = vld [vmem:[#allocation71_spill] sm:$0xff] }
 0x499   :  { %v1567_v42 = vadd.f32 %v1566_v10, %v7299_v22  ;;  %v1638_v47 = vadd.f32 %v1637_v31, %v7361_v9 }
 0x49a   :  { %v3522_v6 = vmul.f32 -1.442695, %v1565_v46 }
 0x49b   :  { %v3523_v11 = vmul.f32 -1.442695, %v1567_v42  ;;  %v3524_v34 = vmul.f32 -1.442695, %v1638_v47 }
 0x49c   :  { %5322 = vpow2.f32 %v3522_v6 }
 0x49d   :  { %5324 = vpow2.f32 %v3523_v11 }
 0x49e   :  { %5326 = vpow2.f32 %v3524_v34 }
 0x49f   :  { %5328 = vtanh.f32 %v1636_v16 }
 0x4a6   :  { %v5323_v14 = vpop.eup %5322 }
 0x4a7   :  { %v5325_v33 = vpop.eup %5324  ;;  %v1643_v8 = vadd.f32 1.0, %v5323_v14 }
 0x4a8   :  { %v1649_v43 = vadd.f32 1.0, %v5325_v33  ;;  %v5327_v39 = vpop.eup %5326 }
 0x4a9   :  { %5330 = vrcp.f32 %v1643_v8  ;;  %v5329_v0 = vpop.eup %5328  ;;  %v1656_v6 = vadd.f32 1.0, %v5327_v39 }
 0x4aa   :  { %5332 = vrcp.f32 %v1649_v43 }
 0x4ab   :  { %5334 = vrcp.f32 %v1656_v6 }
 0x4b3   :  { %v5331_v10 = vpop.eup %5330 }
 0x4b4   :  { %v5333_v46 = vpop.eup %5332  ;;  %v1660_v42 = vmul.f32 %v5331_v10, %v5329_v0  ;;  %v7363_v0 = vld [vmem:[#allocation73_spill] sm:$0xff] }
 0x4b5   :  { %v1659_v11 = vmul.f32 %v5333_v46, %v6342_v57  ;;  %v5335_v57 = vpop.eup %5334 }
 0x4b7   :  { %v1737_v31 = vpop.f32.mrb[6].mxu0  ;;  %v1808_v47 = vpop.f32.mrb[6].mxu1  ;;  %v6456_v9 = vadd.f32 %v1660_v42, %v1659_v11 }
 0x4b8   :  { %v5174_v14 = vadd.f32 %v1737_v31, %v7362_v54  ;;  %v1739_v34 = vpop.f32.mrb[7].mxu0  ;;  %v1810_v16 = vpop.f32.mrb[7].mxu1  ;;  %v5190_v42 = vadd.f32 %v1808_v47, %v6104_v20 }
 0x4b9   :  { %v5175_v33 = vadd.f32 %v1739_v34, %v7242_v18  ;;  %5336 = vtanh.f32 %v6456_v9  ;;  %v5191_v39 = vadd.f32 %v1810_v16, %v7363_v0 }
 0x4ba   :  { %v3525_v43 = vmul.f32 -1.442695, %v5174_v14 }
 0x4bb   :  { %v3526_v8 = vmul.f32 -1.442695, %v5175_v33  ;;  %v3527_v46 = vmul.f32 -1.442695, %v5191_v39 }
 0x4bc   :  { %5338 = vpow2.f32 %v3525_v43 }
 0x4bd   :  { %5340 = vpow2.f32 %v3526_v8 }
 0x4be   :  { %5342 = vpow2.f32 %v3527_v46 }
 0x4bf   :  { %5344 = vtanh.f32 %v5190_v42  ;;  %v7367_v42 = vld [vmem:[#allocation19_spill] sm:$0xff] }
 0x4c3   :  { %v5337_v10 = vpop.eup %5336 }
 0x4c4   :  { %v1663_v6 = vmul.f32 %v5337_v10, %v5335_v57 }
 0x4c6   :  { %v5339_v11 = vpop.eup %5338  ;;  %1905 = vmatprep.mubr.f32.mxu0 %v1663_v6  ;;  %1976 = vmatprep.mubr.f32.mxu1 %v1663_v6  ;;  %v7368_v6 = vld [vmem:[#allocation20_spill] sm:$0xff] }
 0x4c7   :  { %v5341_v31 = vpop.eup %5340  ;;  %v1820_v54 = vadd.f32 1.0, %v5339_v11  ;;  %v7369_v11 = vld [vmem:[#allocation21_spill] sm:$0xff] }
 0x4c8   :  { %v1826_v34 = vadd.f32 1.0, %v5341_v31  ;;  %v5343_v14 = vpop.eup %5342  ;;  %v7370_v31 = vld [vmem:[#allocation22_spill] sm:$0xff] }
 0x4c9   :  { %5346 = vrcp.f32 %v1820_v54  ;;  %v5345_v33 = vpop.eup %5344  ;;  %v1833_v0 = vadd.f32 1.0, %v5343_v14  ;;  %v7365_v54 = vld [vmem:[#allocation17_spill] sm:$0xff]  ;;  %v7372_v14 = vld [vmem:[#allocation24_spill] sm:$0xff] }
 0x4ca   :  { %5348 = vrcp.f32 %v1826_v34  ;;  %v7371_v34 = vld [vmem:[#allocation23_spill] sm:$0xff] }
 0x4cb   :  { %5350 = vrcp.f32 %v1833_v0  ;;  %v7366_v0 = vld [vmem:[#allocation18_spill] sm:$0xff] }
 0x4d3   :  { %v5347_v43 = vpop.eup %5346 }
 0x4d4   :  { %v5349_v16 = vpop.eup %5348  ;;  %v1837_v8 = vmul.f32 %v5347_v43, %v5345_v33  ;;  %v7373_v33 = vld [vmem:[#allocation25_spill] sm:$0xff]  ;;  %v7374_v43 = vld [vmem:[#allocation26_spill] sm:$0xff] }
 0x4d5   :  { %v1836_v39 = vmul.f32 %v5349_v16, %v6350_v62  ;;  %v5351_v57 = vpop.eup %5350  ;;  %v7364_v62 = vld [vmem:[#allocation16_spill] sm:$0xff]  ;;  %v7375_v16 = vld [vmem:[#allocation27_spill] sm:$0xff] }
 0x4d7   :  { %v6464_v47 = vadd.f32 %v1837_v8, %v1836_v39  ;;  %v7376_v8 = vld [vmem:[#allocation28_spill] sm:$0xff]  ;;  %v7377_v39 = vld [vmem:[#allocation29_spill] sm:$0xff] }
 0x4d9   :  { %5352 = vtanh.f32 %v6464_v47 }
 0x4e3   :  { %v5353_v10 = vpop.eup %5352 }
 0x4e4   :  { %v1840_v46 = vmul.f32 %v5353_v10, %v5351_v57  ;;  %v7378_v57 = vld [vmem:[#allocation30_spill] sm:$0xff]  ;;  %v7379_v10 = vld [vmem:[#allocation31_spill] sm:$0xff] }
 0x4e6   :  { %1906 = vmatmul.mubr.f32.vlgmr.msra.gmra.mrb[22].mxu0 %v1840_v46  ;;  %1977 = vmatmul.mubr.f32.vlgmr.msra.gmra.mrb[22].mxu1 %v1840_v46 }
 0x4e7   :  { %4379 = vmatpush1.bf16.msra.mxu0 %v5740_v15  ;;  %4411 = vmatpush1.bf16.msra.mxu1 %v5749_v19 }
 0x4e8   :  { %4381 = vmatprep.subr.bf16.mxu0 %v5752_v23  ;;  %4413 = vmatprep.subr.bf16.mxu1 %v5754_v24 }
 0x4e9   :  { %2078 = vmatprep.mubr.f32.mxu0 %v7181_v58  ;;  %2149 = vmatprep.mubr.f32.mxu1 %v7181_v58 }
 0x4eb   :  { %4383 = vmatpush1.bf16.msra.mxu0 %v5758_v28  ;;  %4415 = vmatpush1.bf16.msra.mxu1 %v5765_v32 }
 0x4ec   :  { %4385 = vmatprep.subr.bf16.mxu0 %v5769_v36  ;;  %4417 = vmatprep.subr.bf16.mxu1 %v5771_v37 }
 0x4ef   :  { %4387 = vmatpush1.bf16.msra.mxu0 %v5775_v41  ;;  %4419 = vmatpush1.bf16.msra.mxu1 %v5782_v45 }
 0x4f0   :  { %4389 = vmatprep.subr.bf16.mxu0 %v5786_v49  ;;  %4421 = vmatprep.subr.bf16.mxu1 %v5790_v53 }
 0x4f3   :  { %4391 = vmatpush1.bf16.msra.mxu0 %v5794_v56  ;;  %4423 = vmatpush1.bf16.msra.mxu1 %v5798_v60 }
 0x4f4   :  { %4393 = vmatprep.subr.bf16.mxu0 %v5805_v1  ;;  %4425 = vmatprep.subr.bf16.mxu1 %v5809_v4 }
 0x4f7   :  { %4395 = vmatpush1.bf16.msra.mxu0 %v5813_v7  ;;  %4427 = vmatpush1.bf16.msra.mxu1 %v5817_v12 }
 0x4f8   :  { %4397 = vmatprep.subr.bf16.mxu0 %v5824_v17  ;;  %4429 = vmatprep.subr.bf16.mxu1 %v5828_v21 }
 0x4fb   :  { %4399 = vmatpush1.bf16.msra.mxu0 %v5832_v26  ;;  %4431 = vmatpush1.bf16.msra.mxu1 %v5836_v30 }
 0x4fc   :  { %4401 = vmatprep.subr.bf16.mxu0 %v5843_v35  ;;  %4433 = vmatprep.subr.bf16.mxu1 %v5847_v40 }
 0x4ff   :  { %4403 = vmatpush1.bf16.msra.mxu0 %v5851_v44  ;;  %4435 = vmatpush1.bf16.msra.mxu1 %v5858_v50 }
 0x500   :  { %4405 = vmatprep.subr.bf16.mxu0 %v5862_v55  ;;  %4437 = vmatprep.subr.bf16.mxu1 %v5866_v61 }
 0x503   :  { %4407 = vmatpush1.bf16.msra.mxu0 %v5870_v2  ;;  %4439 = vmatpush1.bf16.msra.mxu1 %v5874_v3 }
 0x504   :  { %4441 = vmatprep.subr.bf16.mxu0 %v5876_v5  ;;  %4505 = vmatprep.subr.bf16.mxu1 %v5880_v13 }
 0x506   :  { %2079 = vmatmul.mubr.f32.vlgmr.msra.gmra.mrb[8].mxu0 %v1840_v46  ;;  %2150 = vmatmul.mubr.f32.vlgmr.msra.gmra.mrb[8].mxu1 %v1840_v46  ;;  %v7380_v46 = vld [vmem:[#allocation32_spill] sm:$0xff] }
 0x507   :  { %4443 = vmatpush1.bf16.msra.mxu0 %v5886_v25  ;;  %4507 = vmatpush1.bf16.msra.mxu1 %v5890_v27 }
 0x508   :  { %4445 = vmatprep.subr.bf16.mxu0 %v5892_v29  ;;  %4509 = vmatprep.subr.bf16.mxu1 %v5895_v38 }
 0x50b   :  { %4447 = vmatpush1.bf16.msra.mxu0 %v5900_v48  ;;  %4511 = vmatpush1.bf16.msra.mxu1 %v5904_v51 }
 0x50c   :  { %4449 = vmatprep.subr.bf16.mxu0 %v5906_v52  ;;  %4513 = vmatprep.subr.bf16.mxu1 %v5909_v59 }
 0x50f   :  { %4451 = vmatpush1.bf16.msra.mxu0 %v7364_v62  ;;  %4515 = vmatpush1.bf16.msra.mxu1 %v7365_v54 }
 0x510   :  { %4453 = vmatprep.subr.bf16.mxu0 %v7366_v0  ;;  %4517 = vmatprep.subr.bf16.mxu1 %v7367_v42 }
 0x513   :  { %4455 = vmatpush1.bf16.msra.mxu0 %v7368_v6  ;;  %4519 = vmatpush1.bf16.msra.mxu1 %v7369_v11  ;;  %v7420_v11 = vld [vmem:[#allocation70_spill] sm:$0xff] }
 0x514   :  { %4457 = vmatprep.subr.bf16.mxu0 %v7370_v31  ;;  %4521 = vmatprep.subr.bf16.mxu1 %v7371_v34  ;;  %v7381_v31 = vld [vmem:[#allocation33_spill] sm:$0xff]  ;;  %v7382_v34 = vld [vmem:[#allocation34_spill] sm:$0xff] }
 0x517   :  { %4459 = vmatpush1.bf16.msra.mxu0 %v7372_v14  ;;  %4523 = vmatpush1.bf16.msra.mxu1 %v7373_v33  ;;  %v7383_v14 = vld [vmem:[#allocation35_spill] sm:$0xff]  ;;  %v7384_v33 = vld [vmem:[#allocation36_spill] sm:$0xff] }
 0x518   :  { %4461 = vmatprep.subr.bf16.mxu0 %v7374_v43  ;;  %4525 = vmatprep.subr.bf16.mxu1 %v7375_v16  ;;  %v7385_v43 = vld [vmem:[#allocation37_spill] sm:$0xff]  ;;  %v7386_v16 = vld [vmem:[#allocation38_spill] sm:$0xff] }
 0x51b   :  { %4463 = vmatpush1.bf16.msra.mxu0 %v7376_v8  ;;  %4527 = vmatpush1.bf16.msra.mxu1 %v7377_v39  ;;  %v7387_v8 = vld [vmem:[#allocation39_spill] sm:$0xff]  ;;  %v7388_v39 = vld [vmem:[#allocation40_spill] sm:$0xff] }
 0x51c   :  { %4465 = vmatprep.subr.bf16.mxu0 %v7378_v57  ;;  %4529 = vmatprep.subr.bf16.mxu1 %v7379_v10  ;;  %v7389_v57 = vld [vmem:[#allocation41_spill] sm:$0xff]  ;;  %v7390_v10 = vld [vmem:[#allocation42_spill] sm:$0xff] }
 0x51f   :  { %4467 = vmatpush1.bf16.msra.mxu0 %v7380_v46  ;;  %4531 = vmatpush1.bf16.msra.mxu1 %v7381_v31  ;;  %v7391_v46 = vld [vmem:[#allocation43_spill] sm:$0xff]  ;;  %v7392_v31 = vld [vmem:[#allocation44_spill] sm:$0xff] }
 0x520   :  { %4469 = vmatprep.subr.bf16.mxu0 %v7382_v34  ;;  %4533 = vmatprep.subr.bf16.mxu1 %v7383_v14  ;;  %v7393_v34 = vld [vmem:[#allocation45_spill] sm:$0xff]  ;;  %v7394_v14 = vld [vmem:[#allocation46_spill] sm:$0xff] }
 0x523   :  { %4471 = vmatpush1.bf16.msra.mxu0 %v7384_v33  ;;  %4535 = vmatpush1.bf16.msra.mxu1 %v7385_v43  ;;  %v7395_v33 = vld [vmem:[#allocation47_spill] sm:$0xff]  ;;  %v7396_v43 = vld [vmem:[#allocation48_spill] sm:$0xff] }
 0x524   :  { %4473 = vmatprep.subr.bf16.mxu0 %v7386_v16  ;;  %4537 = vmatprep.subr.bf16.mxu1 %v7387_v8  ;;  %v7397_v16 = vld [vmem:[#allocation49_spill] sm:$0xff]  ;;  %v7398_v8 = vld [vmem:[#allocation50_spill] sm:$0xff] }
 0x527   :  { %4475 = vmatpush1.bf16.msra.mxu0 %v7388_v39  ;;  %4539 = vmatpush1.bf16.msra.mxu1 %v7389_v57  ;;  %v7399_v39 = vld [vmem:[#allocation51_spill] sm:$0xff]  ;;  %v7400_v57 = vld [vmem:[#allocation52_spill] sm:$0xff] }
 0x528   :  { %4477 = vmatprep.subr.bf16.mxu0 %v7390_v10  ;;  %4541 = vmatprep.subr.bf16.mxu1 %v7391_v46  ;;  %v7401_v10 = vld [vmem:[#allocation53_spill] sm:$0xff]  ;;  %v7402_v46 = vld [vmem:[#allocation54_spill] sm:$0xff] }
 0x52b   :  { %4479 = vmatpush1.bf16.msra.mxu0 %v7392_v31  ;;  %4543 = vmatpush1.bf16.msra.mxu1 %v7393_v34  ;;  %v7403_v31 = vld [vmem:[#allocation55_spill] sm:$0xff]  ;;  %v7404_v34 = vld [vmem:[#allocation56_spill] sm:$0xff] }
 0x52c   :  { %4481 = vmatprep.subr.bf16.mxu0 %v7394_v14  ;;  %4545 = vmatprep.subr.bf16.mxu1 %v7395_v33  ;;  %v7405_v14 = vld [vmem:[#allocation57_spill] sm:$0xff]  ;;  %v7406_v33 = vld [vmem:[#allocation58_spill] sm:$0xff] }
 0x52f   :  { %4483 = vmatpush1.bf16.msra.mxu0 %v7396_v43  ;;  %4547 = vmatpush1.bf16.msra.mxu1 %v7397_v16  ;;  %v7407_v43 = vld [vmem:[#allocation59_spill] sm:$0xff]  ;;  %v7408_v16 = vld [vmem:[#allocation60_spill] sm:$0xff] }
 0x530   :  { %4485 = vmatprep.subr.bf16.mxu0 %v7398_v8  ;;  %4549 = vmatprep.subr.bf16.mxu1 %v7399_v39  ;;  %v7409_v8 = vld [vmem:[#allocation61_spill] sm:$0xff]  ;;  %v7410_v39 = vld [vmem:[#allocation62_spill] sm:$0xff] }
 0x533   :  { %4487 = vmatpush1.bf16.msra.mxu0 %v7400_v57  ;;  %4551 = vmatpush1.bf16.msra.mxu1 %v7401_v10  ;;  %v7411_v57 = vld [vmem:[#allocation63_spill] sm:$0xff]  ;;  %v7412_v10 = vld [vmem:[#allocation64_spill] sm:$0xff] }
 0x534   :  { %4489 = vmatprep.subr.bf16.mxu0 %v7402_v46  ;;  %4553 = vmatprep.subr.bf16.mxu1 %v7403_v31  ;;  %v7413_v46 = vld [vmem:[#allocation65_spill] sm:$0xff]  ;;  %v7414_v31 = vld [vmem:[#allocation66_spill] sm:$0xff] }
 0x537   :  { %4491 = vmatpush1.bf16.msra.mxu0 %v7404_v34  ;;  %4555 = vmatpush1.bf16.msra.mxu1 %v7405_v14  ;;  %v7415_v34 = vld [vmem:[#allocation67_spill] sm:$0xff]  ;;  %v7416_v14 = vld [vmem:[#allocation68_spill] sm:$0xff] }
 0x538   :  { %4493 = vmatprep.subr.bf16.mxu0 %v7406_v33  ;;  %4557 = vmatprep.subr.bf16.mxu1 %v7407_v43  ;;  %v7417_v33 = vld [vmem:[#allocation69_spill] sm:$0xff]  ;;  %v7418_v43 = vld [vmem:[#allocation14_spill] sm:$0xff] }
 0x53b   :  { %4495 = vmatpush1.bf16.msra.mxu0 %v7408_v16  ;;  %4559 = vmatpush1.bf16.msra.mxu1 %v7409_v8  ;;  %v7419_v16 = vld [vmem:[#allocation15_spill] sm:$0xff] }
 0x53c   :  { %4497 = vmatprep.subr.bf16.mxu0 %v7410_v39  ;;  %4561 = vmatprep.subr.bf16.mxu1 %v7411_v57 }
 0x53f   :  { %4499 = vmatpush1.bf16.msra.mxu0 %v7412_v10  ;;  %4563 = vmatpush1.bf16.msra.mxu1 %v7413_v46 }
 0x540   :  { %4501 = vmatprep.subr.bf16.mxu0 %v7414_v31  ;;  %4565 = vmatprep.subr.bf16.mxu1 %v7415_v34  ;;  %v7421_v34 = vld [vmem:[#allocation75_spill] sm:$0xff] }
 0x543   :  { %4503 = vmatpush1.bf16.msra.mxu0 %v7416_v14  ;;  %4567 = vmatpush1.bf16.msra.mxu1 %v7417_v33 }
 0x544   :  { %4569 = vmatprep.subr.bf16.mxu0 %v7418_v43  ;;  %4601 = vmatprep.subr.bf16.mxu1 %v7419_v16 }
 0x5b9   :  { %v1907_v8 = vpop.f32.mrb[22].mxu0  ;;  %v1978_v39 = vpop.f32.mrb[22].mxu1 }
 0x5ba   :  { %v1908_v57 = vadd.f32 %v1907_v8, %v7420_v11  ;;  %v1909_v6 = vpop.f32.mrb[23].mxu0  ;;  %v1980_v10 = vpop.f32.mrb[23].mxu1  ;;  %v1979_v33 = vadd.f32 %v1978_v39, %v7301_v63  ;;  %v7422_v39 = vld [vmem:[#allocation71_spill] sm:$0xff] }
 0x5bb   :  { %v1910_v46 = vadd.f32 %v1909_v6, %v7299_v22  ;;  %v1981_v14 = vadd.f32 %v1980_v10, %v7421_v34 }
 0x5bc   :  { %v3528_v42 = vmul.f32 -1.442695, %v1908_v57 }
 0x5bd   :  { %v3529_v31 = vmul.f32 -1.442695, %v1910_v46  ;;  %v3530_v0 = vmul.f32 -1.442695, %v1981_v14 }
 0x5be   :  { %5354 = vpow2.f32 %v3528_v42 }
 0x5bf   :  { %5356 = vpow2.f32 %v3529_v31 }
 0x5c0   :  { %5358 = vpow2.f32 %v3530_v0 }
 0x5c1   :  { %5360 = vtanh.f32 %v1979_v33 }
 0x5c8   :  { %v5355_v43 = vpop.eup %5354 }
 0x5c9   :  { %v5357_v54 = vpop.eup %5356  ;;  %v1986_v16 = vadd.f32 1.0, %v5355_v43 }
 0x5ca   :  { %v1992_v62 = vadd.f32 1.0, %v5357_v54  ;;  %v5359_v8 = vpop.eup %5358 }
 0x5cb   :  { %5362 = vrcp.f32 %v1986_v16  ;;  %v5361_v11 = vpop.eup %5360  ;;  %v1999_v42 = vadd.f32 1.0, %v5359_v8 }
 0x5cc   :  { %5364 = vrcp.f32 %v1992_v62 }
 0x5cd   :  { %5366 = vrcp.f32 %v1999_v42 }
 0x5d5   :  { %v5363_v6 = vpop.eup %5362 }
 0x5d6   :  { %v5365_v57 = vpop.eup %5364  ;;  %v2003_v46 = vmul.f32 %v5363_v6, %v5361_v11  ;;  %v7423_v11 = vld [vmem:[#allocation73_spill] sm:$0xff] }
 0x5d7   :  { %v2002_v31 = vmul.f32 %v5365_v57, %v6456_v9  ;;  %v5367_v9 = vpop.eup %5366 }
 0x5d9   :  { %v2080_v10 = vpop.f32.mrb[8].mxu0  ;;  %v2151_v14 = vpop.f32.mrb[8].mxu1  ;;  %v6570_v34 = vadd.f32 %v2003_v46, %v2002_v31 }
 0x5da   :  { %v5176_v43 = vadd.f32 %v2080_v10, %v7422_v39  ;;  %v2082_v0 = vpop.f32.mrb[9].mxu0  ;;  %v2153_v33 = vpop.f32.mrb[9].mxu1  ;;  %v5192_v46 = vadd.f32 %v2151_v14, %v6104_v20 }
 0x5db   :  { %v5177_v54 = vadd.f32 %v2082_v0, %v7242_v18  ;;  %5368 = vtanh.f32 %v6570_v34  ;;  %v5193_v8 = vadd.f32 %v2153_v33, %v7423_v11 }
 0x5dc   :  { %v3531_v62 = vmul.f32 -1.442695, %v5176_v43 }
 0x5dd   :  { %v3532_v16 = vmul.f32 -1.442695, %v5177_v54  ;;  %v3533_v57 = vmul.f32 -1.442695, %v5193_v8 }
 0x5de   :  { %5370 = vpow2.f32 %v3531_v62 }
 0x5df   :  { %5372 = vpow2.f32 %v3532_v16 }
 0x5e0   :  { %5374 = vpow2.f32 %v3533_v57 }
 0x5e1   :  { %5376 = vtanh.f32 %v5192_v46  ;;  %v7427_v46 = vld [vmem:[#allocation19_spill] sm:$0xff] }
 0x5e5   :  { %v5369_v6 = vpop.eup %5368 }
 0x5e6   :  { %v2006_v42 = vmul.f32 %v5369_v6, %v5367_v9 }
 0x5e8   :  { %v5371_v31 = vpop.eup %5370  ;;  %2248 = vmatprep.mubr.f32.mxu0 %v2006_v42  ;;  %2319 = vmatprep.mubr.f32.mxu1 %v2006_v42  ;;  %v7428_v42 = vld [vmem:[#allocation20_spill] sm:$0xff] }
 0x5e9   :  { %v5373_v10 = vpop.eup %5372  ;;  %v2163_v39 = vadd.f32 1.0, %v5371_v31  ;;  %v7429_v31 = vld [vmem:[#allocation21_spill] sm:$0xff] }
 0x5ea   :  { %v2169_v0 = vadd.f32 1.0, %v5373_v10  ;;  %v5375_v43 = vpop.eup %5374  ;;  %v7430_v10 = vld [vmem:[#allocation22_spill] sm:$0xff] }
 0x5eb   :  { %5378 = vrcp.f32 %v2163_v39  ;;  %v5377_v54 = vpop.eup %5376  ;;  %v2176_v11 = vadd.f32 1.0, %v5375_v43  ;;  %v7425_v39 = vld [vmem:[#allocation17_spill] sm:$0xff]  ;;  %v7432_v43 = vld [vmem:[#allocation24_spill] sm:$0xff] }
 0x5ec   :  { %5380 = vrcp.f32 %v2169_v0  ;;  %v7431_v0 = vld [vmem:[#allocation23_spill] sm:$0xff] }
 0x5ed   :  { %5382 = vrcp.f32 %v2176_v11  ;;  %v7426_v11 = vld [vmem:[#allocation18_spill] sm:$0xff] }
 0x5f5   :  { %v5379_v62 = vpop.eup %5378 }
 0x5f6   :  { %v5381_v33 = vpop.eup %5380  ;;  %v2180_v16 = vmul.f32 %v5379_v62, %v5377_v54  ;;  %v7433_v54 = vld [vmem:[#allocation25_spill] sm:$0xff]  ;;  %v7434_v62 = vld [vmem:[#allocation26_spill] sm:$0xff] }
 0x5f7   :  { %v2179_v8 = vmul.f32 %v5381_v33, %v6464_v47  ;;  %v5383_v9 = vpop.eup %5382  ;;  %v7424_v47 = vld [vmem:[#allocation16_spill] sm:$0xff]  ;;  %v7435_v33 = vld [vmem:[#allocation27_spill] sm:$0xff] }
 0x5f9   :  { %v6578_v14 = vadd.f32 %v2180_v16, %v2179_v8  ;;  %v7436_v16 = vld [vmem:[#allocation28_spill] sm:$0xff]  ;;  %v7437_v8 = vld [vmem:[#allocation29_spill] sm:$0xff] }
 0x5fb   :  { %5384 = vtanh.f32 %v6578_v14 }
 0x605   :  { %v5385_v6 = vpop.eup %5384 }
 0x606   :  { %v2183_v57 = vmul.f32 %v5385_v6, %v5383_v9  ;;  %v7438_v9 = vld [vmem:[#allocation30_spill] sm:$0xff]  ;;  %v7439_v6 = vld [vmem:[#allocation31_spill] sm:$0xff] }
 0x608   :  { %2249 = vmatmul.mubr.f32.vlgmr.msra.gmra.mrb[24].mxu0 %v2183_v57  ;;  %2320 = vmatmul.mubr.f32.vlgmr.msra.gmra.mrb[24].mxu1 %v2183_v57 }
 0x609   :  { %4571 = vmatpush1.bf16.msra.mxu0 %v5740_v15  ;;  %4603 = vmatpush1.bf16.msra.mxu1 %v5749_v19 }
 0x60a   :  { %4573 = vmatprep.subr.bf16.mxu0 %v5752_v23  ;;  %4605 = vmatprep.subr.bf16.mxu1 %v5754_v24 }
 0x60b   :  { %2421 = vmatprep.mubr.f32.mxu0 %v7181_v58  ;;  %2492 = vmatprep.mubr.f32.mxu1 %v7181_v58 }
 0x60d   :  { %4575 = vmatpush1.bf16.msra.mxu0 %v5758_v28  ;;  %4607 = vmatpush1.bf16.msra.mxu1 %v5765_v32 }
 0x60e   :  { %4577 = vmatprep.subr.bf16.mxu0 %v5769_v36  ;;  %4609 = vmatprep.subr.bf16.mxu1 %v5771_v37 }
 0x611   :  { %4579 = vmatpush1.bf16.msra.mxu0 %v5775_v41  ;;  %4611 = vmatpush1.bf16.msra.mxu1 %v5782_v45 }
 0x612   :  { %4581 = vmatprep.subr.bf16.mxu0 %v5786_v49  ;;  %4613 = vmatprep.subr.bf16.mxu1 %v5790_v53 }
 0x615   :  { %4583 = vmatpush1.bf16.msra.mxu0 %v5794_v56  ;;  %4615 = vmatpush1.bf16.msra.mxu1 %v5798_v60 }
 0x616   :  { %4585 = vmatprep.subr.bf16.mxu0 %v5805_v1  ;;  %4617 = vmatprep.subr.bf16.mxu1 %v5809_v4 }
 0x619   :  { %4587 = vmatpush1.bf16.msra.mxu0 %v5813_v7  ;;  %4619 = vmatpush1.bf16.msra.mxu1 %v5817_v12 }
 0x61a   :  { %4589 = vmatprep.subr.bf16.mxu0 %v5824_v17  ;;  %4621 = vmatprep.subr.bf16.mxu1 %v5828_v21 }
 0x61d   :  { %4591 = vmatpush1.bf16.msra.mxu0 %v5832_v26  ;;  %4623 = vmatpush1.bf16.msra.mxu1 %v5836_v30 }
 0x61e   :  { %4593 = vmatprep.subr.bf16.mxu0 %v5843_v35  ;;  %4625 = vmatprep.subr.bf16.mxu1 %v5847_v40 }
 0x621   :  { %4595 = vmatpush1.bf16.msra.mxu0 %v5851_v44  ;;  %4627 = vmatpush1.bf16.msra.mxu1 %v5858_v50 }
 0x622   :  { %4597 = vmatprep.subr.bf16.mxu0 %v5862_v55  ;;  %4629 = vmatprep.subr.bf16.mxu1 %v5866_v61 }
 0x625   :  { %4599 = vmatpush1.bf16.msra.mxu0 %v5870_v2  ;;  %4631 = vmatpush1.bf16.msra.mxu1 %v5874_v3 }
 0x626   :  { %4633 = vmatprep.subr.bf16.mxu0 %v5876_v5  ;;  %4697 = vmatprep.subr.bf16.mxu1 %v5880_v13 }
 0x628   :  { %2422 = vmatmul.mubr.f32.vlgmr.msra.gmra.mrb[10].mxu0 %v2183_v57  ;;  %2493 = vmatmul.mubr.f32.vlgmr.msra.gmra.mrb[10].mxu1 %v2183_v57  ;;  %v7440_v57 = vld [vmem:[#allocation32_spill] sm:$0xff] }
 0x629   :  { %4635 = vmatpush1.bf16.msra.mxu0 %v5886_v25  ;;  %4699 = vmatpush1.bf16.msra.mxu1 %v5890_v27 }
 0x62a   :  { %4637 = vmatprep.subr.bf16.mxu0 %v5892_v29  ;;  %4701 = vmatprep.subr.bf16.mxu1 %v5895_v38 }
 0x62d   :  { %4639 = vmatpush1.bf16.msra.mxu0 %v5900_v48  ;;  %4703 = vmatpush1.bf16.msra.mxu1 %v5904_v51 }
 0x62e   :  { %4641 = vmatprep.subr.bf16.mxu0 %v5906_v52  ;;  %4705 = vmatprep.subr.bf16.mxu1 %v5909_v59 }
 0x631   :  { %4643 = vmatpush1.bf16.msra.mxu0 %v7424_v47  ;;  %4707 = vmatpush1.bf16.msra.mxu1 %v7425_v39 }
 0x632   :  { %4645 = vmatprep.subr.bf16.mxu0 %v7426_v11  ;;  %4709 = vmatprep.subr.bf16.mxu1 %v7427_v46 }
 0x635   :  { %4647 = vmatpush1.bf16.msra.mxu0 %v7428_v42  ;;  %4711 = vmatpush1.bf16.msra.mxu1 %v7429_v31  ;;  %v7480_v31 = vld [vmem:[#allocation70_spill] sm:$0xff] }
 0x636   :  { %4649 = vmatprep.subr.bf16.mxu0 %v7430_v10  ;;  %4713 = vmatprep.subr.bf16.mxu1 %v7431_v0  ;;  %v7441_v10 = vld [vmem:[#allocation33_spill] sm:$0xff]  ;;  %v7442_v0 = vld [vmem:[#allocation34_spill] sm:$0xff] }
 0x639   :  { %4651 = vmatpush1.bf16.msra.mxu0 %v7432_v43  ;;  %4715 = vmatpush1.bf16.msra.mxu1 %v7433_v54  ;;  %v7443_v43 = vld [vmem:[#allocation35_spill] sm:$0xff]  ;;  %v7444_v54 = vld [vmem:[#allocation36_spill] sm:$0xff] }
 0x63a   :  { %4653 = vmatprep.subr.bf16.mxu0 %v7434_v62  ;;  %4717 = vmatprep.subr.bf16.mxu1 %v7435_v33  ;;  %v7445_v62 = vld [vmem:[#allocation37_spill] sm:$0xff]  ;;  %v7446_v33 = vld [vmem:[#allocation38_spill] sm:$0xff] }
 0x63d   :  { %4655 = vmatpush1.bf16.msra.mxu0 %v7436_v16  ;;  %4719 = vmatpush1.bf16.msra.mxu1 %v7437_v8  ;;  %v7447_v16 = vld [vmem:[#allocation39_spill] sm:$0xff]  ;;  %v7448_v8 = vld [vmem:[#allocation40_spill] sm:$0xff] }
 0x63e   :  { %4657 = vmatprep.subr.bf16.mxu0 %v7438_v9  ;;  %4721 = vmatprep.subr.bf16.mxu1 %v7439_v6  ;;  %v7449_v9 = vld [vmem:[#allocation41_spill] sm:$0xff]  ;;  %v7450_v6 = vld [vmem:[#allocation42_spill] sm:$0xff] }
 0x641   :  { %4659 = vmatpush1.bf16.msra.mxu0 %v7440_v57  ;;  %4723 = vmatpush1.bf16.msra.mxu1 %v7441_v10  ;;  %v7451_v57 = vld [vmem:[#allocation43_spill] sm:$0xff]  ;;  %v7452_v10 = vld [vmem:[#allocation44_spill] sm:$0xff] }
 0x642   :  { %4661 = vmatprep.subr.bf16.mxu0 %v7442_v0  ;;  %4725 = vmatprep.subr.bf16.mxu1 %v7443_v43  ;;  %v7453_v0 = vld [vmem:[#allocation45_spill] sm:$0xff]  ;;  %v7454_v43 = vld [vmem:[#allocation46_spill] sm:$0xff] }
 0x645   :  { %4663 = vmatpush1.bf16.msra.mxu0 %v7444_v54  ;;  %4727 = vmatpush1.bf16.msra.mxu1 %v7445_v62  ;;  %v7455_v54 = vld [vmem:[#allocation47_spill] sm:$0xff]  ;;  %v7456_v62 = vld [vmem:[#allocation48_spill] sm:$0xff] }
 0x646   :  { %4665 = vmatprep.subr.bf16.mxu0 %v7446_v33  ;;  %4729 = vmatprep.subr.bf16.mxu1 %v7447_v16  ;;  %v7457_v33 = vld [vmem:[#allocation49_spill] sm:$0xff]  ;;  %v7458_v16 = vld [vmem:[#allocation50_spill] sm:$0xff] }
 0x649   :  { %4667 = vmatpush1.bf16.msra.mxu0 %v7448_v8  ;;  %4731 = vmatpush1.bf16.msra.mxu1 %v7449_v9  ;;  %v7459_v8 = vld [vmem:[#allocation51_spill] sm:$0xff]  ;;  %v7460_v9 = vld [vmem:[#allocation52_spill] sm:$0xff] }
 0x64a   :  { %4669 = vmatprep.subr.bf16.mxu0 %v7450_v6  ;;  %4733 = vmatprep.subr.bf16.mxu1 %v7451_v57  ;;  %v7461_v6 = vld [vmem:[#allocation53_spill] sm:$0xff]  ;;  %v7462_v57 = vld [vmem:[#allocation54_spill] sm:$0xff] }
 0x64d   :  { %4671 = vmatpush1.bf16.msra.mxu0 %v7452_v10  ;;  %4735 = vmatpush1.bf16.msra.mxu1 %v7453_v0  ;;  %v7463_v10 = vld [vmem:[#allocation55_spill] sm:$0xff]  ;;  %v7464_v0 = vld [vmem:[#allocation56_spill] sm:$0xff] }
 0x64e   :  { %4673 = vmatprep.subr.bf16.mxu0 %v7454_v43  ;;  %4737 = vmatprep.subr.bf16.mxu1 %v7455_v54  ;;  %v7465_v43 = vld [vmem:[#allocation57_spill] sm:$0xff]  ;;  %v7466_v54 = vld [vmem:[#allocation58_spill] sm:$0xff] }
 0x651   :  { %4675 = vmatpush1.bf16.msra.mxu0 %v7456_v62  ;;  %4739 = vmatpush1.bf16.msra.mxu1 %v7457_v33  ;;  %v7467_v62 = vld [vmem:[#allocation59_spill] sm:$0xff]  ;;  %v7468_v33 = vld [vmem:[#allocation60_spill] sm:$0xff] }
 0x652   :  { %4677 = vmatprep.subr.bf16.mxu0 %v7458_v16  ;;  %4741 = vmatprep.subr.bf16.mxu1 %v7459_v8  ;;  %v7469_v16 = vld [vmem:[#allocation61_spill] sm:$0xff]  ;;  %v7470_v8 = vld [vmem:[#allocation62_spill] sm:$0xff] }
 0x655   :  { %4679 = vmatpush1.bf16.msra.mxu0 %v7460_v9  ;;  %4743 = vmatpush1.bf16.msra.mxu1 %v7461_v6  ;;  %v7471_v9 = vld [vmem:[#allocation63_spill] sm:$0xff]  ;;  %v7472_v6 = vld [vmem:[#allocation64_spill] sm:$0xff] }
 0x656   :  { %4681 = vmatprep.subr.bf16.mxu0 %v7462_v57  ;;  %4745 = vmatprep.subr.bf16.mxu1 %v7463_v10  ;;  %v7473_v57 = vld [vmem:[#allocation65_spill] sm:$0xff]  ;;  %v7474_v10 = vld [vmem:[#allocation66_spill] sm:$0xff] }
 0x659   :  { %4683 = vmatpush1.bf16.msra.mxu0 %v7464_v0  ;;  %4747 = vmatpush1.bf16.msra.mxu1 %v7465_v43  ;;  %v7475_v0 = vld [vmem:[#allocation67_spill] sm:$0xff]  ;;  %v7476_v43 = vld [vmem:[#allocation68_spill] sm:$0xff] }
 0x65a   :  { %4685 = vmatprep.subr.bf16.mxu0 %v7466_v54  ;;  %4749 = vmatprep.subr.bf16.mxu1 %v7467_v62  ;;  %v7477_v54 = vld [vmem:[#allocation69_spill] sm:$0xff]  ;;  %v7478_v62 = vld [vmem:[#allocation14_spill] sm:$0xff] }
 0x65d   :  { %4687 = vmatpush1.bf16.msra.mxu0 %v7468_v33  ;;  %4751 = vmatpush1.bf16.msra.mxu1 %v7469_v16  ;;  %v7479_v33 = vld [vmem:[#allocation15_spill] sm:$0xff] }
 0x65e   :  { %4689 = vmatprep.subr.bf16.mxu0 %v7470_v8  ;;  %4753 = vmatprep.subr.bf16.mxu1 %v7471_v9 }
 0x661   :  { %4691 = vmatpush1.bf16.msra.mxu0 %v7472_v6  ;;  %4755 = vmatpush1.bf16.msra.mxu1 %v7473_v57 }
 0x662   :  { %4693 = vmatprep.subr.bf16.mxu0 %v7474_v10  ;;  %4757 = vmatprep.subr.bf16.mxu1 %v7475_v0  ;;  %v7481_v0 = vld [vmem:[#allocation75_spill] sm:$0xff] }
 0x665   :  { %4695 = vmatpush1.bf16.msra.mxu0 %v7476_v43  ;;  %4759 = vmatpush1.bf16.msra.mxu1 %v7477_v54 }
 0x666   :  { %4761 = vmatprep.subr.bf16.mxu0 %v7478_v62  ;;  %4793 = vmatprep.subr.bf16.mxu1 %v7479_v33 }
 0x6db   :  { %v2250_v16 = vpop.f32.mrb[24].mxu0  ;;  %v2321_v8 = vpop.f32.mrb[24].mxu1 }
 0x6dc   :  { %v2251_v9 = vadd.f32 %v2250_v16, %v7480_v31  ;;  %v2252_v42 = vpop.f32.mrb[25].mxu0  ;;  %v2323_v6 = vpop.f32.mrb[25].mxu1  ;;  %v2322_v54 = vadd.f32 %v2321_v8, %v7301_v63  ;;  %v7482_v8 = vld [vmem:[#allocation71_spill] sm:$0xff] }
 0x6dd   :  { %v2253_v57 = vadd.f32 %v2252_v42, %v7299_v22  ;;  %v2324_v43 = vadd.f32 %v2323_v6, %v7481_v0 }
 0x6de   :  { %v3534_v46 = vmul.f32 -1.442695, %v2251_v9 }
 0x6df   :  { %v3535_v10 = vmul.f32 -1.442695, %v2253_v57  ;;  %v3536_v11 = vmul.f32 -1.442695, %v2324_v43 }
 0x6e0   :  { %5386 = vpow2.f32 %v3534_v46 }
 0x6e1   :  { %5388 = vpow2.f32 %v3535_v10 }
 0x6e2   :  { %5390 = vpow2.f32 %v3536_v11 }
 0x6e3   :  { %5392 = vtanh.f32 %v2322_v54 }
 0x6ea   :  { %v5387_v62 = vpop.eup %5386 }
 0x6eb   :  { %v5389_v39 = vpop.eup %5388  ;;  %v2329_v33 = vadd.f32 1.0, %v5387_v62 }
 0x6ec   :  { %v2335_v47 = vadd.f32 1.0, %v5389_v39  ;;  %v5391_v16 = vpop.eup %5390 }
 0x6ed   :  { %5394 = vrcp.f32 %v2329_v33  ;;  %v5393_v31 = vpop.eup %5392  ;;  %v2342_v46 = vadd.f32 1.0, %v5391_v16 }
 0x6ee   :  { %5396 = vrcp.f32 %v2335_v47 }
 0x6ef   :  { %5398 = vrcp.f32 %v2342_v46 }
 0x6f7   :  { %v5395_v42 = vpop.eup %5394 }
 0x6f8   :  { %v5397_v9 = vpop.eup %5396  ;;  %v2346_v57 = vmul.f32 %v5395_v42, %v5393_v31  ;;  %v7483_v31 = vld [vmem:[#allocation73_spill] sm:$0xff] }
 0x6f9   :  { %v2345_v10 = vmul.f32 %v5397_v9, %v6570_v34  ;;  %v5399_v34 = vpop.eup %5398 }
 0x6fb   :  { %v2423_v6 = vpop.f32.mrb[10].mxu0  ;;  %v2494_v43 = vpop.f32.mrb[10].mxu1  ;;  %v6684_v0 = vadd.f32 %v2346_v57, %v2345_v10 }
 0x6fc   :  { %v5178_v62 = vadd.f32 %v2423_v6, %v7482_v8  ;;  %v2425_v11 = vpop.f32.mrb[11].mxu0  ;;  %v2496_v54 = vpop.f32.mrb[11].mxu1  ;;  %v5194_v57 = vadd.f32 %v2494_v43, %v6104_v20 }
 0x6fd   :  { %v5179_v39 = vadd.f32 %v2425_v11, %v7242_v18  ;;  %5400 = vtanh.f32 %v6684_v0  ;;  %v5195_v16 = vadd.f32 %v2496_v54, %v7483_v31 }
 0x6fe   :  { %v3537_v47 = vmul.f32 -1.442695, %v5178_v62 }
 0x6ff   :  { %v3538_v33 = vmul.f32 -1.442695, %v5179_v39  ;;  %v3539_v9 = vmul.f32 -1.442695, %v5195_v16 }
 0x700   :  { %5402 = vpow2.f32 %v3537_v47 }
 0x701   :  { %5404 = vpow2.f32 %v3538_v33 }
 0x702   :  { %5406 = vpow2.f32 %v3539_v9 }
 0x703   :  { %5408 = vtanh.f32 %v5194_v57  ;;  %v7487_v57 = vld [vmem:[#allocation19_spill] sm:$0xff] }
 0x707   :  { %v5401_v42 = vpop.eup %5400 }
 0x708   :  { %v2349_v46 = vmul.f32 %v5401_v42, %v5399_v34 }
 0x70a   :  { %v5403_v10 = vpop.eup %5402  ;;  %2591 = vmatprep.mubr.f32.mxu0 %v2349_v46  ;;  %2662 = vmatprep.mubr.f32.mxu1 %v2349_v46  ;;  %v7488_v46 = vld [vmem:[#allocation20_spill] sm:$0xff] }
 0x70b   :  { %v5405_v6 = vpop.eup %5404  ;;  %v2506_v8 = vadd.f32 1.0, %v5403_v10  ;;  %v7489_v10 = vld [vmem:[#allocation21_spill] sm:$0xff] }
 0x70c   :  { %v2512_v11 = vadd.f32 1.0, %v5405_v6  ;;  %v5407_v62 = vpop.eup %5406  ;;  %v7490_v6 = vld [vmem:[#allocation22_spill] sm:$0xff] }
 0x70d   :  { %5410 = vrcp.f32 %v2506_v8  ;;  %v5409_v39 = vpop.eup %5408  ;;  %v2519_v31 = vadd.f32 1.0, %v5407_v62  ;;  %v7485_v8 = vld [vmem:[#allocation17_spill] sm:$0xff]  ;;  %v7492_v62 = vld [vmem:[#allocation24_spill] sm:$0xff] }
 0x70e   :  { %5412 = vrcp.f32 %v2512_v11  ;;  %v7491_v11 = vld [vmem:[#allocation23_spill] sm:$0xff] }
 0x70f   :  { %5414 = vrcp.f32 %v2519_v31  ;;  %v7486_v31 = vld [vmem:[#allocation18_spill] sm:$0xff] }
 0x717   :  { %v5411_v47 = vpop.eup %5410 }
 0x718   :  { %v5413_v54 = vpop.eup %5412  ;;  %v2523_v33 = vmul.f32 %v5411_v47, %v5409_v39  ;;  %v7493_v39 = vld [vmem:[#allocation25_spill] sm:$0xff]  ;;  %v7494_v47 = vld [vmem:[#allocation26_spill] sm:$0xff] }
 0x719   :  { %v2522_v16 = vmul.f32 %v5413_v54, %v6578_v14  ;;  %v5415_v34 = vpop.eup %5414  ;;  %v7484_v14 = vld [vmem:[#allocation16_spill] sm:$0xff]  ;;  %v7495_v54 = vld [vmem:[#allocation27_spill] sm:$0xff] }
 0x71b   :  { %v6692_v43 = vadd.f32 %v2523_v33, %v2522_v16  ;;  %v7496_v33 = vld [vmem:[#allocation28_spill] sm:$0xff]  ;;  %v7497_v16 = vld [vmem:[#allocation29_spill] sm:$0xff] }
 0x71d   :  { %5416 = vtanh.f32 %v6692_v43 }
 0x727   :  { %v5417_v42 = vpop.eup %5416 }
 0x728   :  { %v2526_v9 = vmul.f32 %v5417_v42, %v5415_v34  ;;  %v7498_v34 = vld [vmem:[#allocation30_spill] sm:$0xff]  ;;  %v7499_v42 = vld [vmem:[#allocation31_spill] sm:$0xff] }
 0x72a   :  { %2592 = vmatmul.mubr.f32.vlgmr.msra.gmra.mrb[26].mxu0 %v2526_v9  ;;  %2663 = vmatmul.mubr.f32.vlgmr.msra.gmra.mrb[26].mxu1 %v2526_v9 }
 0x72b   :  { %4763 = vmatpush1.bf16.msra.mxu0 %v5740_v15  ;;  %4795 = vmatpush1.bf16.msra.mxu1 %v5749_v19 }
 0x72c   :  { %4765 = vmatprep.subr.bf16.mxu0 %v5752_v23  ;;  %4797 = vmatprep.subr.bf16.mxu1 %v5754_v24 }
 0x72d   :  { %2764 = vmatprep.mubr.f32.mxu0 %v7181_v58  ;;  %2835 = vmatprep.mubr.f32.mxu1 %v7181_v58 }
 0x72f   :  { %4767 = vmatpush1.bf16.msra.mxu0 %v5758_v28  ;;  %4799 = vmatpush1.bf16.msra.mxu1 %v5765_v32 }
 0x730   :  { %4769 = vmatprep.subr.bf16.mxu0 %v5769_v36  ;;  %4801 = vmatprep.subr.bf16.mxu1 %v5771_v37 }
 0x733   :  { %4771 = vmatpush1.bf16.msra.mxu0 %v5775_v41  ;;  %4803 = vmatpush1.bf16.msra.mxu1 %v5782_v45 }
 0x734   :  { %4773 = vmatprep.subr.bf16.mxu0 %v5786_v49  ;;  %4805 = vmatprep.subr.bf16.mxu1 %v5790_v53 }
 0x737   :  { %4775 = vmatpush1.bf16.msra.mxu0 %v5794_v56  ;;  %4807 = vmatpush1.bf16.msra.mxu1 %v5798_v60 }
 0x738   :  { %4777 = vmatprep.subr.bf16.mxu0 %v5805_v1  ;;  %4809 = vmatprep.subr.bf16.mxu1 %v5809_v4 }
 0x73b   :  { %4779 = vmatpush1.bf16.msra.mxu0 %v5813_v7  ;;  %4811 = vmatpush1.bf16.msra.mxu1 %v5817_v12 }
 0x73c   :  { %4781 = vmatprep.subr.bf16.mxu0 %v5824_v17  ;;  %4813 = vmatprep.subr.bf16.mxu1 %v5828_v21 }
 0x73f   :  { %4783 = vmatpush1.bf16.msra.mxu0 %v5832_v26  ;;  %4815 = vmatpush1.bf16.msra.mxu1 %v5836_v30 }
 0x740   :  { %4785 = vmatprep.subr.bf16.mxu0 %v5843_v35  ;;  %4817 = vmatprep.subr.bf16.mxu1 %v5847_v40 }
 0x743   :  { %4787 = vmatpush1.bf16.msra.mxu0 %v5851_v44  ;;  %4819 = vmatpush1.bf16.msra.mxu1 %v5858_v50 }
 0x744   :  { %4789 = vmatprep.subr.bf16.mxu0 %v5862_v55  ;;  %4821 = vmatprep.subr.bf16.mxu1 %v5866_v61 }
 0x747   :  { %4791 = vmatpush1.bf16.msra.mxu0 %v5870_v2  ;;  %4823 = vmatpush1.bf16.msra.mxu1 %v5874_v3 }
 0x748   :  { %4825 = vmatprep.subr.bf16.mxu0 %v5876_v5  ;;  %4889 = vmatprep.subr.bf16.mxu1 %v5880_v13 }
 0x74a   :  { %2765 = vmatmul.mubr.f32.vlgmr.msra.gmra.mrb[12].mxu0 %v2526_v9  ;;  %2836 = vmatmul.mubr.f32.vlgmr.msra.gmra.mrb[12].mxu1 %v2526_v9  ;;  %v7500_v9 = vld [vmem:[#allocation32_spill] sm:$0xff] }
 0x74b   :  { %4827 = vmatpush1.bf16.msra.mxu0 %v5886_v25  ;;  %4891 = vmatpush1.bf16.msra.mxu1 %v5890_v27 }
 0x74c   :  { %4829 = vmatprep.subr.bf16.mxu0 %v5892_v29  ;;  %4893 = vmatprep.subr.bf16.mxu1 %v5895_v38 }
 0x74f   :  { %4831 = vmatpush1.bf16.msra.mxu0 %v5900_v48  ;;  %4895 = vmatpush1.bf16.msra.mxu1 %v5904_v51 }
 0x750   :  { %4833 = vmatprep.subr.bf16.mxu0 %v5906_v52  ;;  %4897 = vmatprep.subr.bf16.mxu1 %v5909_v59 }
 0x753   :  { %4835 = vmatpush1.bf16.msra.mxu0 %v7484_v14  ;;  %4899 = vmatpush1.bf16.msra.mxu1 %v7485_v8 }
 0x754   :  { %4837 = vmatprep.subr.bf16.mxu0 %v7486_v31  ;;  %4901 = vmatprep.subr.bf16.mxu1 %v7487_v57 }
 0x757   :  { %4839 = vmatpush1.bf16.msra.mxu0 %v7488_v46  ;;  %4903 = vmatpush1.bf16.msra.mxu1 %v7489_v10  ;;  %v7540_v10 = vld [vmem:[#allocation70_spill] sm:$0xff] }
 0x758   :  { %4841 = vmatprep.subr.bf16.mxu0 %v7490_v6  ;;  %4905 = vmatprep.subr.bf16.mxu1 %v7491_v11  ;;  %v7501_v6 = vld [vmem:[#allocation33_spill] sm:$0xff]  ;;  %v7502_v11 = vld [vmem:[#allocation34_spill] sm:$0xff] }
 0x75b   :  { %4843 = vmatpush1.bf16.msra.mxu0 %v7492_v62  ;;  %4907 = vmatpush1.bf16.msra.mxu1 %v7493_v39  ;;  %v7503_v62 = vld [vmem:[#allocation35_spill] sm:$0xff]  ;;  %v7504_v39 = vld [vmem:[#allocation36_spill] sm:$0xff] }
 0x75c   :  { %4845 = vmatprep.subr.bf16.mxu0 %v7494_v47  ;;  %4909 = vmatprep.subr.bf16.mxu1 %v7495_v54  ;;  %v7505_v47 = vld [vmem:[#allocation37_spill] sm:$0xff]  ;;  %v7506_v54 = vld [vmem:[#allocation38_spill] sm:$0xff] }
 0x75f   :  { %4847 = vmatpush1.bf16.msra.mxu0 %v7496_v33  ;;  %4911 = vmatpush1.bf16.msra.mxu1 %v7497_v16  ;;  %v7507_v33 = vld [vmem:[#allocation39_spill] sm:$0xff]  ;;  %v7508_v16 = vld [vmem:[#allocation40_spill] sm:$0xff] }
 0x760   :  { %4849 = vmatprep.subr.bf16.mxu0 %v7498_v34  ;;  %4913 = vmatprep.subr.bf16.mxu1 %v7499_v42  ;;  %v7509_v34 = vld [vmem:[#allocation41_spill] sm:$0xff]  ;;  %v7510_v42 = vld [vmem:[#allocation42_spill] sm:$0xff] }
 0x763   :  { %4851 = vmatpush1.bf16.msra.mxu0 %v7500_v9  ;;  %4915 = vmatpush1.bf16.msra.mxu1 %v7501_v6  ;;  %v7511_v9 = vld [vmem:[#allocation43_spill] sm:$0xff]  ;;  %v7512_v6 = vld [vmem:[#allocation44_spill] sm:$0xff] }
 0x764   :  { %4853 = vmatprep.subr.bf16.mxu0 %v7502_v11  ;;  %4917 = vmatprep.subr.bf16.mxu1 %v7503_v62  ;;  %v7513_v11 = vld [vmem:[#allocation45_spill] sm:$0xff]  ;;  %v7514_v62 = vld [vmem:[#allocation46_spill] sm:$0xff] }
 0x767   :  { %4855 = vmatpush1.bf16.msra.mxu0 %v7504_v39  ;;  %4919 = vmatpush1.bf16.msra.mxu1 %v7505_v47  ;;  %v7515_v39 = vld [vmem:[#allocation47_spill] sm:$0xff]  ;;  %v7516_v47 = vld [vmem:[#allocation48_spill] sm:$0xff] }
 0x768   :  { %4857 = vmatprep.subr.bf16.mxu0 %v7506_v54  ;;  %4921 = vmatprep.subr.bf16.mxu1 %v7507_v33  ;;  %v7517_v54 = vld [vmem:[#allocation49_spill] sm:$0xff]  ;;  %v7518_v33 = vld [vmem:[#allocation50_spill] sm:$0xff] }
 0x76b   :  { %4859 = vmatpush1.bf16.msra.mxu0 %v7508_v16  ;;  %4923 = vmatpush1.bf16.msra.mxu1 %v7509_v34  ;;  %v7519_v16 = vld [vmem:[#allocation51_spill] sm:$0xff]  ;;  %v7520_v34 = vld [vmem:[#allocation52_spill] sm:$0xff] }
 0x76c   :  { %4861 = vmatprep.subr.bf16.mxu0 %v7510_v42  ;;  %4925 = vmatprep.subr.bf16.mxu1 %v7511_v9  ;;  %v7521_v42 = vld [vmem:[#allocation53_spill] sm:$0xff]  ;;  %v7522_v9 = vld [vmem:[#allocation54_spill] sm:$0xff] }
 0x76f   :  { %4863 = vmatpush1.bf16.msra.mxu0 %v7512_v6  ;;  %4927 = vmatpush1.bf16.msra.mxu1 %v7513_v11  ;;  %v7523_v6 = vld [vmem:[#allocation55_spill] sm:$0xff]  ;;  %v7524_v11 = vld [vmem:[#allocation56_spill] sm:$0xff] }
 0x770   :  { %4865 = vmatprep.subr.bf16.mxu0 %v7514_v62  ;;  %4929 = vmatprep.subr.bf16.mxu1 %v7515_v39  ;;  %v7525_v62 = vld [vmem:[#allocation57_spill] sm:$0xff]  ;;  %v7526_v39 = vld [vmem:[#allocation58_spill] sm:$0xff] }
 0x773   :  { %4867 = vmatpush1.bf16.msra.mxu0 %v7516_v47  ;;  %4931 = vmatpush1.bf16.msra.mxu1 %v7517_v54  ;;  %v7527_v47 = vld [vmem:[#allocation59_spill] sm:$0xff]  ;;  %v7528_v54 = vld [vmem:[#allocation60_spill] sm:$0xff] }
 0x774   :  { %4869 = vmatprep.subr.bf16.mxu0 %v7518_v33  ;;  %4933 = vmatprep.subr.bf16.mxu1 %v7519_v16  ;;  %v7529_v33 = vld [vmem:[#allocation61_spill] sm:$0xff]  ;;  %v7530_v16 = vld [vmem:[#allocation62_spill] sm:$0xff] }
 0x777   :  { %4871 = vmatpush1.bf16.msra.mxu0 %v7520_v34  ;;  %4935 = vmatpush1.bf16.msra.mxu1 %v7521_v42  ;;  %v7531_v34 = vld [vmem:[#allocation63_spill] sm:$0xff]  ;;  %v7532_v42 = vld [vmem:[#allocation64_spill] sm:$0xff] }
 0x778   :  { %4873 = vmatprep.subr.bf16.mxu0 %v7522_v9  ;;  %4937 = vmatprep.subr.bf16.mxu1 %v7523_v6  ;;  %v7533_v9 = vld [vmem:[#allocation65_spill] sm:$0xff]  ;;  %v7534_v6 = vld [vmem:[#allocation66_spill] sm:$0xff] }
 0x77b   :  { %4875 = vmatpush1.bf16.msra.mxu0 %v7524_v11  ;;  %4939 = vmatpush1.bf16.msra.mxu1 %v7525_v62  ;;  %v7535_v11 = vld [vmem:[#allocation67_spill] sm:$0xff]  ;;  %v7536_v62 = vld [vmem:[#allocation68_spill] sm:$0xff] }
 0x77c   :  { %4877 = vmatprep.subr.bf16.mxu0 %v7526_v39  ;;  %4941 = vmatprep.subr.bf16.mxu1 %v7527_v47  ;;  %v7537_v39 = vld [vmem:[#allocation69_spill] sm:$0xff]  ;;  %v7538_v47 = vld [vmem:[#allocation14_spill] sm:$0xff] }
 0x77f   :  { %4879 = vmatpush1.bf16.msra.mxu0 %v7528_v54  ;;  %4943 = vmatpush1.bf16.msra.mxu1 %v7529_v33  ;;  %v7539_v54 = vld [vmem:[#allocation15_spill] sm:$0xff] }
 0x780   :  { %4881 = vmatprep.subr.bf16.mxu0 %v7530_v16  ;;  %4945 = vmatprep.subr.bf16.mxu1 %v7531_v34 }
 0x783   :  { %4883 = vmatpush1.bf16.msra.mxu0 %v7532_v42  ;;  %4947 = vmatpush1.bf16.msra.mxu1 %v7533_v9 }
 0x784   :  { %4885 = vmatprep.subr.bf16.mxu0 %v7534_v6  ;;  %4949 = vmatprep.subr.bf16.mxu1 %v7535_v11  ;;  %v7541_v11 = vld [vmem:[#allocation75_spill] sm:$0xff] }
 0x787   :  { %4887 = vmatpush1.bf16.msra.mxu0 %v7536_v62  ;;  %4951 = vmatpush1.bf16.msra.mxu1 %v7537_v39 }
 0x788   :  { %4953 = vmatprep.subr.bf16.mxu0 %v7538_v47  ;;  %4985 = vmatprep.subr.bf16.mxu1 %v7539_v54 }
 0x7fd   :  { %v2593_v33 = vpop.f32.mrb[26].mxu0  ;;  %v2664_v16 = vpop.f32.mrb[26].mxu1 }
 0x7fe   :  { %v2594_v34 = vadd.f32 %v2593_v33, %v7540_v10  ;;  %v2595_v46 = vpop.f32.mrb[27].mxu0  ;;  %v2666_v42 = vpop.f32.mrb[27].mxu1  ;;  %v2665_v39 = vadd.f32 %v2664_v16, %v7301_v63  ;;  %v7542_v16 = vld [vmem:[#allocation71_spill] sm:$0xff] }
 0x7ff   :  { %v2596_v9 = vadd.f32 %v2595_v46, %v7299_v22  ;;  %v2667_v62 = vadd.f32 %v2666_v42, %v7541_v11 }
 0x800   :  { %v3540_v57 = vmul.f32 -1.442695, %v2594_v34 }
 0x801   :  { %v3541_v6 = vmul.f32 -1.442695, %v2596_v9  ;;  %v3542_v31 = vmul.f32 -1.442695, %v2667_v62 }
 0x802   :  { %5418 = vpow2.f32 %v3540_v57 }
 0x803   :  { %5420 = vpow2.f32 %v3541_v6 }
 0x804   :  { %5422 = vpow2.f32 %v3542_v31 }
 0x805   :  { %5424 = vtanh.f32 %v2665_v39 }
 0x80c   :  { %v5419_v47 = vpop.eup %5418 }
 0x80d   :  { %v5421_v8 = vpop.eup %5420  ;;  %v2672_v54 = vadd.f32 1.0, %v5419_v47 }
 0x80e   :  { %v2678_v14 = vadd.f32 1.0, %v5421_v8  ;;  %v5423_v33 = vpop.eup %5422 }
 0x80f   :  { %5426 = vrcp.f32 %v2672_v54  ;;  %v5425_v10 = vpop.eup %5424  ;;  %v2685_v57 = vadd.f32 1.0, %v5423_v33 }
 0x810   :  { %5428 = vrcp.f32 %v2678_v14 }
 0x811   :  { %5430 = vrcp.f32 %v2685_v57 }
 0x819   :  { %v5427_v46 = vpop.eup %5426 }
 0x81a   :  { %v5429_v34 = vpop.eup %5428  ;;  %v2689_v9 = vmul.f32 %v5427_v46, %v5425_v10  ;;  %v7543_v10 = vld [vmem:[#allocation73_spill] sm:$0xff] }
 0x81b   :  { %v2688_v6 = vmul.f32 %v5429_v34, %v6684_v0  ;;  %v5431_v0 = vpop.eup %5430 }
 0x81d   :  { %v2766_v42 = vpop.f32.mrb[12].mxu0  ;;  %v2837_v62 = vpop.f32.mrb[12].mxu1  ;;  %v6798_v11 = vadd.f32 %v2689_v9, %v2688_v6 }
 0x81e   :  { %v5180_v47 = vadd.f32 %v2766_v42, %v7542_v16  ;;  %v2768_v31 = vpop.f32.mrb[13].mxu0  ;;  %v2839_v39 = vpop.f32.mrb[13].mxu1  ;;  %v5196_v9 = vadd.f32 %v2837_v62, %v6104_v20 }
 0x81f   :  { %v5181_v8 = vadd.f32 %v2768_v31, %v7242_v18  ;;  %5432 = vtanh.f32 %v6798_v11  ;;  %v5197_v33 = vadd.f32 %v2839_v39, %v7543_v10 }
 0x820   :  { %v3543_v14 = vmul.f32 -1.442695, %v5180_v47 }
 0x821   :  { %v3544_v54 = vmul.f32 -1.442695, %v5181_v8  ;;  %v3545_v34 = vmul.f32 -1.442695, %v5197_v33 }
 0x822   :  { %5434 = vpow2.f32 %v3543_v14 }
 0x823   :  { %5436 = vpow2.f32 %v3544_v54 }
 0x824   :  { %5438 = vpow2.f32 %v3545_v34 }
 0x825   :  { %5440 = vtanh.f32 %v5196_v9  ;;  %v7587_v9 = vld [vmem:[#allocation59_spill] sm:$0xff] }
 0x829   :  { %v5433_v46 = vpop.eup %5432 }
 0x82a   :  { %v2692_v57 = vmul.f32 %v5433_v46, %v5431_v0 }
 0x82c   :  { %v5435_v6 = vpop.eup %5434  ;;  %2934 = vmatprep.mubr.f32.mxu0 %v2692_v57  ;;  %3005 = vmatprep.mubr.f32.mxu1 %v2692_v57  ;;  %v7588_v57 = vld [vmem:[#allocation60_spill] sm:$0xff] }
 0x82d   :  { %v5437_v42 = vpop.eup %5436  ;;  %v2849_v16 = vadd.f32 1.0, %v5435_v6  ;;  %v7589_v6 = vld [vmem:[#allocation61_spill] sm:$0xff] }
 0x82e   :  { %v2855_v31 = vadd.f32 1.0, %v5437_v42  ;;  %v5439_v47 = vpop.eup %5438  ;;  %v7590_v42 = vld [vmem:[#allocation62_spill] sm:$0xff] }
 0x82f   :  { %5442 = vrcp.f32 %v2849_v16  ;;  %v5441_v8 = vpop.eup %5440  ;;  %v2862_v10 = vadd.f32 1.0, %v5439_v47  ;;  %v7585_v16 = vld [vmem:[#allocation57_spill] sm:$0xff]  ;;  %v7592_v47 = vld [vmem:[#allocation64_spill] sm:$0xff] }
 0x830   :  { %5444 = vrcp.f32 %v2855_v31  ;;  %v7591_v31 = vld [vmem:[#allocation63_spill] sm:$0xff] }
 0x831   :  { %5446 = vrcp.f32 %v2862_v10  ;;  %v7586_v10 = vld [vmem:[#allocation58_spill] sm:$0xff] }
 0x839   :  { %v5443_v14 = vpop.eup %5442 }
 0x83a   :  { %v5445_v39 = vpop.eup %5444  ;;  %v2866_v54 = vmul.f32 %v5443_v14, %v5441_v8  ;;  %v7593_v8 = vld [vmem:[#allocation65_spill] sm:$0xff]  ;;  %v7594_v14 = vld [vmem:[#allocation66_spill] sm:$0xff] }
 0x83b   :  { %v2865_v33 = vmul.f32 %v5445_v39, %v6692_v43  ;;  %v5447_v0 = vpop.eup %5446  ;;  %v7584_v43 = vld [vmem:[#allocation56_spill] sm:$0xff]  ;;  %v7595_v39 = vld [vmem:[#allocation67_spill] sm:$0xff] }
 0x83d   :  { %v6806_v62 = vadd.f32 %v2866_v54, %v2865_v33  ;;  %v7596_v54 = vld [vmem:[#allocation68_spill] sm:$0xff]  ;;  %v7597_v33 = vld [vmem:[#allocation69_spill] sm:$0xff] }
 0x83f   :  { %5448 = vtanh.f32 %v6806_v62 }
 0x849   :  { %v5449_v46 = vpop.eup %5448 }
 0x84a   :  { %v2869_v34 = vmul.f32 %v5449_v46, %v5447_v0 }
 0x84c   :  { %2935 = vmatmul.mubr.f32.vlgmr.msra.gmra.mrb[28].mxu0 %v2869_v34  ;;  %3006 = vmatmul.mubr.f32.vlgmr.msra.gmra.mrb[28].mxu1 %v2869_v34 }
 0x84d   :  { %4955 = vmatpush1.bf16.msra.mxu0 %v5740_v15  ;;  %4987 = vmatpush1.bf16.msra.mxu1 %v5749_v19  ;;  %v7544_v15 = vld [vmem:[#allocation16_spill] sm:$0xff]  ;;  %v7545_v19 = vld [vmem:[#allocation17_spill] sm:$0xff] }
 0x84e   :  { %4957 = vmatprep.subr.bf16.mxu0 %v5752_v23  ;;  %4989 = vmatprep.subr.bf16.mxu1 %v5754_v24  ;;  %v7546_v23 = vld [vmem:[#allocation18_spill] sm:$0xff]  ;;  %v7547_v24 = vld [vmem:[#allocation19_spill] sm:$0xff] }
 0x84f   :  { %3107 = vmatprep.mubr.f32.mxu0 %v7181_v58  ;;  %3178 = vmatprep.mubr.f32.mxu1 %v7181_v58 }
 0x851   :  { %4959 = vmatpush1.bf16.msra.mxu0 %v5758_v28  ;;  %4991 = vmatpush1.bf16.msra.mxu1 %v5765_v32  ;;  %v7548_v28 = vld [vmem:[#allocation20_spill] sm:$0xff]  ;;  %v7549_v32 = vld [vmem:[#allocation21_spill] sm:$0xff] }
 0x852   :  { %4961 = vmatprep.subr.bf16.mxu0 %v5769_v36  ;;  %4993 = vmatprep.subr.bf16.mxu1 %v5771_v37  ;;  %v7550_v36 = vld [vmem:[#allocation22_spill] sm:$0xff]  ;;  %v7551_v37 = vld [vmem:[#allocation23_spill] sm:$0xff] }
 0x855   :  { %4963 = vmatpush1.bf16.msra.mxu0 %v5775_v41  ;;  %4995 = vmatpush1.bf16.msra.mxu1 %v5782_v45  ;;  %v7552_v41 = vld [vmem:[#allocation24_spill] sm:$0xff]  ;;  %v7553_v45 = vld [vmem:[#allocation25_spill] sm:$0xff] }
 0x856   :  { %4965 = vmatprep.subr.bf16.mxu0 %v5786_v49  ;;  %4997 = vmatprep.subr.bf16.mxu1 %v5790_v53  ;;  %v7554_v49 = vld [vmem:[#allocation26_spill] sm:$0xff]  ;;  %v7555_v53 = vld [vmem:[#allocation27_spill] sm:$0xff] }
 0x859   :  { %4967 = vmatpush1.bf16.msra.mxu0 %v5794_v56  ;;  %4999 = vmatpush1.bf16.msra.mxu1 %v5798_v60  ;;  %v7556_v56 = vld [vmem:[#allocation28_spill] sm:$0xff]  ;;  %v7557_v60 = vld [vmem:[#allocation29_spill] sm:$0xff] }
 0x85a   :  { %4969 = vmatprep.subr.bf16.mxu0 %v5805_v1  ;;  %5001 = vmatprep.subr.bf16.mxu1 %v5809_v4  ;;  %v7558_v1 = vld [vmem:[#allocation30_spill] sm:$0xff]  ;;  %v7559_v4 = vld [vmem:[#allocation31_spill] sm:$0xff] }
 0x85d   :  { %4971 = vmatpush1.bf16.msra.mxu0 %v5813_v7  ;;  %5003 = vmatpush1.bf16.msra.mxu1 %v5817_v12  ;;  %v7560_v7 = vld [vmem:[#allocation32_spill] sm:$0xff]  ;;  %v7561_v12 = vld [vmem:[#allocation33_spill] sm:$0xff] }
 0x85e   :  { %4973 = vmatprep.subr.bf16.mxu0 %v5824_v17  ;;  %5005 = vmatprep.subr.bf16.mxu1 %v5828_v21  ;;  %v7562_v17 = vld [vmem:[#allocation34_spill] sm:$0xff]  ;;  %v7563_v21 = vld [vmem:[#allocation35_spill] sm:$0xff] }
 0x861   :  { %4975 = vmatpush1.bf16.msra.mxu0 %v5832_v26  ;;  %5007 = vmatpush1.bf16.msra.mxu1 %v5836_v30  ;;  %v7564_v26 = vld [vmem:[#allocation36_spill] sm:$0xff]  ;;  %v7565_v30 = vld [vmem:[#allocation37_spill] sm:$0xff] }
 0x862   :  { %4977 = vmatprep.subr.bf16.mxu0 %v5843_v35  ;;  %5009 = vmatprep.subr.bf16.mxu1 %v5847_v40  ;;  %v7566_v35 = vld [vmem:[#allocation38_spill] sm:$0xff]  ;;  %v7567_v40 = vld [vmem:[#allocation39_spill] sm:$0xff] }
 0x865   :  { %4979 = vmatpush1.bf16.msra.mxu0 %v5851_v44  ;;  %5011 = vmatpush1.bf16.msra.mxu1 %v5858_v50  ;;  %v7568_v44 = vld [vmem:[#allocation40_spill] sm:$0xff]  ;;  %v7569_v50 = vld [vmem:[#allocation41_spill] sm:$0xff] }
 0x866   :  { %4981 = vmatprep.subr.bf16.mxu0 %v5862_v55  ;;  %5013 = vmatprep.subr.bf16.mxu1 %v5866_v61  ;;  %v7570_v55 = vld [vmem:[#allocation42_spill] sm:$0xff]  ;;  %v7571_v61 = vld [vmem:[#allocation43_spill] sm:$0xff] }
 0x869   :  { %4983 = vmatpush1.bf16.msra.mxu0 %v5870_v2  ;;  %5015 = vmatpush1.bf16.msra.mxu1 %v5874_v3  ;;  %v7572_v2 = vld [vmem:[#allocation44_spill] sm:$0xff]  ;;  %v7573_v3 = vld [vmem:[#allocation45_spill] sm:$0xff] }
 0x86a   :  { %5017 = vmatprep.subr.bf16.mxu0 %v5876_v5  ;;  %5081 = vmatprep.subr.bf16.mxu1 %v5880_v13  ;;  %v7574_v5 = vld [vmem:[#allocation46_spill] sm:$0xff]  ;;  %v7575_v13 = vld [vmem:[#allocation47_spill] sm:$0xff] }
 0x86c   :  { %3108 = vmatmul.mubr.f32.vlgmr.msra.gmra.mrb[14].mxu0 %v2869_v34  ;;  %3179 = vmatmul.mubr.f32.vlgmr.msra.gmra.mrb[14].mxu1 %v2869_v34  ;;  %v7598_v34 = vld [vmem:[#allocation70_spill] sm:$0xff] }
 0x86d   :  { %5019 = vmatpush1.bf16.msra.mxu0 %v5886_v25  ;;  %5083 = vmatpush1.bf16.msra.mxu1 %v5890_v27  ;;  %v7576_v25 = vld [vmem:[#allocation48_spill] sm:$0xff]  ;;  %v7577_v27 = vld [vmem:[#allocation49_spill] sm:$0xff] }
 0x86e   :  { %5021 = vmatprep.subr.bf16.mxu0 %v5892_v29  ;;  %5085 = vmatprep.subr.bf16.mxu1 %v5895_v38  ;;  %v7578_v29 = vld [vmem:[#allocation50_spill] sm:$0xff]  ;;  %v7579_v38 = vld [vmem:[#allocation51_spill] sm:$0xff] }
 0x871   :  { %5023 = vmatpush1.bf16.msra.mxu0 %v5900_v48  ;;  %5087 = vmatpush1.bf16.msra.mxu1 %v5904_v51  ;;  %v7580_v48 = vld [vmem:[#allocation52_spill] sm:$0xff]  ;;  %v7581_v51 = vld [vmem:[#allocation53_spill] sm:$0xff] }
 0x872   :  { %5025 = vmatprep.subr.bf16.mxu0 %v5906_v52  ;;  %5089 = vmatprep.subr.bf16.mxu1 %v5909_v59  ;;  %v7582_v52 = vld [vmem:[#allocation54_spill] sm:$0xff]  ;;  %v7583_v59 = vld [vmem:[#allocation55_spill] sm:$0xff] }
 0x875   :  { %5027 = vmatpush1.bf16.msra.mxu0 %v7544_v15  ;;  %5091 = vmatpush1.bf16.msra.mxu1 %v7545_v19 }
 0x876   :  { %5029 = vmatprep.subr.bf16.mxu0 %v7546_v23  ;;  %5093 = vmatprep.subr.bf16.mxu1 %v7547_v24 }
 0x879   :  { %5031 = vmatpush1.bf16.msra.mxu0 %v7548_v28  ;;  %5095 = vmatpush1.bf16.msra.mxu1 %v7549_v32 }
 0x87a   :  { %5033 = vmatprep.subr.bf16.mxu0 %v7550_v36  ;;  %5097 = vmatprep.subr.bf16.mxu1 %v7551_v37  ;;  %v7599_v36 = vld [vmem:[#allocation75_spill] sm:$0xff] }
 0x87d   :  { %5035 = vmatpush1.bf16.msra.mxu0 %v7552_v41  ;;  %5099 = vmatpush1.bf16.msra.mxu1 %v7553_v45 }
 0x87e   :  { %5037 = vmatprep.subr.bf16.mxu0 %v7554_v49  ;;  %5101 = vmatprep.subr.bf16.mxu1 %v7555_v53 }
 0x881   :  { %5039 = vmatpush1.bf16.msra.mxu0 %v7556_v56  ;;  %5103 = vmatpush1.bf16.msra.mxu1 %v7557_v60 }
 0x882   :  { %5041 = vmatprep.subr.bf16.mxu0 %v7558_v1  ;;  %5105 = vmatprep.subr.bf16.mxu1 %v7559_v4 }
 0x885   :  { %5043 = vmatpush1.bf16.msra.mxu0 %v7560_v7  ;;  %5107 = vmatpush1.bf16.msra.mxu1 %v7561_v12 }
 0x886   :  { %5045 = vmatprep.subr.bf16.mxu0 %v7562_v17  ;;  %5109 = vmatprep.subr.bf16.mxu1 %v7563_v21 }
 0x889   :  { %5047 = vmatpush1.bf16.msra.mxu0 %v7564_v26  ;;  %5111 = vmatpush1.bf16.msra.mxu1 %v7565_v30 }
 0x88a   :  { %5049 = vmatprep.subr.bf16.mxu0 %v7566_v35  ;;  %5113 = vmatprep.subr.bf16.mxu1 %v7567_v40 }
 0x88d   :  { %5051 = vmatpush1.bf16.msra.mxu0 %v7568_v44  ;;  %5115 = vmatpush1.bf16.msra.mxu1 %v7569_v50  ;;  %v7600_v44 = vld [vmem:[#allocation71_spill] sm:$0xff] }
 0x88e   :  { %5053 = vmatprep.subr.bf16.mxu0 %v7570_v55  ;;  %5117 = vmatprep.subr.bf16.mxu1 %v7571_v61 }
 0x891   :  { %5055 = vmatpush1.bf16.msra.mxu0 %v7572_v2  ;;  %5119 = vmatpush1.bf16.msra.mxu1 %v7573_v3 }
 0x892   :  { %5057 = vmatprep.subr.bf16.mxu0 %v7574_v5  ;;  %5121 = vmatprep.subr.bf16.mxu1 %v7575_v13  ;;  %v7601_v13 = vld [vmem:[#allocation73_spill] sm:$0xff] }
 0x895   :  { %5059 = vmatpush1.bf16.msra.mxu0 %v7576_v25  ;;  %5123 = vmatpush1.bf16.msra.mxu1 %v7577_v27 }
 0x896   :  { %5061 = vmatprep.subr.bf16.mxu0 %v7578_v29  ;;  %5125 = vmatprep.subr.bf16.mxu1 %v7579_v38 }
 0x899   :  { %5063 = vmatpush1.bf16.msra.mxu0 %v7580_v48  ;;  %5127 = vmatpush1.bf16.msra.mxu1 %v7581_v51 }
 0x89a   :  { %5065 = vmatprep.subr.bf16.mxu0 %v7582_v52  ;;  %5129 = vmatprep.subr.bf16.mxu1 %v7583_v59 }
 0x89d   :  { %5067 = vmatpush1.bf16.msra.mxu0 %v7584_v43  ;;  %5131 = vmatpush1.bf16.msra.mxu1 %v7585_v16 }
 0x89e   :  { %5069 = vmatprep.subr.bf16.mxu0 %v7586_v10  ;;  %5133 = vmatprep.subr.bf16.mxu1 %v7587_v9 }
 0x8a1   :  { %5071 = vmatpush1.bf16.msra.mxu0 %v7588_v57  ;;  %5135 = vmatpush1.bf16.msra.mxu1 %v7589_v6 }
 0x8a2   :  { %5073 = vmatprep.subr.bf16.mxu0 %v7590_v42  ;;  %5137 = vmatprep.subr.bf16.mxu1 %v7591_v31 }
 0x8a5   :  { %5075 = vmatpush1.bf16.msra.mxu0 %v7592_v47  ;;  %5139 = vmatpush1.bf16.msra.mxu1 %v7593_v8 }
 0x8a6   :  { %5077 = vmatprep.subr.bf16.mxu0 %v7594_v14  ;;  %5141 = vmatprep.subr.bf16.mxu1 %v7595_v39  ;;  %v3379_v14 = vld [vmem:[%s6984_s6] sm:$0xff]  ;;  %v3380_v39 = vld [vmem:[%s6984_s6 + $0x8] sm:$0xff] }
 0x8a9   :  { %5079 = vmatpush1.bf16.msra.mxu0 %v7596_v54  ;;  %5143 = vmatpush1.bf16.msra.mxu1 %v7597_v33  ;;  %v5145_v54 = vpack.c.bf16 %v3380_v39, %v3379_v14  ;;  %v5622_v33 = vmov 0.0|0.0  }
 0x8aa   :  { %5144 = vmatprep.subr.bf16.mxu0 %v5622_v33 }
 0x91f   :  { %v2936_v0 = vpop.f32.mrb[28].mxu0  ;;  %v3007_v46 = vpop.f32.mrb[28].mxu1 }
 0x920   :  { %v2937_v15 = vadd.f32 %v2936_v0, %v7598_v34  ;;  %v2938_v19 = vpop.f32.mrb[29].mxu0  ;;  %v3009_v23 = vpop.f32.mrb[29].mxu1  ;;  %v3008_v45 = vadd.f32 %v3007_v46, %v7301_v63  ;;  %v3382_v0 = vld [vmem:[%s6984_s6 + $0x18] sm:$0xff] }
 0x921   :  { %v2939_v24 = vadd.f32 %v2938_v19, %v7299_v22  ;;  %v3010_v37 = vadd.f32 %v3009_v23, %v7599_v36  ;;  %v3384_v19 = vld [vmem:[%s6984_s6 + $0x28] sm:$0xff] }
 0x922   :  { %v3546_v28 = vmul.f32 -1.442695, %v2937_v15  ;;  %v3383_v15 = vld [vmem:[%s6984_s6 + $0x20] sm:$0xff] }
 0x923   :  { %v3547_v32 = vmul.f32 -1.442695, %v2939_v24  ;;  %v3548_v41 = vmul.f32 -1.442695, %v3010_v37  ;;  %v5151_v23 = vpack.c.bf16 %v3384_v19, %v3383_v15  ;;  %v3385_v24 = vld [vmem:[%s6984_s6 + $0x30] sm:$0xff]  ;;  %v3387_v37 = vld [vmem:[%s6984_s6 + $0x40] sm:$0xff] }
 0x924   :  { %5450 = vpow2.f32 %v3546_v28  ;;  %v3386_v28 = vld [vmem:[%s6984_s6 + $0x38] sm:$0xff] }
 0x925   :  { %5452 = vpow2.f32 %v3547_v32  ;;  %v5154_v32 = vpack.c.bf16 %v3386_v28, %v3385_v24 }
 0x926   :  { %5454 = vpow2.f32 %v3548_v41  ;;  %v3388_v41 = vld [vmem:[%s6984_s6 + $0x48] sm:$0xff] }
 0x927   :  { %5456 = vtanh.f32 %v3008_v45  ;;  %v5157_v45 = vpack.c.bf16 %v3388_v41, %v3387_v37 }
 0x92e   :  { %v5451_v49 = vpop.eup %5450 }
 0x92f   :  { %v5453_v53 = vpop.eup %5452  ;;  %v3015_v56 = vadd.f32 1.0, %v5451_v49  ;;  %v3389_v49 = vld [vmem:[%s6984_s6 + $0x50] sm:$0xff] }
 0x930   :  { %v3021_v60 = vadd.f32 1.0, %v5453_v53  ;;  %v5455_v1 = vpop.eup %5454  ;;  %v3390_v53 = vld [vmem:[%s6984_s6 + $0x58] sm:$0xff] }
 0x931   :  { %5458 = vrcp.f32 %v3015_v56  ;;  %v5457_v4 = vpop.eup %5456  ;;  %v3028_v21 = vadd.f32 1.0, %v5455_v1  ;;  %v3391_v56 = vld [vmem:[%s6984_s6 + $0x60] sm:$0xff]  ;;  %v3392_v1 = vld [vmem:[%s6984_s6 + $0x68] sm:$0xff] }
 0x932   :  { %5460 = vrcp.f32 %v3021_v60  ;;  %v5160_v60 = vpack.c.bf16 %v3390_v53, %v3389_v49 }
 0x933   :  { %5462 = vrcp.f32 %v3028_v21 }
 0x93b   :  { %v5459_v7 = vpop.eup %5458 }
 0x93c   :  { %v5461_v12 = vpop.eup %5460  ;;  %v3032_v17 = vmul.f32 %v5459_v7, %v5457_v4  ;;  %v5163_v4 = vpack.c.bf16 %v3392_v1, %v3391_v56  ;;  %v3393_v7 = vld [vmem:[%s6984_s6 + $0x70] sm:$0xff] }
 0x93d   :  { %v3031_v26 = vmul.f32 %v5461_v12, %v6798_v11  ;;  %v5463_v11 = vpop.eup %5462  ;;  %v3394_v12 = vld [vmem:[%s6984_s6 + $0x78] sm:$0xff] }
 0x93f   :  { %v3109_v30 = vpop.f32.mrb[14].mxu0  ;;  %v3180_v35 = vpop.f32.mrb[14].mxu1  ;;  %v6910_v40 = vadd.f32 %v3032_v17, %v3031_v26  ;;  %v5166_v17 = vpack.c.bf16 %v3394_v12, %v3393_v7 }
 0x940   :  { %v5182_v50 = vadd.f32 %v3109_v30, %v7600_v44  ;;  %v3111_v55 = vpop.f32.mrb[15].mxu0  ;;  %v3182_v61 = vpop.f32.mrb[15].mxu1  ;;  %v5198_v38 = vadd.f32 %v3180_v35, %v6104_v20 }
 0x941   :  { %v5183_v2 = vadd.f32 %v3111_v55, %v7242_v18  ;;  %5464 = vtanh.f32 %v6910_v40  ;;  %v5199_v25 = vadd.f32 %v3182_v61, %v7601_v13 }
 0x942   :  { %v3549_v3 = vmul.f32 -1.442695, %v5182_v50 }
 0x943   :  { %v3550_v5 = vmul.f32 -1.442695, %v5183_v2  ;;  %v3551_v29 = vmul.f32 -1.442695, %v5199_v25 }
 0x944   :  { %5466 = vpow2.f32 %v3549_v3 }
 0x945   :  { %5468 = vpow2.f32 %v3550_v5 }
 0x946   :  { %5470 = vpow2.f32 %v3551_v29 }
 0x947   :  { %5472 = vtanh.f32 %v5198_v38 }
 0x94b   :  { %v5465_v27 = vpop.eup %5464 }
 0x94c   :  { %v3035_v48 = vmul.f32 %v5465_v27, %v5463_v11 }
 0x94e   :  { %v5467_v51 = vpop.eup %5466  ;;  %3277 = vmatprep.mubr.f32.mxu0 %v3035_v48  ;;  %3348 = vmatprep.mubr.f32.mxu1 %v3035_v48 }
 0x94f   :  { %v5469_v52 = vpop.eup %5468  ;;  %v3192_v59 = vadd.f32 1.0, %v5467_v51 }
 0x950   :  { %v3198_v18 = vadd.f32 1.0, %v5469_v52  ;;  %v5471_v43 = vpop.eup %5470 }
 0x951   :  { %5474 = vrcp.f32 %v3192_v59  ;;  %v5473_v16 = vpop.eup %5472  ;;  %v3205_v6 = vadd.f32 1.0, %v5471_v43 }
 0x952   :  { %5476 = vrcp.f32 %v3198_v18  ;;  %v3555_v18 = vld [vmem:[%s6985_s7] ss:$0 sm:$0xff] }
 0x953   :  { %5478 = vrcp.f32 %v3205_v6 }
 0x95b   :  { %v5475_v10 = vpop.eup %5474 }
 0x95c   :  { %v5477_v9 = vpop.eup %5476  ;;  %v3209_v57 = vmul.f32 %v5475_v10, %v5473_v16 }
 0x95d   :  { %v3208_v42 = vmul.f32 %v5477_v9, %v6806_v62  ;;  %v5479_v31 = vpop.eup %5478  ;;  %v3381_v62 = vld [vmem:[%s6984_s6 + $0x10] sm:$0xff] }
 0x95e   :  { %v5148_v46 = vpack.c.bf16 %v3382_v0, %v3381_v62 }
 0x95f   :  { %v3210_v20 = vadd.f32 %v3209_v57, %v3208_v42 }
 0x961   :  { %5480 = vtanh.f32 %v3210_v20 }
 0x96b   :  { %v5481_v47 = vpop.eup %5480 }
 0x96c   :  { %v3212_v8 = vmul.f32 %v5481_v47, %v5479_v31 }
 0x96e   :  { %3278 = vmatmul.mubr.f32.vlgmr.msra.gmra.mrb[30].mxu0 %v3212_v8  ;;  %3349 = vmatmul.mubr.f32.vlgmr.msra.gmra.mrb[30].mxu1 %v3212_v8 }
 0x96f   :  { %5146 = vmatpush3.bf16.msra.mxu0 %v5145_v54  ;;  %3605 = vmatprep.mubr.msk.f32.mxu0 %vm5623_vm2, %v7181_v58 }
 0x970   :  { %5147 = vmatprep.subr.bf16.mxu0 %v5622_v33 }
 0x973   :  { %5149 = vmatpush3.bf16.msra.mxu0 %v5148_v46 }
 0x974   :  { %5150 = vmatprep.subr.bf16.mxu0 %v5622_v33 }
 0x977   :  { %5152 = vmatpush3.bf16.msra.mxu0 %v5151_v23 }
 0x978   :  { %5153 = vmatprep.subr.bf16.mxu0 %v5622_v33 }
 0x97b   :  { %5155 = vmatpush3.bf16.msra.mxu0 %v5154_v32 }
 0x97c   :  { %5156 = vmatprep.subr.bf16.mxu0 %v5622_v33 }
 0x97f   :  { %5158 = vmatpush3.bf16.msra.mxu0 %v5157_v45 }
 0x980   :  { %5159 = vmatprep.subr.bf16.mxu0 %v5622_v33 }
 0x983   :  { %5161 = vmatpush3.bf16.msra.mxu0 %v5160_v60 }
 0x984   :  { %5162 = vmatprep.subr.bf16.mxu0 %v5622_v33 }
 0x987   :  { %5164 = vmatpush3.bf16.msra.mxu0 %v5163_v4 }
 0x988   :  { %5165 = vmatprep.subr.bf16.mxu0 %v5622_v33 }
 0x98b   :  { %5167 = vmatpush3.bf16.msra.mxu0 %v5166_v17 }
 0xa41   :  { %v3279_v21 = vpop.f32.mrb[30].mxu0  ;;  %v3350_v26 = vpop.f32.mrb[30].mxu1 }
 0xa42   :  { %v3280_v30 = vadd.f32 %v3279_v21, %v7598_v34  ;;  %v3281_v58 = vpop.f32.mrb[31].mxu0  ;;  %v3352_v35 = vpop.f32.mrb[31].mxu1  ;;  %v3351_v3 = vadd.f32 %v3350_v26, %v7301_v63 }
 0xa43   :  { %v3282_v44 = vadd.f32 %v3281_v58, %v7299_v22  ;;  %v3353_v61 = vadd.f32 %v3352_v35, %v7599_v36 }
 0xa44   :  { %v3552_v50 = vmul.f32 -1.442695, %v3280_v30 }
 0xa45   :  { %v3553_v55 = vmul.f32 -1.442695, %v3282_v44  ;;  %v3554_v2 = vmul.f32 -1.442695, %v3353_v61 }
 0xa46   :  { %5482 = vpow2.f32 %v3552_v50 }
 0xa47   :  { %5484 = vpow2.f32 %v3553_v55 }
 0xa48   :  { %5486 = vpow2.f32 %v3554_v2 }
 0xa49   :  { %5488 = vtanh.f32 %v3351_v3 }
 0xa50   :  { %v5483_v5 = vpop.eup %5482 }
 0xa51   :  { %v5485_v13 = vpop.eup %5484  ;;  %v3358_v25 = vadd.f32 1.0, %v5483_v5 }
 0xa52   :  { %v3364_v11 = vadd.f32 1.0, %v5485_v13  ;;  %v5487_v34 = vpop.eup %5486 }
 0xa53   :  { %5490 = vrcp.f32 %v3358_v25  ;;  %v5489_v27 = vpop.eup %5488  ;;  %v3371_v48 = vadd.f32 1.0, %v5487_v34 }
 0xa54   :  { %5492 = vrcp.f32 %v3364_v11 }
 0xa55   :  { %5494 = vrcp.f32 %v3371_v48 }
 0xa5d   :  { %v5491_v22 = vpop.eup %5490 }
 0xa5e   :  { %v5493_v29 = vpop.eup %5492  ;;  %v3375_v38 = vmul.f32 %v5491_v22, %v5489_v27 }
 0xa5f   :  { %v3374_v51 = vmul.f32 %v5493_v29, %v6910_v40  ;;  %v5495_v63 = vpop.eup %5494 }
 0xa61   :  { %v3376_v36 = vadd.f32 %v3375_v38, %v3374_v51 }
 0xa63   :  { %5496 = vtanh.f32 %v3376_v36 }
 0xa6d   :  { %v5497_v52 = vpop.eup %5496 }
 0xa6e   :  { %v3378_v59 = vmul.f32 %v5497_v52, %v5495_v63 }
 0xa70   :  { %3606 = vmatmul.mubr.f32.vlgmr.msra.gmra.mrb[32].mxu0 %v3378_v59 }
 0xb43   :  { %v3468_v43 = vpop.f32.mrb[32].mxu0 }
 0xb44   :  { %v3469_v16 = vadd.f32 %v3555_v18, %v3468_v43  ;;  %v3607_v10 = vpop.f32.mrb[33].mxu0 }
 0xb46   :  { %3472 = vst [vmem:[%s6986_s8] sm:$0xff] %v3469_v16 }
 0xb47   :  { %3477 = vsyncpa [#allocation4], 1 }
 0xb48   :  { %3478 = vsyncpa [#allocation6], 1 }
 0xb49   :  { %3479 = vsyncpa [#allocation9], 1 }

</bundles_post_ra>
